<compile_context>
chip_gen: v7x
topology: tpu7x:2x2x1
jax: 0.10.0
libtpu: 0.0.40
codegen_flags: <defaults>
</compile_context>

<pallas_src>
import functools

import jax
import jax.numpy as jnp
from jax import lax
from jax.experimental import pallas as pl
from jax.experimental.pallas import tpu as pltpu


# ---------------------------------------------------------------------------
# Parameter construction (deterministic, mirrors HyVEConv.__init__/initialize)
# ---------------------------------------------------------------------------
def _kaiming_normal(key, shape, fan_in):
    std = (2.0 / fan_in) ** 0.5
    return std * jax.random.normal(key, shape, dtype=jnp.float32)


def make_gauss_params(num_of_wrois, wl_min, wl_range):
    # "equally_distributed=True": means equally spaced over the wavelength range
    means = wl_min + (jnp.arange(num_of_wrois, dtype=jnp.float32) + 0.5) * (
        wl_range / num_of_wrois
    )
    sigmas = jnp.full(
        (num_of_wrois,), wl_range / (2.0 * num_of_wrois), dtype=jnp.float32
    )
    return means, sigmas


def gauss_features(channel_wavelengths, means, sigmas):
    # TODO(synk): GaussDistributionModule source was not provided; implemented as
    # equally spaced Gaussians exp(-(lambda-mu)^2 / (2 sigma^2)) per channel.
    d = channel_wavelengths[:, None] - means[None, :]
    return jnp.exp(-(d * d) / (2.0 * sigmas[None, :] ** 2))  # (Cin, G)


def init_hyve_conv(key, num_of_wrois, wavelength_range, out_channels, kernel_size,
                   enable_extension=True):
    kh, kw = kernel_size
    k1, k2, k3 = jax.random.split(key, 3)
    params = {
        # kaiming_normal_(mode='fan_in') on (G, Cout, KH, KW): fan_in = Cout*KH*KW
        "kernel_weights_individual": _kaiming_normal(
            k1, (num_of_wrois, out_channels, kh, kw), out_channels * kh * kw
        ),
        "bias": jnp.zeros((out_channels,), jnp.float32),
    }
    if enable_extension:
        params["kernel_weights_channelwise"] = _kaiming_normal(
            k2, (1, out_channels, kh, kw), out_channels * kh * kw
        )
        params["kernel_weights_channelwise_factor"] = jnp.float32(0.1)
        params["kernel_weights_convwise"] = _kaiming_normal(
            k3, (1, 1, kh, kw), kh * kw
        )
        params["kernel_weights_convwise_factor"] = jnp.float32(0.1)
    means, sigmas = make_gauss_params(
        num_of_wrois, wavelength_range[0], wavelength_range[1] - wavelength_range[0]
    )
    params["gauss_means"] = means
    params["gauss_sigmas"] = sigmas
    return params


# ---------------------------------------------------------------------------
# Pallas conv kernel: im2col into VMEM scratch + single MXU matmul per tile.
#
#   x_ref : (1, Hp, Wp, Cin)   padded NHWC input, resident per batch (bf16)
#   w_ref : (Cout, K)          K = KH*KW*Cin, resident (bf16)
#   b_ref : (Cout, 1)          f32 bias
#   o_ref : (1, Cout, TH*Wo)   NCHW output row-tile, flattened spatial = lanes
#   p_ref : (TH*Wo, K)         im2col patch scratch (bf16)
# ---------------------------------------------------------------------------
def _hyve_conv_kernel(x_ref, w_ref, b_ref, o_ref, p_ref, *,
                      cin, kh, kw, dh, dw, th, wo):
    r = pl.program_id(1)
    row0 = pl.multiple_of(r * th, th)
    s = th * wo

    # im2col: one pass over the window, 9 (KH*KW) slab copies into the patch.
    for ki in range(kh):
        for kj in range(kw):
            tap = ki * kw + kj
            xs = x_ref[0, pl.ds(row0 + ki * dh, th), pl.ds(kj * dw, wo), :]
            # (TH, Wo, Cin) -> (TH*Wo, Cin): lane dim (Cin) unchanged.
            p_ref[:, pl.ds(tap * cin, cin)] = xs.reshape(s, cin)

    # Single matmul, contraction K = KH*KW*Cin, f32 accumulation on the MXU.
    acc = jnp.dot(w_ref[...], p_ref[...].T, preferred_element_type=jnp.float32)
    acc = acc + b_ref[...]          # f32 bias add (kept f32 for v5e's VPU)
    o_ref[0] = acc.astype(o_ref.dtype)


def _vmem_capacity_bytes():
    try:
        return int(pltpu.get_tpu_info().vmem_capacity_bytes)
    except Exception:  # noqa: BLE001  (older runtimes / interpret mode)
        return None


def _pick_row_tile(ho, wo, cin, cout, k, hp, wp, c_itemsize, o_itemsize, budget):
    """Largest row tile TH dividing Ho that keeps the tiles in the VMEM budget
    and keeps the output lane dim (TH*Wo) a multiple of 128 (or full extent)."""
    resident = (2 * hp * wp * cin * c_itemsize        # input block (double-buffered)
                + cout * k * c_itemsize + cout * 4)   # weight + bias (resident)
    valid = [d for d in range(1, ho + 1)
             if ho % d == 0 and (d == ho or (d * wo) % 128 == 0)]
    if not valid:
        valid = [ho]
    for th in sorted(valid, reverse=True):
        s = th * wo
        tile = (2 * cout * s * o_itemsize      # output double buffer
                + s * k * c_itemsize           # patch scratch
                + cout * s * 4)                # f32 accumulator headroom
        if resident + tile <= budget:
            return th
    return valid[0]


def hyve_conv2d_pallas(x, weight_oihw, bias, *, stride=(1, 1), padding=(0, 0),
                       dilation=(1, 1), compute_dtype=jnp.bfloat16,
                       row_tile=None):
    if tuple(stride) != (1, 1):
        # TODO(synk): stride > 1 needs strided output indexing; not implemented.
        raise NotImplementedError("hyve_conv2d_pallas only supports stride=1")
    n, cin, h, w = x.shape
    cout, cin_w, kh, kw = weight_oihw.shape
    assert cin == cin_w, (cin, cin_w)
    ph, pw = padding
    dh, dw = dilation
    ho = h + 2 * ph - dh * (kh - 1)
    wo = w + 2 * pw - dw * (kw - 1)
    hp, wp = h + 2 * ph, w + 2 * pw
    k = kh * kw * cin

    # Single fused XLA pass on the input: NCHW->NHWC + zero pad + MXU dtype cast.
    # TODO(synk): fold this into halo'd row-tile DMAs (pl.ANY + make_async_copy).
    x_prep = jnp.pad(
        jnp.transpose(x, (0, 2, 3, 1)).astype(compute_dtype),
        ((0, 0), (ph, ph), (pw, pw), (0, 0)),
    )
    # Weight reordered so column index = (ki*KW + kj)*Cin + ci, matching im2col.
    w2 = jnp.transpose(weight_oihw, (0, 2, 3, 1)).reshape(cout, k).astype(compute_dtype)
    b2 = bias.reshape(cout, 1).astype(jnp.float32)

    cap = _vmem_capacity_bytes()
    if cap is None:
        vmem_limit = None
        budget = 16 * 2**20
    else:
        vmem_limit = min((cap * 3) // 4, 96 * 2**20)
        budget = vmem_limit // 2

    c_itemsize = jnp.dtype(compute_dtype).itemsize
    o_itemsize = jnp.dtype(x.dtype).itemsize
    th = row_tile if row_tile is not None else _pick_row_tile(
        ho, wo, cin, cout, k, hp, wp, c_itemsize, o_itemsize, budget
    )
    assert ho % th == 0, (ho, th)
    grid = (n, ho // th)

    cparams = dict(dimension_semantics=("parallel", "parallel"))
    if vmem_limit is not None:
        cparams["vmem_limit_bytes"] = int(vmem_limit)

    kernel = functools.partial(
        _hyve_conv_kernel, cin=cin, kh=kh, kw=kw, dh=dh, dw=dw, th=th, wo=wo
    )
    out_flat = pl.pallas_call(
        kernel,
        out_shape=jax.ShapeDtypeStruct((n, cout, ho * wo), x.dtype),
        grid_spec=pltpu.PrefetchScalarGridSpec(
            num_scalar_prefetch=0,
            grid=grid,
            in_specs=[
                # full padded image, resident across the row-tile axis
                pl.BlockSpec((1, hp, wp, cin), lambda b, r: (b, 0, 0, 0)),
                # weight / bias resident across the whole grid
                pl.BlockSpec((cout, k), lambda b, r: (0, 0)),
                pl.BlockSpec((cout, 1), lambda b, r: (0, 0)),
            ],
            out_specs=pl.BlockSpec((1, cout, th * wo), lambda b, r: (b, 0, r)),
            scratch_shapes=[pltpu.VMEM((th * wo, k), compute_dtype)],
        ),
        compiler_params=pltpu.CompilerParams(**cparams),
    )(x_prep, w2, b2)
    return out_flat.reshape(n, cout, ho, wo)


# ---------------------------------------------------------------------------
# HyVEConv forward (single channel-wavelength definition path)
# ---------------------------------------------------------------------------
def hyve_conv_forward(params, x, channel_wavelengths, *, padding=(0, 0),
                      dilation=(1, 1), stride=(1, 1), enable_extension=True,
                      use_bias=True, compute_dtype=jnp.bfloat16):
    # TODO(synk): the multi-channel-definition branch (2-D channel_wavelengths,
    # per-sample padding-channel removal) is data-dependent per sample; only the
    # single-definition path is implemented here.
    gnum, cout, kh, kw = params["kernel_weights_individual"].shape
    cin = channel_wavelengths.shape[0]
    assert x.shape[1] == cin

    feats = gauss_features(
        channel_wavelengths, params["gauss_means"], params["gauss_sigmas"]
    )  # (Cin, G)

    kernel = params["kernel_weights_individual"]
    if enable_extension:
        kernel = kernel + params["kernel_weights_convwise_factor"] * jnp.broadcast_to(
            params["kernel_weights_convwise"], kernel.shape
        )
        kernel = kernel + params["kernel_weights_channelwise_factor"] * jnp.broadcast_to(
            params["kernel_weights_channelwise"], kernel.shape
        )

    # Tiny (Cin, G) @ (G, Cout*KH*KW) weight prediction stays in plain XLA — a
    # dedicated pallas_call would cost more (launch + HBM round trip) than the
    # matmul itself, and XLA fuses it with the surrounding reshapes.
    w_flat = feats @ kernel.reshape(gnum, -1)
    weight = jnp.transpose(
        w_flat.reshape(cin, cout, kh, kw), (1, 0, 2, 3)
    )  # (Cout, Cin, KH, KW) == predict_kernel().permute(1,0,2,3)

    bias = params["bias"] if use_bias else jnp.zeros((cout,), jnp.float32)
    out = hyve_conv2d_pallas(
        x, weight, bias, stride=stride, padding=padding, dilation=dilation,
        compute_dtype=compute_dtype,
    )
    return out, weight


# ---------------------------------------------------------------------------
# Demo / self-check
# ---------------------------------------------------------------------------
if __name__ == "__main__":
    key = jax.random.PRNGKey(0)
    kx, kp, kb = jax.random.split(key, 3)

    # small shapes: batch=2, in-channels=4, spatial=16x16
    N, CIN, H, W = 2, 4, 16, 16
    G, COUT, KH, KW = 5, 8, 3, 3
    WL_RANGE = (400.0, 1000.0)
    PADDING = (1, 1)

    x = jax.random.normal(kx, (N, CIN, H, W), dtype=jnp.float32)
    channel_wavelengths = jnp.array([450.0, 600.0, 750.0, 900.0], dtype=jnp.float32)

    params = init_hyve_conv(kp, G, WL_RANGE, COUT, (KH, KW), enable_extension=True)
    # non-zero bias so the bias path is actually exercised
    params["bias"] = 0.1 * jax.random.normal(kb, (COUT,), dtype=jnp.float32)

    fwd = jax.jit(
        lambda p, xx, wl: hyve_conv_forward(p, xx, wl, padding=PADDING,
                                            enable_extension=True)
    )
    out, weight = fwd(params, x, channel_wavelengths)
    out = jax.block_until_ready(out)
    assert out.shape == (N, COUT, H, W), out.shape

    # Reference: same predicted weight, operands rounded to bf16 exactly like
    # the kernel's MXU inputs, conv + bias in f32.
    x_q = x.astype(jnp.bfloat16).astype(jnp.float32)
    w_q = weight.astype(jnp.bfloat16).astype(jnp.float32)
    ref = lax.conv_general_dilated(
        x_q, w_q, window_strides=(1, 1),
        padding=[(PADDING[0], PADDING[0]), (PADDING[1], PADDING[1])],
        dimension_numbers=("NCHW", "OIHW", "NCHW"),
    ) + params["bias"][None, :, None, None]

    err = float(jnp.max(jnp.abs(out - ref)))
    assert jnp.allclose(out, ref, atol=1e-2, rtol=1e-2), err
    print("KERNEL_OK")
</pallas_src>

<mosaic_0001>
module attributes {stable_mosaic.version = 11 : i64} {
  func.func @_hyve_conv_kernel(%arg0: i32, %arg1: i32, %arg2: memref<1x18x18x4xbf16, #tpu.memory_space<vmem>>, %arg3: memref<8x36xbf16, #tpu.memory_space<vmem>>, %arg4: memref<8x1xf32, #tpu.memory_space<vmem>>, %arg5: memref<1x8x256xf32, #tpu.memory_space<vmem>>, %arg6: memref<256x36xbf16, #tpu.memory_space<vmem>>) attributes {dimension_semantics = [#tpu.dimension_semantics<parallel>, #tpu.dimension_semantics<parallel>], iteration_bounds = array<i64: 2, 1>, scalar_prefetch = 0 : i64, scratch_operands = 1 : i64, tpu.core_type = #tpu.core_type<tc>, window_params = [{transform_indices = @transform_0, window_bounds = array<i64: 1, 18, 18, 4>}, {pipeline_mode = #tpu.pipeline_mode<synchronous>, transform_indices = @transform_1, window_bounds = array<i64: 8, 36>}, {pipeline_mode = #tpu.pipeline_mode<synchronous>, transform_indices = @transform_2, window_bounds = array<i64: 8, 1>}, {transform_indices = @transform_3, window_bounds = array<i64: 1, 8, 256>}]} {
    %c16_i32 = arith.constant 16 : i32
    %0 = arith.muli %arg1, %c16_i32 : i32
    %1 = tpu.assume_multiple %0, 16 : i32
    %c0_i32 = arith.constant 0 : i32
    %2 = arith.addi %1, %c0_i32 : i32
    %c0 = arith.constant 0 : index
    %3 = arith.index_cast %2 : i32 to index
    %c0_0 = arith.constant 0 : index
    %c0_1 = arith.constant 0 : index
    %4 = vector.load %arg2[%c0, %3, %c0_0, %c0_1] : memref<1x18x18x4xbf16, #tpu.memory_space<vmem>>, vector<1x16x16x4xbf16>
    %5 = vector.shape_cast %4 : vector<1x16x16x4xbf16> to vector<16x16x4xbf16>
    %6 = vector.shape_cast %5 : vector<16x16x4xbf16> to vector<256x4xbf16>
    %c0_2 = arith.constant 0 : index
    %c0_3 = arith.constant 0 : index
    %7 = vector.load %arg6[%c0_2, %c0_3] : memref<256x36xbf16, #tpu.memory_space<vmem>>, vector<256x4xbf16>
    tpu.vector_store %arg6[%c0_2, %c0_3], %6 {strides = array<i32>} : memref<256x36xbf16, #tpu.memory_space<vmem>>, vector<256x4xbf16>,
    %c0_i32_4 = arith.constant 0 : i32
    %8 = arith.addi %1, %c0_i32_4 : i32
    %c0_5 = arith.constant 0 : index
    %9 = arith.index_cast %8 : i32 to index
    %c1 = arith.constant 1 : index
    %c0_6 = arith.constant 0 : index
    %10 = vector.load %arg2[%c0_5, %9, %c1, %c0_6] : memref<1x18x18x4xbf16, #tpu.memory_space<vmem>>, vector<1x16x16x4xbf16>
    %11 = vector.shape_cast %10 : vector<1x16x16x4xbf16> to vector<16x16x4xbf16>
    %12 = vector.shape_cast %11 : vector<16x16x4xbf16> to vector<256x4xbf16>
    %c0_7 = arith.constant 0 : index
    %c4 = arith.constant 4 : index
    %13 = vector.load %arg6[%c0_7, %c4] : memref<256x36xbf16, #tpu.memory_space<vmem>>, vector<256x4xbf16>
    tpu.vector_store %arg6[%c0_7, %c4], %12 {strides = array<i32>} : memref<256x36xbf16, #tpu.memory_space<vmem>>, vector<256x4xbf16>,
    %c0_i32_8 = arith.constant 0 : i32
    %14 = arith.addi %1, %c0_i32_8 : i32
    %c0_9 = arith.constant 0 : index
    %15 = arith.index_cast %14 : i32 to index
    %c2 = arith.constant 2 : index
    %c0_10 = arith.constant 0 : index
    %16 = vector.load %arg2[%c0_9, %15, %c2, %c0_10] : memref<1x18x18x4xbf16, #tpu.memory_space<vmem>>, vector<1x16x16x4xbf16>
    %17 = vector.shape_cast %16 : vector<1x16x16x4xbf16> to vector<16x16x4xbf16>
    %18 = vector.shape_cast %17 : vector<16x16x4xbf16> to vector<256x4xbf16>
    %c0_11 = arith.constant 0 : index
    %c8 = arith.constant 8 : index
    %19 = vector.load %arg6[%c0_11, %c8] : memref<256x36xbf16, #tpu.memory_space<vmem>>, vector<256x4xbf16>
    tpu.vector_store %arg6[%c0_11, %c8], %18 {strides = array<i32>} : memref<256x36xbf16, #tpu.memory_space<vmem>>, vector<256x4xbf16>,
    %c1_i32 = arith.constant 1 : i32
    %20 = arith.addi %1, %c1_i32 : i32
    %c0_12 = arith.constant 0 : index
    %21 = arith.index_cast %20 : i32 to index
    %c0_13 = arith.constant 0 : index
    %c0_14 = arith.constant 0 : index
    %22 = vector.load %arg2[%c0_12, %21, %c0_13, %c0_14] : memref<1x18x18x4xbf16, #tpu.memory_space<vmem>>, vector<1x16x16x4xbf16>
    %23 = vector.shape_cast %22 : vector<1x16x16x4xbf16> to vector<16x16x4xbf16>
    %24 = vector.shape_cast %23 : vector<16x16x4xbf16> to vector<256x4xbf16>
    %c0_15 = arith.constant 0 : index
    %c12 = arith.constant 12 : index
    %25 = vector.load %arg6[%c0_15, %c12] : memref<256x36xbf16, #tpu.memory_space<vmem>>, vector<256x4xbf16>
    tpu.vector_store %arg6[%c0_15, %c12], %24 {strides = array<i32>} : memref<256x36xbf16, #tpu.memory_space<vmem>>, vector<256x4xbf16>,
    %c1_i32_16 = arith.constant 1 : i32
    %26 = arith.addi %1, %c1_i32_16 : i32
    %c0_17 = arith.constant 0 : index
    %27 = arith.index_cast %26 : i32 to index
    %c1_18 = arith.constant 1 : index
    %c0_19 = arith.constant 0 : index
    %28 = vector.load %arg2[%c0_17, %27, %c1_18, %c0_19] : memref<1x18x18x4xbf16, #tpu.memory_space<vmem>>, vector<1x16x16x4xbf16>
    %29 = vector.shape_cast %28 : vector<1x16x16x4xbf16> to vector<16x16x4xbf16>
    %30 = vector.shape_cast %29 : vector<16x16x4xbf16> to vector<256x4xbf16>
    %c0_20 = arith.constant 0 : index
    %c16 = arith.constant 16 : index
    %31 = vector.load %arg6[%c0_20, %c16] : memref<256x36xbf16, #tpu.memory_space<vmem>>, vector<256x4xbf16>
    tpu.vector_store %arg6[%c0_20, %c16], %30 {strides = array<i32>} : memref<256x36xbf16, #tpu.memory_space<vmem>>, vector<256x4xbf16>,
    %c1_i32_21 = arith.constant 1 : i32
    %32 = arith.addi %1, %c1_i32_21 : i32
    %c0_22 = arith.constant 0 : index
    %33 = arith.index_cast %32 : i32 to index
    %c2_23 = arith.constant 2 : index
    %c0_24 = arith.constant 0 : index
    %34 = vector.load %arg2[%c0_22, %33, %c2_23, %c0_24] : memref<1x18x18x4xbf16, #tpu.memory_space<vmem>>, vector<1x16x16x4xbf16>
    %35 = vector.shape_cast %34 : vector<1x16x16x4xbf16> to vector<16x16x4xbf16>
    %36 = vector.shape_cast %35 : vector<16x16x4xbf16> to vector<256x4xbf16>
    %c0_25 = arith.constant 0 : index
    %c20 = arith.constant 20 : index
    %37 = vector.load %arg6[%c0_25, %c20] : memref<256x36xbf16, #tpu.memory_space<vmem>>, vector<256x4xbf16>
    tpu.vector_store %arg6[%c0_25, %c20], %36 {strides = array<i32>} : memref<256x36xbf16, #tpu.memory_space<vmem>>, vector<256x4xbf16>,
    %c2_i32 = arith.constant 2 : i32
    %38 = arith.addi %1, %c2_i32 : i32
    %c0_26 = arith.constant 0 : index
    %39 = arith.index_cast %38 : i32 to index
    %c0_27 = arith.constant 0 : index
    %c0_28 = arith.constant 0 : index
    %40 = vector.load %arg2[%c0_26, %39, %c0_27, %c0_28] : memref<1x18x18x4xbf16, #tpu.memory_space<vmem>>, vector<1x16x16x4xbf16>
    %41 = vector.shape_cast %40 : vector<1x16x16x4xbf16> to vector<16x16x4xbf16>
    %42 = vector.shape_cast %41 : vector<16x16x4xbf16> to vector<256x4xbf16>
    %c0_29 = arith.constant 0 : index
    %c24 = arith.constant 24 : index
    %43 = vector.load %arg6[%c0_29, %c24] : memref<256x36xbf16, #tpu.memory_space<vmem>>, vector<256x4xbf16>
    tpu.vector_store %arg6[%c0_29, %c24], %42 {strides = array<i32>} : memref<256x36xbf16, #tpu.memory_space<vmem>>, vector<256x4xbf16>,
    %c2_i32_30 = arith.constant 2 : i32
    %44 = arith.addi %1, %c2_i32_30 : i32
    %c0_31 = arith.constant 0 : index
    %45 = arith.index_cast %44 : i32 to index
    %c1_32 = arith.constant 1 : index
    %c0_33 = arith.constant 0 : index
    %46 = vector.load %arg2[%c0_31, %45, %c1_32, %c0_33] : memref<1x18x18x4xbf16, #tpu.memory_space<vmem>>, vector<1x16x16x4xbf16>
    %47 = vector.shape_cast %46 : vector<1x16x16x4xbf16> to vector<16x16x4xbf16>
    %48 = vector.shape_cast %47 : vector<16x16x4xbf16> to vector<256x4xbf16>
    %c0_34 = arith.constant 0 : index
    %c28 = arith.constant 28 : index
    %49 = vector.load %arg6[%c0_34, %c28] : memref<256x36xbf16, #tpu.memory_space<vmem>>, vector<256x4xbf16>
    tpu.vector_store %arg6[%c0_34, %c28], %48 {strides = array<i32>} : memref<256x36xbf16, #tpu.memory_space<vmem>>, vector<256x4xbf16>,
    %c2_i32_35 = arith.constant 2 : i32
    %50 = arith.addi %1, %c2_i32_35 : i32
    %c0_36 = arith.constant 0 : index
    %51 = arith.index_cast %50 : i32 to index
    %c2_37 = arith.constant 2 : index
    %c0_38 = arith.constant 0 : index
    %52 = vector.load %arg2[%c0_36, %51, %c2_37, %c0_38] : memref<1x18x18x4xbf16, #tpu.memory_space<vmem>>, vector<1x16x16x4xbf16>
    %53 = vector.shape_cast %52 : vector<1x16x16x4xbf16> to vector<16x16x4xbf16>
    %54 = vector.shape_cast %53 : vector<16x16x4xbf16> to vector<256x4xbf16>
    %c0_39 = arith.constant 0 : index
    %c32 = arith.constant 32 : index
    %55 = vector.load %arg6[%c0_39, %c32] : memref<256x36xbf16, #tpu.memory_space<vmem>>, vector<256x4xbf16>
    tpu.vector_store %arg6[%c0_39, %c32], %54 {strides = array<i32>} : memref<256x36xbf16, #tpu.memory_space<vmem>>, vector<256x4xbf16>,
    %c0_40 = arith.constant 0 : index
    %c0_41 = arith.constant 0 : index
    %56 = vector.load %arg3[%c0_40, %c0_41] : memref<8x36xbf16, #tpu.memory_space<vmem>>, vector<8x36xbf16>
    %c0_42 = arith.constant 0 : index
    %c0_43 = arith.constant 0 : index
    %57 = vector.load %arg6[%c0_42, %c0_43] : memref<256x36xbf16, #tpu.memory_space<vmem>>, vector<256x36xbf16>
    %58 = tpu.transpose %57, [1, 0] : vector<256x36xbf16> -> vector<36x256xbf16>
    %cst = arith.constant dense<0.000000e+00> : vector<8x256xf32>
    %59 = tpu.matmul %56, %58, %cst {dimension_numbers = #tpu.dot_dimension_numbers<[1], [0], [0], [1], [0, 0, 1, 1], [], []>} : vector<8x36xbf16>, vector<36x256xbf16>, vector<8x256xf32> -> vector<8x256xf32>
    %c0_44 = arith.constant 0 : index
    %c0_45 = arith.constant 0 : index
    %60 = vector.load %arg4[%c0_44, %c0_45] : memref<8x1xf32, #tpu.memory_space<vmem>>, vector<8x1xf32>
    %61 = vector.broadcast %60 : vector<8x1xf32> to vector<8x256xf32>
    %62 = arith.addf %59, %61 : vector<8x256xf32>
    %c0_46 = arith.constant 0 : index
    %c0_47 = arith.constant 0 : index
    %c0_48 = arith.constant 0 : index
    %63 = vector.load %arg5[%c0_46, %c0_47, %c0_48] : memref<1x8x256xf32, #tpu.memory_space<vmem>>, vector<1x8x256xf32>
    %64 = vector.shape_cast %63 : vector<1x8x256xf32> to vector<8x256xf32>
    %65 = vector.shape_cast %62 : vector<8x256xf32> to vector<1x8x256xf32>
    tpu.vector_store %arg5[%c0_46, %c0_47, %c0_48], %65 {strides = array<i32>} : memref<1x8x256xf32, #tpu.memory_space<vmem>>, vector<1x8x256xf32>,
    return
  }
  func.func @transform_0(%arg0: i32, %arg1: i32) -> (i32, i32, i32, i32) {
    %c0_i32 = arith.constant 0 : i32
    %c0_i32_0 = arith.constant 0 : i32
    %c0_i32_1 = arith.constant 0 : i32
    %c0_i32_2 = arith.constant 0 : i32
    return %arg0, %c0_i32, %c0_i32_0, %c0_i32_1 : i32, i32, i32, i32
  }
  func.func @transform_1(%arg0: i32, %arg1: i32) -> (i32, i32) {
    %c0_i32 = arith.constant 0 : i32
    %c0_i32_0 = arith.constant 0 : i32
    %c0_i32_1 = arith.constant 0 : i32
    return %c0_i32, %c0_i32_0 : i32, i32
  }
  func.func @transform_2(%arg0: i32, %arg1: i32) -> (i32, i32) {
    %c0_i32 = arith.constant 0 : i32
    %c0_i32_0 = arith.constant 0 : i32
    %c0_i32_1 = arith.constant 0 : i32
    return %c0_i32, %c0_i32_0 : i32, i32
  }
  func.func @transform_3(%arg0: i32, %arg1: i32) -> (i32, i32, i32) {
    %c0_i32 = arith.constant 0 : i32
    %c0_i32_0 = arith.constant 0 : i32
    return %arg0, %c0_i32, %arg1 : i32, i32, i32
  }
}

</mosaic_0001>

<bundles_post_ra>
// kernel: _lambda_.1
= control target key start
LH: loop header
LB: loop body
LE: loop exit
PB: predicated region body
PF: predicated region fallthrough
CT: control target
= control target key end

     0   :  { %s4141_s12 = smov 0   ;;  %s4143_s13 = smov 0   ;;  %s5247_s0 = inlined_call_operand.vmem [shape: bf16[2,18,18,4], index: 0, kind: input, shape index: {}]   ;;  %s5248_s1 = inlined_call_operand.vmem [shape: bf16[8,36], index: 1, kind: input, shape index: {}]   ;;  %s5249_s2 = inlined_call_operand.vmem [shape: f32[8,1], index: 2, kind: input, shape index: {}]   ;;  %s5250_s3 = inlined_call_operand.vmem [shape: f32[2,8,256], index: 3, kind: output, shape index: {}]  }
   0x1   :  { %s4145_s14 = smov 0  }
   0x2 LB: > { %s25_s15 = sadd.s32 1, %s4106_s13  ;;  %p3523_p0 = scmp.ge.s32.totalorder %s4110_s14, 1  ;;  %s4110_s14 = sphi %s4145_s14, %s13_s14   ;;  %s4106_s13 = sphi %s4143_s13, %s5256_s13   ;;  %s4102_s12 = sphi %s4141_s12, %s5255_s12  }
   0x3   : > { %p27_p1 = scmp.ge.s32.totalorder %s25_s15, 2  ;;  %p151_p2 = scmp.lt.s32.totalorder %s4110_s14, 3 }
   0x5   : > { %s5258_s15 = smov (%p27_p1, %s25_s15), 0  ;;  %p152_p3 = pnand %p3523_p0, %p151_p2 }
   0x6   : > { %p179_p4 = scmp.lt.s32.totalorder (!%p152_p3), %s4102_s12, 1  ;;  %vm988_vm0 = vcmask (!%p152_p3), 1042432   ;;  %vm989_vm1 = vcmask (!%p152_p3), 1046532   ;;  %s4112_s20 = smov (!%p152_p3), 12   ;;  %vm392_vm3 = vsmask.f32 (!%p152_p3), 3328 }
   0x7   : > { %155 = sbr.rel (%p152_p3) target bundleno = 663 (0x297), region = 32  ;;  %vm4167_vm2 = vmor (!%p152_p3), %vm988_vm0, %vm989_vm1  ;;  %vm393_vm4 = vsmask.f32 (!%p152_p3), 7440  ;;  %s4113_s21 = smov (!%p152_p3), 20   ;;  %vm327_vm6 = vcmask (!%p152_p3), 31744   ;;  %vm875_vm7 = vcmask (!%p152_p3), 64544  }
   0x8   : > { %s4114_s22 = smov (!%p152_p3), 8   ;;  %vm4208_vm5 = vmor (!%p152_p3), %vm392_vm3, %vm393_vm4  ;;  %s4115_s23 = smov (!%p152_p3), 4   ;;  %vm1199_vm8 = vcmask (!%p152_p3), 97344   ;;  %vm1380_vm9 = vcmask (!%p152_p3), 130144   ;;  %vm1925_vm10 = vcmask (!%p152_p3), 162944   ;;  %vm2246_vm11 = vcmask (!%p152_p3), 195744  }
   0x9   : > { %s4116_s24 = smov (!%p152_p3), 16   ;;  %s4117_s25 = smov (!%p152_p3), 24   ;;  %vm2427_vm12 = vcmask (!%p152_p3), 228544   ;;  %vm2972_vm13 = vcmask (!%p152_p3), 261344   ;;  %vm3293_vm14 = vcmask (!%p152_p3), 294144   ;;  %vm3333_vm15 = vcmask (!%p152_p3), 293888  }
   0xa   : > { %s4118_s26 = smov (!%p152_p3), 28   ;;  %s4119_s27 = smov (!%p152_p3), 32   ;;  %v5162_v53 = vld [vmem:[%s5248_s1] sm:$0xf] (!%p152_p3) }
   0xb   : > { %3995 = vmatprep.mubr.msk.bf16.mxu0 (!%p152_p3), %vm3333_vm15, %v5162_v53 }
   0xe   : > { %s5260_s12 = smov (!%p179_p4, %s4102_s12), 1 }
   0xf   : > { %s4005_s16 = smul.u32 216, %s5260_s12  ;;  %s3978_s5 = sshll.u32 %s5260_s12, 4 }
  0x10   : > { %s192_s8 = scalar_lea.vmem %s5250_s3, %s3978_s5 }
  0x11   : > { %s4165_s19 = scalar_lea.vmem %s5247_s0, %s4005_s16 }
  0x12   : > { %v4040_v1 = vld [vmem:[%s4165_s19 + $0x6c] sm:$0xff]   ;;  %v3705_v5 = vld [vmem:[%s4165_s19 + $0x14] sm:$0x1]  ;;  %v892_v9 = vld [vmem:[%s4165_s19] sm:$0xe] }
  0x13   : > { %v4041_v2 = vld [vmem:[%s4165_s19 + $0xc] sm:$0xff]   ;;  %1348 = vrot.lane.b32.xlu1 %v4040_v1, %s4112_s20  ;;  %v2043_v8 = vrot.slane %v3705_v5, 5  ;;  %v893_v10 = vld [vmem:[%s4165_s19 + $0x4] sm:$0xf]  ;;  %v894_v11 = vld [vmem:[%s4165_s19 + $0x8] sm:$0x1] }
  0x14   : > { %v3703_v3 = vld [vmem:[%s4165_s19 + $0xc] sm:$0xe]  ;;  %v3704_v4 = vld [vmem:[%s4165_s19 + $0x10] sm:$0xf]  ;;  %1332 = vrot.lane.b32.xlu0 %v4041_v2, %s4112_s20  ;;  %v3559_v12 = vrot.slane %v892_v9, 9  ;;  %v993_v15 = vrot.slane %v893_v10, 5 }
  0x15   : > { %v3751_v6 = vrot.slane %v3703_v3, 9  ;;  %v2040_v7 = vrot.slane %v3704_v4, 5  ;;  %v996_v16 = vrot.slane %v894_v11, 5  ;;  %v916_v17 = vld [vmem:[%s4165_s19 + $0x60] sm:$0xe] }
  0x16   : > { %v917_v18 = vld [vmem:[%s4165_s19 + $0x64] sm:$0xf]  ;;  %v918_v19 = vld [vmem:[%s4165_s19 + $0x68] sm:$0x1]  ;;  %v3567_v20 = vrot.slane %v916_v17, 9  ;;  %v994_v22 = vsel %vm4167_vm2, %v3559_v12, %v993_v15  ;;  %v995_v23 = vrot.slane %v993_v15, 4 }
  0x17   : > { %v2041_v13 = vsel %vm4167_vm2, %v3751_v6, %v2040_v7  ;;  %v2042_v14 = vrot.slane %v2040_v7, 4  ;;  %v1049_v24 = vrot.slane %v917_v18, 5  ;;  %v344_v25 = vld [vmem:[%s4165_s19] sm:$0xf]  ;;  %v345_v26 = vld [vmem:[%s4165_s19 + $0x4] sm:$0xf] }
  0x18   : > { %v1052_v28 = vrot.slane %v918_v19, 5  ;;  %v346_v29 = vld [vmem:[%s4165_s19 + $0x8] sm:$0x1]  ;;  %v396_v30 = vshrl.u32 %v344_v25, 16  ;;  %v399_v31 = vshll.u32 %v344_v25, 16  ;;  %v997_v32 = vsel %vm4167_vm2, %v995_v23, %v996_v16 }
  0x19   : > { %v2044_v21 = vsel %vm4167_vm2, %v2042_v14, %v2043_v8  ;;  %v1050_v33 = vsel %vm4167_vm2, %v3567_v20, %v1049_v24  ;;  %v1051_v34 = vrot.slane %v1049_v24, 4  ;;  %v405_v35 = vshll.u32 %v345_v26, 16  ;;  %v3727_v36 = vld [vmem:[%s4165_s19 + $0x6c] sm:$0xe]  ;;  %v3728_v37 = vld [vmem:[%s4165_s19 + $0x70] sm:$0xf] }
  0x1a   : > { %v3767_v27 = vcombine.low %v2041_v13, %v2044_v21  ;;  %v3575_v38 = vcombine.low %v994_v22, %v997_v32  ;;  %v398_v39 = vrot.slane %v396_v30, 4  ;;  %v401_v40 = vrot.slane %v399_v31, 5  ;;  %v3729_v42 = vld [vmem:[%s4165_s19 + $0x74] sm:$0x1]  ;;  %v368_v47 = vld [vmem:[%s4165_s19 + $0x60] sm:$0xf] }
  0x1b   : > { %v409_v41 = vshrl.u32 %v345_v26, 16  ;;  %v1053_v43 = vsel %vm4167_vm2, %v1051_v34, %v1052_v28  ;;  %v407_v44 = vrot.slane %v405_v35, 5  ;;  %v415_v45 = vshll.u32 %v346_v29, 16  ;;  %v369_v52 = vld [vmem:[%s4165_s19 + $0x64] sm:$0xf] }
  0x1c   : > { %2198 = vrot.lane.b32.xlu0 %v3767_v27, %s4113_s21  ;;  %v3759_v46 = vrot.slane %v3727_v36, 9  ;;  %1151 = vrot.lane.b32.xlu1 %v3575_v38, %s4114_s22  ;;  %v3583_v48 = vcombine.low %v1050_v33, %v1053_v43  ;;  %v402_v49 = vor.u32 %v401_v40, %v398_v39  ;;  %v2096_v51 = vrot.slane %v3728_v37, 5  ;;  %v370_v56 = vld [vmem:[%s4165_s19 + $0x68] sm:$0x1]  ;;  %v3663_v63 = vld [vmem:[%s4165_s19 + $0x6c] sm:$0xf] }
  0x1d   : > { %v411_v50 = vrot.slane %v409_v41, 4  ;;  %v417_v54 = vrot.slane %v415_v45, 5  ;;  %v2099_v55 = vrot.slane %v3729_v42, 5  ;;  %v588_v57 = vshrl.u32 %v368_v47, 16  ;;  %v3664_v5 = vld [vmem:[%s4165_s19 + $0x70] sm:$0xf] }
  0x1e   : > { %v591_v58 = vshll.u32 %v368_v47, 16  ;;  %v403_v59 = vrot.slane %v402_v49, 4  ;;  %v2097_v61 = vsel %vm4167_vm2, %v3759_v46, %v2096_v51  ;;  %v2098_v62 = vrot.slane %v2096_v51, 4  ;;  %v3665_v10 = vld [vmem:[%s4165_s19 + $0x74] sm:$0x1] }
  0x1f   : > { %v412_v60 = vor.u32 %v411_v50, %v407_v44  ;;  %v590_v1 = vrot.slane %v588_v57, 4  ;;  %v597_v3 = vshll.u32 %v369_v52, 16  ;;  %v601_v4 = vshrl.u32 %v369_v52, 16  ;;  %v3639_v11 = vld [vmem:[%s4165_s19 + $0xc] sm:$0xf] }
  0x20   : > { %v593_v2 = vrot.slane %v591_v58, 5  ;;  %1167 = vrot.lane.b32.xlu1 %v3583_v48, %s4114_s22  ;;  %v408_v6 = vsel %vm4208_vm5, %v403_v59, %v407_v44  ;;  %v2100_v8 = vsel %vm4167_vm2, %v2098_v62, %v2099_v55  ;;  %v607_v9 = vshll.u32 %v370_v56, 16  ;;  %v3640_v28 = vld [vmem:[%s4165_s19 + $0x10] sm:$0xf]  ;;  %v3641_v32 = vld [vmem:[%s4165_s19 + $0x14] sm:$0x1] }
  0x21   : > { %v413_v7 = vrot.slane %v412_v60, 4  ;;  %v3775_v12 = vcombine.low %v2097_v61, %v2100_v8  ;;  %v599_v14 = vrot.slane %v597_v3, 5  ;;  %v603_v15 = vrot.slane %v601_v4, 4  ;;  %v3855_v38 = vld [vmem:[%s4165_s19 + $0x78] sm:$0xf] }
  0x22   : > { %v594_v13 = vor.u32 %v593_v2, %v590_v1  ;;  %v609_v17 = vrot.slane %v607_v9, 5  ;;  %v1638_v18 = vshrl.u32 %v3663_v63, 16  ;;  %v1641_v19 = vshll.u32 %v3663_v63, 16  ;;  %v3856_v47 = vld [vmem:[%s4165_s19 + $0x7c] sm:$0xf] }
  0x23   : > { %v418_v16 = vsel %vm4208_vm5, %v413_v7, %v417_v54  ;;  %v604_v22 = vor.u32 %v603_v15, %v599_v14  ;;  %v1647_v23 = vshll.u32 %v3664_v5, 16  ;;  %v1651_v26 = vshrl.u32 %v3664_v5, 16  ;;  %v3857_v56 = vld [vmem:[%s4165_s19 + $0x80] sm:$0x1]  ;;  %v3831_v62 = vld [vmem:[%s4165_s19 + $0x18] sm:$0xf] }
  0x24   : > { %v3543_v20 = vcombine.low %v408_v6, %v418_v16  ;;  %v595_v21 = vrot.slane %v594_v13, 4  ;;  %2214 = vrot.lane.b32.xlu1 %v3775_v12, %s4113_s21  ;;  %v1640_v24 = vrot.slane %v1638_v18, 4  ;;  %v1643_v25 = vrot.slane %v1641_v19, 5  ;;  %v3832_v4 = vld [vmem:[%s4165_s19 + $0x1c] sm:$0xf] }
  0x25   : > { %v1657_v27 = vshll.u32 %v3665_v10, 16  ;;  %v605_v30 = vrot.slane %v604_v22, 4  ;;  %v1649_v31 = vrot.slane %v1647_v23, 5  ;;  %v1446_v33 = vshrl.u32 %v3639_v11, 16  ;;  %v3833_v12 = vld [vmem:[%s4165_s19 + $0x20] sm:$0x1] }
  0x26   : > { %827 = vrot.lane.b32.xlu0 %v3543_v20, %s4115_s23  ;;  %v600_v29 = vsel %vm4208_vm5, %v595_v21, %v599_v14  ;;  %v1644_v34 = vor.u32 %v1643_v25, %v1640_v24  ;;  %v1653_v35 = vrot.slane %v1651_v26, 4  ;;  %v1449_v37 = vshll.u32 %v3639_v11, 16  ;;  %v3919_v14 = vld [vmem:[%s4165_s19 + $0x78] sm:$0xe]  ;;  %v3920_v20 = vld [vmem:[%s4165_s19 + $0x7c] sm:$0xf] }
  0x27   : > { %v1659_v36 = vrot.slane %v1657_v27, 5  ;;  %v610_v39 = vsel %vm4208_vm5, %v605_v30, %v609_v17  ;;  %v1448_v40 = vrot.slane %v1446_v33, 4  ;;  %v1455_v41 = vshll.u32 %v3640_v28, 16  ;;  %v4042_v16 = vld [vmem:[%s4165_s19 + $0x78] sm:$0xff]   ;;  %v3921_v25 = vld [vmem:[%s4165_s19 + $0x80] sm:$0x1] }
  0x28   : > { %v1459_v42 = vshrl.u32 %v3640_v28, 16  ;;  %v3551_v43 = vcombine.low %v600_v29, %v610_v39  ;;  %v1645_v44 = vrot.slane %v1644_v34, 4  ;;  %v1654_v45 = vor.u32 %v1653_v35, %v1649_v31  ;;  %v3895_v26 = vld [vmem:[%s4165_s19 + $0x18] sm:$0xe] }
  0x29   : > { %v1451_v46 = vrot.slane %v1449_v37, 5  ;;  %v1457_v48 = vrot.slane %v1455_v41, 5  ;;  %v1465_v50 = vshll.u32 %v3641_v32, 16  ;;  %v2685_v51 = vshrl.u32 %v3855_v38, 16  ;;  %v4043_v32 = vld [vmem:[%s4165_s19 + $0x18] sm:$0xff]  }
  0x2a   : > { %v1461_v49 = vrot.slane %v1459_v42, 4  ;;  %843 = vrot.lane.b32.xlu0 %v3551_v43, %s4115_s23  ;;  %v1650_v52 = vsel %vm4208_vm5, %v1645_v44, %v1649_v31  ;;  %v1655_v54 = vrot.slane %v1654_v45, 4  ;;  %v2688_v57 = vshll.u32 %v3855_v38, 16  ;;  %v3896_v31 = vld [vmem:[%s4165_s19 + $0x1c] sm:$0xf] }
  0x2b   : > { %v1452_v55 = vor.u32 %v1451_v46, %v1448_v40  ;;  %v1467_v59 = vrot.slane %v1465_v50, 5  ;;  %v2687_v60 = vrot.slane %v2685_v51, 4  ;;  %v2694_v61 = vshll.u32 %v3856_v47, 16  ;;  %v3897_v37 = vld [vmem:[%s4165_s19 + $0x20] sm:$0x1] }
  0x2c   : > { %v1462_v58 = vor.u32 %v1461_v49, %v1457_v48  ;;  %v1660_v63 = vsel %vm4208_vm5, %v1655_v54, %v1659_v36  ;;  %v2690_v2 = vrot.slane %v2688_v57, 5  ;;  %v2698_v3 = vshrl.u32 %v3856_v47, 16  ;;  %v371_v42 = vld [vmem:[%s4165_s19 + $0x6c] sm:$0xf]  ;;  %v372_v47 = vld [vmem:[%s4165_s19 + $0x70] sm:$0xf] }
  0x2d   : > { %v1453_v1 = vrot.slane %v1452_v55, 4  ;;  %v3695_v5 = vcombine.low %v1650_v52, %v1660_v63  ;;  %v2696_v7 = vrot.slane %v2694_v61, 5  ;;  %v2704_v8 = vshll.u32 %v3857_v56, 16  ;;  %v347_v54 = vld [vmem:[%s4165_s19 + $0xc] sm:$0xf] }
  0x2e   : > { %v1463_v6 = vrot.slane %v1462_v58, 4  ;;  %v2691_v10 = vor.u32 %v2690_v2, %v2687_v60  ;;  %v2700_v11 = vrot.slane %v2698_v3, 4  ;;  %v2493_v13 = vshrl.u32 %v3831_v62, 16 }
  0x2f   : > { %v1458_v9 = vsel %vm4208_vm5, %v1453_v1, %v1457_v48  ;;  %1893 = vrot.lane.b32.xlu1 %v3695_v5, %s4116_s24  ;;  %v2706_v17 = vrot.slane %v2704_v8, 5  ;;  %v2496_v18 = vshll.u32 %v3831_v62, 16  ;;  %v2502_v19 = vshll.u32 %v3832_v4, 16  ;;  %v373_v48 = vld [vmem:[%s4165_s19 + $0x74] sm:$0x1] }
  0x30   : > { %v1468_v15 = vsel %vm4208_vm5, %v1463_v6, %v1467_v59  ;;  %v2692_v22 = vrot.slane %v2691_v10, 4  ;;  %v2701_v23 = vor.u32 %v2700_v11, %v2696_v7  ;;  %v2495_v24 = vrot.slane %v2493_v13, 4  ;;  %v349_v8 = vld [vmem:[%s4165_s19 + $0x14] sm:$0x1] }
  0x31   : > { %v3687_v21 = vcombine.low %v1458_v9, %v1468_v15  ;;  %v2498_v27 = vrot.slane %v2496_v18, 5  ;;  %v2504_v28 = vrot.slane %v2502_v19, 5  ;;  %v2506_v29 = vshrl.u32 %v3832_v4, 16  ;;  %v348_v4 = vld [vmem:[%s4165_s19 + $0x10] sm:$0xf] }
  0x32   : > { %v2512_v30 = vshll.u32 %v3833_v12, 16  ;;  %v2697_v33 = vsel %vm4208_vm5, %v2692_v22, %v2696_v7  ;;  %v2702_v34 = vrot.slane %v2701_v23, 4  ;;  %v3951_v35 = vrot.slane %v3919_v14, 9  ;;  %v919_v14 = vld [vmem:[%s4165_s19 + $0x6c] sm:$0xe] }
  0x33   : > { %1877 = vrot.lane.b32.xlu0 %v3687_v21, %s4116_s24  ;;  %v3143_v36 = vrot.slane %v3920_v20, 5  ;;  %2395 = vrot.lane.b32.xlu1 %v4042_v16, %s4117_s25  ;;  %v2499_v38 = vor.u32 %v2498_v27, %v2495_v24  ;;  %v2508_v39 = vrot.slane %v2506_v29, 4  ;;  %v3146_v41 = vrot.slane %v3921_v25, 5  ;;  %v920_v15 = vld [vmem:[%s4165_s19 + $0x70] sm:$0xf] }
  0x34   : > { %v2514_v40 = vrot.slane %v2512_v30, 5  ;;  %v2707_v43 = vsel %vm4208_vm5, %v2702_v34, %v2706_v17  ;;  %v3943_v46 = vrot.slane %v3895_v26, 9  ;;  %v3087_v52 = vrot.slane %v3896_v31, 5  ;;  %v921_v20 = vld [vmem:[%s4165_s19 + $0x74] sm:$0x1] }
  0x35   : > { %v3144_v44 = vsel %vm4167_vm2, %v3951_v35, %v3143_v36  ;;  %v3145_v45 = vrot.slane %v3143_v36, 4  ;;  %v3887_v49 = vcombine.low %v2697_v33, %v2707_v43  ;;  %v2500_v50 = vrot.slane %v2499_v38, 4  ;;  %v895_v21 = vld [vmem:[%s4165_s19 + $0xc] sm:$0xe]  ;;  %v896_v26 = vld [vmem:[%s4165_s19 + $0x10] sm:$0xf] }
  0x36   : > { %v2509_v51 = vor.u32 %v2508_v39, %v2504_v28  ;;  %v3090_v56 = vrot.slane %v3897_v37, 5  ;;  %v612_v57 = vshrl.u32 %v371_v42, 16  ;;  %v615_v58 = vshll.u32 %v371_v42, 16  ;;  %v897_v31 = vld [vmem:[%s4165_s19 + $0x14] sm:$0x1] }
  0x37   : > { %2379 = vrot.lane.b32.xlu0 %v4043_v32, %s4117_s25  ;;  %v3147_v55 = vsel %vm4167_vm2, %v3145_v45, %v3146_v41  ;;  %2940 = vrot.lane.b32.xlu1 %v3887_v49, %s4118_s26  ;;  %v2505_v59 = vsel %vm4208_vm5, %v2500_v50, %v2504_v28  ;;  %v3088_v62 = vsel %vm4167_vm2, %v3943_v46, %v3087_v52  ;;  %v3089_v63 = vrot.slane %v3087_v52, 4  ;;  %v3666_v36 = vld [vmem:[%s4165_s19 + $0x78] sm:$0xf]  ;;  %v3667_v45 = vld [vmem:[%s4165_s19 + $0x7c] sm:$0xf] }
  0x38   : > { %v2510_v60 = vrot.slane %v2509_v51, 4  ;;  %v3967_v61 = vcombine.low %v3144_v44, %v3147_v55  ;;  %v614_v1 = vrot.slane %v612_v57, 4  ;;  %v617_v2 = vrot.slane %v615_v58, 5  ;;  %v3668_v46 = vld [vmem:[%s4165_s19 + $0x80] sm:$0x1] }
  0x39   : > { %v621_v3 = vshll.u32 %v372_v47, 16  ;;  %v625_v6 = vshrl.u32 %v372_v47, 16  ;;  %v631_v7 = vshll.u32 %v373_v48, 16  ;;  %v420_v9 = vshrl.u32 %v347_v54, 16  ;;  %v3642_v51 = vld [vmem:[%s4165_s19 + $0x18] sm:$0xf] }
  0x3a   : > { %v2515_v5 = vsel %vm4208_vm5, %v2510_v60, %v2514_v40  ;;  %v3091_v11 = vsel %vm4167_vm2, %v3089_v63, %v3090_v56  ;;  %v618_v12 = vor.u32 %v617_v2, %v614_v1  ;;  %v423_v23 = vshll.u32 %v347_v54, 16  ;;  %v3643_v2 = vld [vmem:[%s4165_s19 + $0x1c] sm:$0xf] }
  0x3b   : > { %v3879_v10 = vcombine.low %v2505_v59, %v2515_v5  ;;  %v623_v13 = vrot.slane %v621_v3, 5  ;;  %3261 = vrot.lane.b32.xlu1 %v3967_v61, %s4119_s27  ;;  %v3959_v16 = vcombine.low %v3088_v62, %v3091_v11  ;;  %v627_v17 = vrot.slane %v625_v6, 4 }
  0x3c   : > { %v633_v18 = vrot.slane %v631_v7, 5  ;;  %v422_v19 = vrot.slane %v420_v9, 4  ;;  %v619_v22 = vrot.slane %v618_v12, 4  ;;  %v429_v24 = vshll.u32 %v348_v4, 16  ;;  %v3644_v7 = vld [vmem:[%s4165_s19 + $0x20] sm:$0x1] }
  0x3d   : > { %2924 = vrot.lane.b32.xlu0 %v3879_v10, %s4118_s26  ;;  %v433_v25 = vshrl.u32 %v348_v4, 16  ;;  %v628_v27 = vor.u32 %v627_v17, %v623_v13  ;;  %v439_v28 = vshll.u32 %v349_v8, 16  ;;  %v3568_v29 = vrot.slane %v919_v14, 9  ;;  %v3730_v8 = vld [vmem:[%s4165_s19 + $0x78] sm:$0xe] }
  0x3e   : > { %v1056_v30 = vrot.slane %v920_v15, 5  ;;  %v624_v32 = vsel %vm4208_vm5, %v619_v22, %v623_v13  ;;  %v425_v33 = vrot.slane %v423_v23, 5  ;;  %v431_v34 = vrot.slane %v429_v24, 5  ;;  %v3731_v13 = vld [vmem:[%s4165_s19 + $0x7c] sm:$0xf] }
  0x3f   : > { %v435_v35 = vrot.slane %v433_v25, 4  ;;  %v629_v37 = vrot.slane %v628_v27, 4  ;;  %v441_v38 = vrot.slane %v439_v28, 5  ;;  %v1059_v43 = vrot.slane %v921_v20, 5  ;;  %v3706_v24 = vld [vmem:[%s4165_s19 + $0x18] sm:$0xe] }
  0x40   : > { %v1057_v39 = vsel %vm4167_vm2, %v3568_v29, %v1056_v30  ;;  %v1058_v40 = vrot.slane %v1056_v30, 4  ;;  %v426_v41 = vor.u32 %v425_v33, %v422_v19  ;;  %v3560_v44 = vrot.slane %v895_v21, 9  ;;  %v4044_v19 = vld [vmem:[%s4165_s19 + $0x78] sm:$0xff]  }
  0x41   : > { %3245 = vrot.lane.b32.xlu0 %v3959_v16, %s4119_s27  ;;  %v436_v42 = vor.u32 %v435_v35, %v431_v34  ;;  %v634_v47 = vsel %vm4208_vm5, %v629_v37, %v633_v18  ;;  %v1000_v48 = vrot.slane %v896_v26, 5  ;;  %v1003_v49 = vrot.slane %v897_v31, 5  ;;  %v3732_v18 = vld [vmem:[%s4165_s19 + $0x80] sm:$0x1]  ;;  %v3707_v29 = vld [vmem:[%s4165_s19 + $0x1c] sm:$0xf] }
  0x42   : > { %v1662_v50 = vshrl.u32 %v3666_v36, 16  ;;  %v3552_v52 = vcombine.low %v624_v32, %v634_v47  ;;  %v427_v54 = vrot.slane %v426_v41, 4  ;;  %v1060_v56 = vsel %vm4167_vm2, %v1058_v40, %v1059_v43  ;;  %v4045_v35 = vld [vmem:[%s4165_s19 + $0x18] sm:$0xff]   ;;  %v3858_v40 = vld [vmem:[%s4165_s19 + $0x84] sm:$0xf] }
  0x43   : > { %v437_v55 = vrot.slane %v436_v42, 4  ;;  %v3584_v57 = vcombine.low %v1057_v39, %v1060_v56  ;;  %v1001_v58 = vsel %vm4167_vm2, %v3560_v44, %v1000_v48  ;;  %v1002_v59 = vrot.slane %v1000_v48, 4 }
  0x44   : > { %v1664_v60 = vrot.slane %v1662_v50, 4  ;;  %845 = vrot.lane.b32.xlu1 %v3552_v52, %s4115_s23  ;;  %v432_v61 = vsel %vm4208_vm5, %v427_v54, %v431_v34  ;;  %v1665_v63 = vshll.u32 %v3666_v36, 16  ;;  %v1671_v1 = vshll.u32 %v3667_v45, 16  ;;  %v3708_v34 = vld [vmem:[%s4165_s19 + $0x20] sm:$0x1] }
  0x45   : > { %v442_v62 = vsel %vm4208_vm5, %v437_v55, %v441_v38  ;;  %v1004_v4 = vsel %vm4167_vm2, %v1002_v59, %v1003_v49  ;;  %v1675_v5 = vshrl.u32 %v3667_v45, 16  ;;  %v1681_v6 = vshll.u32 %v3668_v46, 16  ;;  %v3859_v49 = vld [vmem:[%s4165_s19 + $0x88] sm:$0xf]  ;;  %v3860_v54 = vld [vmem:[%s4165_s19 + $0x8c] sm:$0x1] }
  0x46   : > { %v3544_v3 = vcombine.low %v432_v61, %v442_v62  ;;  %v3576_v9 = vcombine.low %v1001_v58, %v1004_v4  ;;  %v1667_v10 = vrot.slane %v1665_v63, 5  ;;  %v1673_v11 = vrot.slane %v1671_v1, 5  ;;  %v3835_v61 = vld [vmem:[%s4165_s19 + $0x28] sm:$0xf] }
  0x47   : > { %v1470_v12 = vshrl.u32 %v3642_v51, 16  ;;  %v1677_v14 = vrot.slane %v1675_v5, 4  ;;  %v1683_v15 = vrot.slane %v1681_v6, 5  ;;  %v1473_v16 = vshll.u32 %v3642_v51, 16 }
  0x48   : > { %829 = vrot.lane.b32.xlu0 %v3544_v3, %s4115_s23  ;;  %v1479_v17 = vshll.u32 %v3643_v2, 16  ;;  %1169 = vrot.lane.b32.xlu1 %v3584_v57, %s4114_s22  ;;  %v1668_v20 = vor.u32 %v1667_v10, %v1664_v60  ;;  %v1483_v22 = vshrl.u32 %v3643_v2, 16  ;;  %v1489_v23 = vshll.u32 %v3644_v7, 16  ;;  %v3834_v60 = vld [vmem:[%s4165_s19 + $0x24] sm:$0xf] }
  0x49   : > { %v1472_v21 = vrot.slane %v1470_v12, 4  ;;  %v1678_v25 = vor.u32 %v1677_v14, %v1673_v11  ;;  %v1475_v26 = vrot.slane %v1473_v16, 5  ;;  %v3760_v28 = vrot.slane %v3730_v8, 9  ;;  %v3836_v3 = vld [vmem:[%s4165_s19 + $0x2c] sm:$0x1] }
  0x4a   : > { %v1481_v27 = vrot.slane %v1479_v17, 5  ;;  %v1669_v30 = vrot.slane %v1668_v20, 4  ;;  %v1485_v31 = vrot.slane %v1483_v22, 4  ;;  %v1491_v32 = vrot.slane %v1489_v23, 5  ;;  %v3922_v8 = vld [vmem:[%s4165_s19 + $0x84] sm:$0xe] }
  0x4b   : > { %v2103_v33 = vrot.slane %v3731_v13, 5  ;;  %v1679_v36 = vrot.slane %v1678_v25, 4  ;;  %v1476_v37 = vor.u32 %v1475_v26, %v1472_v21  ;;  %v2106_v38 = vrot.slane %v3732_v18, 5  ;;  %v3924_v14 = vld [vmem:[%s4165_s19 + $0x8c] sm:$0x1]  ;;  %v4046_v20 = vld [vmem:[%s4165_s19 + $0x84] sm:$0xff]  }
  0x4c   : > { %1153 = vrot.lane.b32.xlu0 %v3576_v9, %s4114_s22  ;;  %v3752_v39 = vrot.slane %v3706_v24, 9  ;;  %1350 = vrot.lane.b32.xlu1 %v4044_v19, %s4112_s20  ;;  %v1674_v41 = vsel %vm4208_vm5, %v1669_v30, %v1673_v11  ;;  %v1486_v42 = vor.u32 %v1485_v31, %v1481_v27  ;;  %v2047_v47 = vrot.slane %v3707_v29, 5  ;;  %v3923_v9 = vld [vmem:[%s4165_s19 + $0x88] sm:$0xf]  ;;  %v3898_v19 = vld [vmem:[%s4165_s19 + $0x24] sm:$0xe] }
  0x4d   : > { %v2104_v43 = vsel %vm4167_vm2, %v3760_v28, %v2103_v33  ;;  %v2105_v44 = vrot.slane %v2103_v33, 4  ;;  %v1684_v45 = vsel %vm4208_vm5, %v1679_v36, %v1683_v15  ;;  %v1477_v46 = vrot.slane %v1476_v37, 4  ;;  %v3899_v25 = vld [vmem:[%s4165_s19 + $0x28] sm:$0xf]  ;;  %v3900_v26 = vld [vmem:[%s4165_s19 + $0x2c] sm:$0x1] }
  0x4e   : > { %v2050_v48 = vrot.slane %v3708_v34, 5  ;;  %v3696_v50 = vcombine.low %v1674_v41, %v1684_v45  ;;  %v1487_v51 = vrot.slane %v1486_v42, 4  ;;  %v2709_v55 = vshrl.u32 %v3858_v40, 16  ;;  %v374_v31 = vld [vmem:[%s4165_s19 + $0x78] sm:$0xf]  ;;  %v4047_v36 = vld [vmem:[%s4165_s19 + $0x24] sm:$0xff]  }
  0x4f   : > { %v2107_v52 = vsel %vm4167_vm2, %v2105_v44, %v2106_v38  ;;  %v1482_v56 = vsel %vm4208_vm5, %v1477_v46, %v1481_v27  ;;  %v2048_v58 = vsel %vm4167_vm2, %v3752_v39, %v2047_v47  ;;  %v2049_v59 = vrot.slane %v2047_v47, 4 }
  0x50   : > { %1334 = vrot.lane.b32.xlu0 %v4045_v35, %s4112_s20  ;;  %v3776_v57 = vcombine.low %v2104_v43, %v2107_v52  ;;  %1895 = vrot.lane.b32.xlu1 %v3696_v50, %s4116_s24  ;;  %v1492_v62 = vsel %vm4208_vm5, %v1487_v51, %v1491_v32  ;;  %v2711_v63 = vrot.slane %v2709_v55, 4  ;;  %v2712_v1 = vshll.u32 %v3858_v40, 16 }
  0x51   : > { %v2718_v2 = vshll.u32 %v3859_v49, 16  ;;  %v3688_v4 = vcombine.low %v1482_v56, %v1492_v62  ;;  %v2051_v5 = vsel %vm4167_vm2, %v2049_v59, %v2050_v48  ;;  %v2722_v6 = vshrl.u32 %v3859_v49, 16  ;;  %v375_v49 = vld [vmem:[%s4165_s19 + $0x7c] sm:$0xf] }
  0x52   : > { %v2728_v7 = vshll.u32 %v3860_v54, 16  ;;  %v3768_v10 = vcombine.low %v2048_v58, %v2051_v5  ;;  %v2714_v11 = vrot.slane %v2712_v1, 5  ;;  %v2517_v13 = vshrl.u32 %v3834_v60, 16  ;;  %v376_v54 = vld [vmem:[%s4165_s19 + $0x80] sm:$0x1] }
  0x53   : > { %v2720_v12 = vrot.slane %v2718_v2, 5  ;;  %v2724_v15 = vrot.slane %v2722_v6, 4  ;;  %v2520_v17 = vshll.u32 %v3834_v60, 16  ;;  %v2526_v18 = vshll.u32 %v3835_v61, 16  ;;  %v350_v60 = vld [vmem:[%s4165_s19 + $0x18] sm:$0xf] }
  0x54   : > { %1879 = vrot.lane.b32.xlu0 %v3688_v4, %s4116_s24  ;;  %v2730_v16 = vrot.slane %v2728_v7, 5  ;;  %2216 = vrot.lane.b32.xlu1 %v3776_v57, %s4113_s21  ;;  %v2715_v21 = vor.u32 %v2714_v11, %v2711_v63  ;;  %v2519_v22 = vrot.slane %v2517_v13, 4  ;;  %v2530_v23 = vshrl.u32 %v3835_v61, 16  ;;  %v351_v61 = vld [vmem:[%s4165_s19 + $0x1c] sm:$0xf] }
  0x55   : > { %v2536_v24 = vshll.u32 %v3836_v3, 16  ;;  %v2725_v27 = vor.u32 %v2724_v15, %v2720_v12  ;;  %v2522_v28 = vrot.slane %v2520_v17, 5  ;;  %v2528_v29 = vrot.slane %v2526_v18, 5  ;;  %v352_v3 = vld [vmem:[%s4165_s19 + $0x20] sm:$0x1] }
  0x56   : > { %v3952_v30 = vrot.slane %v3922_v8, 9  ;;  %v2716_v32 = vrot.slane %v2715_v21, 4  ;;  %v2532_v33 = vrot.slane %v2530_v23, 4  ;;  %v3150_v35 = vrot.slane %v3923_v9, 5  ;;  %v922_v8 = vld [vmem:[%s4165_s19 + $0x78] sm:$0xe] }
  0x57   : > { %v2538_v34 = vrot.slane %v2536_v24, 5  ;;  %v2726_v37 = vrot.slane %v2725_v27, 4  ;;  %v2523_v38 = vor.u32 %v2522_v28, %v2519_v22  ;;  %v3153_v39 = vrot.slane %v3924_v14, 5  ;;  %v923_v9 = vld [vmem:[%s4165_s19 + $0x7c] sm:$0xf] }
  0x58   : > { %2200 = vrot.lane.b32.xlu0 %v3768_v10, %s4113_s21  ;;  %v3944_v40 = vrot.slane %v3898_v19, 9  ;;  %2397 = vrot.lane.b32.xlu1 %v4046_v20, %s4117_s25  ;;  %v2721_v41 = vsel %vm4208_vm5, %v2716_v32, %v2720_v12  ;;  %v2533_v42 = vor.u32 %v2532_v33, %v2528_v29  ;;  %v3151_v43 = vsel %vm4167_vm2, %v3952_v30, %v3150_v35  ;;  %v924_v14 = vld [vmem:[%s4165_s19 + $0x80] sm:$0x1]  ;;  %v898_v19 = vld [vmem:[%s4165_s19 + $0x18] sm:$0xe] }
  0x59   : > { %v3152_v44 = vrot.slane %v3150_v35, 4  ;;  %v2731_v45 = vsel %vm4208_vm5, %v2726_v37, %v2730_v16  ;;  %v2524_v46 = vrot.slane %v2523_v38, 4  ;;  %v3094_v47 = vrot.slane %v3899_v25, 5  ;;  %v899_v24 = vld [vmem:[%s4165_s19 + $0x1c] sm:$0xf] }
  0x5a   : > { %v3097_v48 = vrot.slane %v3900_v26, 5  ;;  %v3888_v50 = vcombine.low %v2721_v41, %v2731_v45  ;;  %v2534_v51 = vrot.slane %v2533_v42, 4  ;;  %v636_v55 = vshrl.u32 %v374_v31, 16  ;;  %v900_v25 = vld [vmem:[%s4165_s19 + $0x20] sm:$0x1] }
  0x5b   : > { %v3154_v52 = vsel %vm4167_vm2, %v3152_v44, %v3153_v39  ;;  %v2529_v56 = vsel %vm4208_vm5, %v2524_v46, %v2528_v29  ;;  %v3095_v58 = vsel %vm4167_vm2, %v3944_v40, %v3094_v47  ;;  %v3096_v59 = vrot.slane %v3094_v47, 4  ;;  %v3669_v30 = vld [vmem:[%s4165_s19 + $0x84] sm:$0xf]  ;;  %v3670_v47 = vld [vmem:[%s4165_s19 + $0x88] sm:$0xf] }
  0x5c   : > { %2381 = vrot.lane.b32.xlu0 %v4047_v36, %s4117_s25  ;;  %v3968_v57 = vcombine.low %v3151_v43, %v3154_v52  ;;  %2942 = vrot.lane.b32.xlu1 %v3888_v50, %s4118_s26  ;;  %v2539_v62 = vsel %vm4208_vm5, %v2534_v51, %v2538_v34  ;;  %v638_v63 = vrot.slane %v636_v55, 4  ;;  %v639_v1 = vshll.u32 %v374_v31, 16  ;;  %v3671_v51 = vld [vmem:[%s4165_s19 + $0x8c] sm:$0x1] }
  0x5d   : > { %v645_v2 = vshll.u32 %v375_v49, 16  ;;  %v3880_v4 = vcombine.low %v2529_v56, %v2539_v62  ;;  %v3098_v5 = vsel %vm4167_vm2, %v3096_v59, %v3097_v48  ;;  %v649_v6 = vshrl.u32 %v375_v49, 16 }
  0x5e   : > { %v655_v7 = vshll.u32 %v376_v54, 16  ;;  %v3960_v10 = vcombine.low %v3095_v58, %v3098_v5  ;;  %v641_v11 = vrot.slane %v639_v1, 5  ;;  %v444_v13 = vshrl.u32 %v350_v60, 16  ;;  %v3645_v58 = vld [vmem:[%s4165_s19 + $0x24] sm:$0xf] }
  0x5f   : > { %v647_v12 = vrot.slane %v645_v2, 5  ;;  %v651_v15 = vrot.slane %v649_v6, 4  ;;  %v447_v17 = vshll.u32 %v350_v60, 16  ;;  %v453_v18 = vshll.u32 %v351_v61, 16  ;;  %v3647_v5 = vld [vmem:[%s4165_s19 + $0x2c] sm:$0x1] }
  0x60   : > { %2926 = vrot.lane.b32.xlu0 %v3880_v4, %s4118_s26  ;;  %v657_v16 = vrot.slane %v655_v7, 5  ;;  %3263 = vrot.lane.b32.xlu1 %v3968_v57, %s4119_s27  ;;  %v642_v20 = vor.u32 %v641_v11, %v638_v63  ;;  %v446_v21 = vrot.slane %v444_v13, 4  ;;  %v457_v22 = vshrl.u32 %v351_v61, 16  ;;  %v3646_v63 = vld [vmem:[%s4165_s19 + $0x28] sm:$0xf] }
  0x61   : > { %v463_v23 = vshll.u32 %v352_v3, 16  ;;  %v652_v26 = vor.u32 %v651_v15, %v647_v12  ;;  %v449_v27 = vrot.slane %v447_v17, 5  ;;  %v455_v28 = vrot.slane %v453_v18, 5  ;;  %v3733_v6 = vld [vmem:[%s4165_s19 + $0x84] sm:$0xe] }
  0x62   : > { %v3569_v29 = vrot.slane %v922_v8, 9  ;;  %v643_v31 = vrot.slane %v642_v20, 4  ;;  %v459_v32 = vrot.slane %v457_v22, 4  ;;  %v1063_v34 = vrot.slane %v923_v9, 5  ;;  %v3734_v11 = vld [vmem:[%s4165_s19 + $0x88] sm:$0xf] }
  0x63   : > { %v465_v33 = vrot.slane %v463_v23, 5  ;;  %v653_v35 = vrot.slane %v652_v26, 4  ;;  %v450_v36 = vor.u32 %v449_v27, %v446_v21  ;;  %v1066_v37 = vrot.slane %v924_v14, 5  ;;  %v4048_v17 = vld [vmem:[%s4165_s19 + $0x84] sm:$0xff]  }
  0x64   : > { %3247 = vrot.lane.b32.xlu0 %v3960_v10, %s4119_s27  ;;  %v3561_v38 = vrot.slane %v898_v19, 9  ;;  %v648_v39 = vsel %vm4208_vm5, %v643_v31, %v647_v12  ;;  %v460_v40 = vor.u32 %v459_v32, %v455_v28  ;;  %v1064_v41 = vsel %vm4167_vm2, %v3569_v29, %v1063_v34  ;;  %v3709_v22 = vld [vmem:[%s4165_s19 + $0x24] sm:$0xe]  ;;  %v3710_v27 = vld [vmem:[%s4165_s19 + $0x28] sm:$0xf] }
  0x65   : > { %v1065_v42 = vrot.slane %v1063_v34, 4  ;;  %v658_v43 = vsel %vm4208_vm5, %v653_v35, %v657_v16  ;;  %v451_v44 = vrot.slane %v450_v36, 4  ;;  %v1007_v45 = vrot.slane %v899_v24, 5  ;;  %v3735_v16 = vld [vmem:[%s4165_s19 + $0x8c] sm:$0x1] }
  0x66   : > { %v1010_v46 = vrot.slane %v900_v25, 5  ;;  %v3553_v48 = vcombine.low %v648_v39, %v658_v43  ;;  %v461_v49 = vrot.slane %v460_v40, 4  ;;  %v1686_v52 = vshrl.u32 %v3669_v30, 16  ;;  %v3711_v32 = vld [vmem:[%s4165_s19 + $0x2c] sm:$0x1] }
  0x67   : > { %v1067_v50 = vsel %vm4167_vm2, %v1065_v42, %v1066_v37  ;;  %v456_v54 = vsel %vm4208_vm5, %v451_v44, %v455_v28  ;;  %v1008_v56 = vsel %vm4167_vm2, %v3561_v38, %v1007_v45  ;;  %v1009_v57 = vrot.slane %v1007_v45, 4  ;;  %v3861_v38 = vld [vmem:[%s4165_s19 + $0x90] sm:$0xf] }
  0x68   : > { %v3585_v55 = vcombine.low %v1064_v41, %v1067_v50  ;;  %847 = vrot.lane.b32.xlu1 %v3553_v48, %s4115_s23  ;;  %v466_v59 = vsel %vm4208_vm5, %v461_v49, %v465_v33  ;;  %v1688_v60 = vrot.slane %v1686_v52, 4  ;;  %v1689_v61 = vshll.u32 %v3669_v30, 16  ;;  %v4049_v33 = vld [vmem:[%s4165_s19 + $0x24] sm:$0xff]  }
  0x69   : > { %v1695_v62 = vshll.u32 %v3670_v47, 16  ;;  %v3545_v1 = vcombine.low %v456_v54, %v466_v59  ;;  %v1011_v2 = vsel %vm4167_vm2, %v1009_v57, %v1010_v46  ;;  %v1699_v3 = vshrl.u32 %v3670_v47, 16  ;;  %v3862_v47 = vld [vmem:[%s4165_s19 + $0x94] sm:$0xf] }
  0x6a   : > { %v1705_v4 = vshll.u32 %v3671_v51, 16  ;;  %v3577_v7 = vcombine.low %v1008_v56, %v1011_v2  ;;  %v1691_v8 = vrot.slane %v1689_v61, 5  ;;  %v1494_v10 = vshrl.u32 %v3645_v58, 16  ;;  %v3863_v51 = vld [vmem:[%s4165_s19 + $0x98] sm:$0x1] }
  0x6b   : > { %v1697_v9 = vrot.slane %v1695_v62, 5  ;;  %831 = vrot.lane.b32.xlu0 %v3545_v1, %s4115_s23  ;;  %v1701_v12 = vrot.slane %v1699_v3, 4  ;;  %v1497_v14 = vshll.u32 %v3645_v58, 16  ;;  %v1503_v15 = vshll.u32 %v3646_v63, 16  ;;  %v3837_v58 = vld [vmem:[%s4165_s19 + $0x30] sm:$0xf] }
  0x6c   : > { %v1707_v13 = vrot.slane %v1705_v4, 5  ;;  %1171 = vrot.lane.b32.xlu1 %v3585_v55, %s4114_s22  ;;  %v1692_v18 = vor.u32 %v1691_v8, %v1688_v60  ;;  %v1496_v19 = vrot.slane %v1494_v10, 4  ;;  %v1507_v20 = vshrl.u32 %v3646_v63, 16  ;;  %v3838_v59 = vld [vmem:[%s4165_s19 + $0x34] sm:$0xf] }
  0x6d   : > { %v1513_v21 = vshll.u32 %v3647_v5, 16  ;;  %v1702_v23 = vor.u32 %v1701_v12, %v1697_v9  ;;  %v1499_v24 = vrot.slane %v1497_v14, 5  ;;  %v1505_v25 = vrot.slane %v1503_v15, 5  ;;  %v3839_v1 = vld [vmem:[%s4165_s19 + $0x38] sm:$0x1] }
  0x6e   : > { %v3761_v26 = vrot.slane %v3733_v6, 9  ;;  %v1693_v28 = vrot.slane %v1692_v18, 4  ;;  %v1509_v29 = vrot.slane %v1507_v20, 4  ;;  %v2110_v31 = vrot.slane %v3734_v11, 5  ;;  %v3925_v6 = vld [vmem:[%s4165_s19 + $0x90] sm:$0xe] }
  0x6f   : > { %v1515_v30 = vrot.slane %v1513_v21, 5  ;;  %1155 = vrot.lane.b32.xlu0 %v3577_v7, %s4114_s22  ;;  %v1703_v34 = vrot.slane %v1702_v23, 4  ;;  %v1500_v35 = vor.u32 %v1499_v24, %v1496_v19  ;;  %v2113_v36 = vrot.slane %v3735_v16, 5  ;;  %v3926_v7 = vld [vmem:[%s4165_s19 + $0x94] sm:$0xf] }
  0x70   : > { %v3753_v37 = vrot.slane %v3709_v22, 9  ;;  %1352 = vrot.lane.b32.xlu1 %v4048_v17, %s4112_s20  ;;  %v1698_v39 = vsel %vm4208_vm5, %v1693_v28, %v1697_v9  ;;  %v1510_v40 = vor.u32 %v1509_v29, %v1505_v25  ;;  %v2111_v41 = vsel %vm4167_vm2, %v3761_v26, %v2110_v31  ;;  %v3927_v12 = vld [vmem:[%s4165_s19 + $0x98] sm:$0x1]  ;;  %v4050_v18 = vld [vmem:[%s4165_s19 + $0x90] sm:$0xff]  }
  0x71   : > { %v2112_v42 = vrot.slane %v2110_v31, 4  ;;  %v1708_v43 = vsel %vm4208_vm5, %v1703_v34, %v1707_v13  ;;  %v1501_v44 = vrot.slane %v1500_v35, 4  ;;  %v2054_v45 = vrot.slane %v3710_v27, 5  ;;  %v3901_v13 = vld [vmem:[%s4165_s19 + $0x30] sm:$0xe] }
  0x72   : > { %v2057_v46 = vrot.slane %v3711_v32, 5  ;;  %v3697_v48 = vcombine.low %v1698_v39, %v1708_v43  ;;  %v1511_v49 = vrot.slane %v1510_v40, 4  ;;  %v2733_v52 = vshrl.u32 %v3861_v38, 16  ;;  %v3902_v23 = vld [vmem:[%s4165_s19 + $0x34] sm:$0xf] }
  0x73   : > { %v2114_v50 = vsel %vm4167_vm2, %v2112_v42, %v2113_v36  ;;  %1336 = vrot.lane.b32.xlu0 %v4049_v33, %s4112_s20  ;;  %v1506_v54 = vsel %vm4208_vm5, %v1501_v44, %v1505_v25  ;;  %v2055_v56 = vsel %vm4167_vm2, %v3753_v37, %v2054_v45  ;;  %v2056_v57 = vrot.slane %v2054_v45, 4  ;;  %v3903_v32 = vld [vmem:[%s4165_s19 + $0x38] sm:$0x1]  ;;  %v4051_v33 = vld [vmem:[%s4165_s19 + $0x30] sm:$0xff]  }
  0x74   : > { %v3777_v55 = vcombine.low %v2111_v41, %v2114_v50  ;;  %1897 = vrot.lane.b32.xlu1 %v3697_v48, %s4116_s24  ;;  %v1516_v60 = vsel %vm4208_vm5, %v1511_v49, %v1515_v30  ;;  %v2735_v61 = vrot.slane %v2733_v52, 4  ;;  %v2736_v62 = vshll.u32 %v3861_v38, 16  ;;  %v377_v38 = vld [vmem:[%s4165_s19 + $0x84] sm:$0xf] }
  0x75   : > { %v2742_v63 = vshll.u32 %v3862_v47, 16  ;;  %v3689_v2 = vcombine.low %v1506_v54, %v1516_v60  ;;  %v2058_v3 = vsel %vm4167_vm2, %v2056_v57, %v2057_v46  ;;  %v2746_v4 = vshrl.u32 %v3862_v47, 16  ;;  %v378_v47 = vld [vmem:[%s4165_s19 + $0x88] sm:$0xf] }
  0x76   : > { %v2752_v5 = vshll.u32 %v3863_v51, 16  ;;  %v3769_v8 = vcombine.low %v2055_v56, %v2058_v3  ;;  %v2738_v9 = vrot.slane %v2736_v62, 5  ;;  %v2541_v11 = vshrl.u32 %v3837_v58, 16  ;;  %v379_v51 = vld [vmem:[%s4165_s19 + $0x8c] sm:$0x1] }
  0x77   : > { %v2744_v10 = vrot.slane %v2742_v63, 5  ;;  %1881 = vrot.lane.b32.xlu0 %v3689_v2, %s4116_s24  ;;  %v2748_v14 = vrot.slane %v2746_v4, 4  ;;  %v2544_v16 = vshll.u32 %v3837_v58, 16  ;;  %v2550_v17 = vshll.u32 %v3838_v59, 16  ;;  %v353_v58 = vld [vmem:[%s4165_s19 + $0x24] sm:$0xf] }
  0x78   : > { %v2754_v15 = vrot.slane %v2752_v5, 5  ;;  %2218 = vrot.lane.b32.xlu1 %v3777_v55, %s4113_s21  ;;  %v2739_v19 = vor.u32 %v2738_v9, %v2735_v61  ;;  %v2543_v20 = vrot.slane %v2541_v11, 4  ;;  %v2554_v21 = vshrl.u32 %v3838_v59, 16  ;;  %v354_v59 = vld [vmem:[%s4165_s19 + $0x28] sm:$0xf] }
  0x79   : > { %v2560_v22 = vshll.u32 %v3839_v1, 16  ;;  %v2749_v24 = vor.u32 %v2748_v14, %v2744_v10  ;;  %v2546_v25 = vrot.slane %v2544_v16, 5  ;;  %v2552_v26 = vrot.slane %v2550_v17, 5  ;;  %v355_v1 = vld [vmem:[%s4165_s19 + $0x2c] sm:$0x1] }
  0x7a   : > { %v3953_v27 = vrot.slane %v3925_v6, 9  ;;  %v2740_v28 = vrot.slane %v2739_v19, 4  ;;  %v2556_v29 = vrot.slane %v2554_v21, 4  ;;  %v3157_v31 = vrot.slane %v3926_v7, 5  ;;  %v925_v6 = vld [vmem:[%s4165_s19 + $0x84] sm:$0xe] }
  0x7b   : > { %v2562_v30 = vrot.slane %v2560_v22, 5  ;;  %2202 = vrot.lane.b32.xlu0 %v3769_v8, %s4113_s21  ;;  %v2750_v34 = vrot.slane %v2749_v24, 4  ;;  %v2547_v35 = vor.u32 %v2546_v25, %v2543_v20  ;;  %v3160_v36 = vrot.slane %v3927_v12, 5  ;;  %v926_v7 = vld [vmem:[%s4165_s19 + $0x88] sm:$0xf] }
  0x7c   : > { %v3945_v37 = vrot.slane %v3901_v13, 9  ;;  %2399 = vrot.lane.b32.xlu1 %v4050_v18, %s4117_s25  ;;  %v2745_v39 = vsel %vm4208_vm5, %v2740_v28, %v2744_v10  ;;  %v2557_v40 = vor.u32 %v2556_v29, %v2552_v26  ;;  %v3158_v41 = vsel %vm4167_vm2, %v3953_v27, %v3157_v31  ;;  %v927_v12 = vld [vmem:[%s4165_s19 + $0x8c] sm:$0x1]  ;;  %v901_v13 = vld [vmem:[%s4165_s19 + $0x24] sm:$0xe] }
  0x7d   : > { %v3159_v42 = vrot.slane %v3157_v31, 4  ;;  %v2755_v43 = vsel %vm4208_vm5, %v2750_v34, %v2754_v15  ;;  %v2548_v44 = vrot.slane %v2547_v35, 4  ;;  %v3101_v45 = vrot.slane %v3902_v23, 5  ;;  %v902_v22 = vld [vmem:[%s4165_s19 + $0x28] sm:$0xf] }
  0x7e   : > { %v3104_v46 = vrot.slane %v3903_v32, 5  ;;  %v3889_v48 = vcombine.low %v2745_v39, %v2755_v43  ;;  %v2558_v49 = vrot.slane %v2557_v40, 4  ;;  %v660_v52 = vshrl.u32 %v377_v38, 16  ;;  %v903_v31 = vld [vmem:[%s4165_s19 + $0x2c] sm:$0x1] }
  0x7f   : > { %v3161_v50 = vsel %vm4167_vm2, %v3159_v42, %v3160_v36  ;;  %2383 = vrot.lane.b32.xlu0 %v4051_v33, %s4117_s25  ;;  %v2553_v54 = vsel %vm4208_vm5, %v2548_v44, %v2552_v26  ;;  %v3102_v56 = vsel %vm4167_vm2, %v3945_v37, %v3101_v45  ;;  %v3103_v57 = vrot.slane %v3101_v45, 4  ;;  %v3672_v36 = vld [vmem:[%s4165_s19 + $0x90] sm:$0xf] }
  0x80   : > { %v3969_v55 = vcombine.low %v3158_v41, %v3161_v50  ;;  %2944 = vrot.lane.b32.xlu1 %v3889_v48, %s4118_s26  ;;  %v2563_v60 = vsel %vm4208_vm5, %v2558_v49, %v2562_v30  ;;  %v662_v61 = vrot.slane %v660_v52, 4  ;;  %v663_v62 = vshll.u32 %v377_v38, 16  ;;  %v3673_v41 = vld [vmem:[%s4165_s19 + $0x94] sm:$0xf]  ;;  %v3648_v52 = vld [vmem:[%s4165_s19 + $0x30] sm:$0xf] }
  0x81   : > { %v669_v63 = vshll.u32 %v378_v47, 16  ;;  %v3881_v2 = vcombine.low %v2553_v54, %v2563_v60  ;;  %v3105_v3 = vsel %vm4167_vm2, %v3103_v57, %v3104_v46  ;;  %v673_v4 = vshrl.u32 %v378_v47, 16  ;;  %v3674_v46 = vld [vmem:[%s4165_s19 + $0x98] sm:$0x1] }
  0x82   : > { %v679_v5 = vshll.u32 %v379_v51, 16  ;;  %v3961_v8 = vcombine.low %v3102_v56, %v3105_v3  ;;  %v665_v9 = vrot.slane %v663_v62, 5  ;;  %v468_v11 = vshrl.u32 %v353_v58, 16 }
  0x83   : > { %v671_v10 = vrot.slane %v669_v63, 5  ;;  %2928 = vrot.lane.b32.xlu0 %v3881_v2, %s4118_s26  ;;  %v675_v14 = vrot.slane %v673_v4, 4  ;;  %v471_v16 = vshll.u32 %v353_v58, 16  ;;  %v477_v17 = vshll.u32 %v354_v59, 16  ;;  %v3649_v58 = vld [vmem:[%s4165_s19 + $0x34] sm:$0xf] }
  0x84   : > { %v681_v15 = vrot.slane %v679_v5, 5  ;;  %3265 = vrot.lane.b32.xlu1 %v3969_v55, %s4119_s27  ;;  %v666_v18 = vor.u32 %v665_v9, %v662_v61  ;;  %v470_v19 = vrot.slane %v468_v11, 4  ;;  %v481_v20 = vshrl.u32 %v354_v59, 16 }
  0x85   : > { %v487_v21 = vshll.u32 %v355_v1, 16  ;;  %v676_v23 = vor.u32 %v675_v14, %v671_v10  ;;  %v473_v24 = vrot.slane %v471_v16, 5  ;;  %v479_v25 = vrot.slane %v477_v17, 5  ;;  %v4510_v47 = vpop.permute.xlu1 %1348  ;;  %v3650_v1 = vld [vmem:[%s4165_s19 + $0x38] sm:$0x1] }
  0x86   : > { %v3570_v26 = vrot.slane %v925_v6, 9  ;;  %v667_v27 = vrot.slane %v666_v18, 4  ;;  %v483_v28 = vrot.slane %v481_v20, 4  ;;  %v1070_v30 = vrot.slane %v926_v7, 5  ;;  %v4520_v59 = vpop.permute.xlu0 %1332  ;;  %v3736_v6 = vld [vmem:[%s4165_s19 + $0x90] sm:$0xe] }
  0x87   : > { %v489_v29 = vrot.slane %v487_v21, 5  ;;  %3249 = vrot.lane.b32.xlu0 %v3961_v8, %s4119_s27  ;;  %v677_v32 = vrot.slane %v676_v23, 4  ;;  %v474_v33 = vor.u32 %v473_v24, %v470_v19  ;;  %v1073_v34 = vrot.slane %v927_v12, 5  ;;  %v3737_v7 = vld [vmem:[%s4165_s19 + $0x94] sm:$0xf] }
  0x88   : > { %v3562_v35 = vrot.slane %v901_v13, 9  ;;  %v672_v37 = vsel %vm4208_vm5, %v667_v27, %v671_v10  ;;  %v484_v38 = vor.u32 %v483_v28, %v479_v25  ;;  %v1071_v39 = vsel %vm4167_vm2, %v3570_v26, %v1070_v30  ;;  %v3738_v12 = vld [vmem:[%s4165_s19 + $0x98] sm:$0x1]  ;;  %v3712_v17 = vld [vmem:[%s4165_s19 + $0x30] sm:$0xe] }
  0x89   : > { %v1072_v40 = vrot.slane %v1070_v30, 4  ;;  %v682_v42 = vsel %vm4208_vm5, %v677_v32, %v681_v15  ;;  %v475_v43 = vrot.slane %v474_v33, 4  ;;  %v1014_v44 = vrot.slane %v902_v22, 5  ;;  %v4052_v19 = vld [vmem:[%s4165_s19 + $0x90] sm:$0xff]  }
  0x8a   : > { %v1017_v45 = vrot.slane %v903_v31, 5  ;;  %v3554_v48 = vcombine.low %v672_v37, %v682_v42  ;;  %v485_v49 = vrot.slane %v484_v38, 4  ;;  %v1710_v51 = vshrl.u32 %v3672_v36, 16  ;;  %v3713_v24 = vld [vmem:[%s4165_s19 + $0x34] sm:$0xf] }
  0x8b   : > { %v1074_v50 = vsel %vm4167_vm2, %v1072_v40, %v1073_v34  ;;  %v480_v54 = vsel %vm4208_vm5, %v475_v43, %v479_v25  ;;  %v1015_v56 = vsel %vm4167_vm2, %v3562_v35, %v1014_v44  ;;  %v1016_v57 = vrot.slane %v1014_v44, 4  ;;  %v3714_v34 = vld [vmem:[%s4165_s19 + $0x38] sm:$0x1]  ;;  %v4053_v35 = vld [vmem:[%s4165_s19 + $0x30] sm:$0xff]   ;;  %v3864_v40 = vld [vmem:[%s4165_s19 + $0x9c] sm:$0xf] }
  0x8c   : > { %v3586_v55 = vcombine.low %v1071_v39, %v1074_v50  ;;  %849 = vrot.lane.b32.xlu1 %v3554_v48, %s4115_s23  ;;  %v490_v60 = vsel %vm4208_vm5, %v485_v49, %v489_v29  ;;  %v1712_v61 = vrot.slane %v1710_v51, 4  ;;  %v1713_v62 = vshll.u32 %v3672_v36, 16  ;;  %v3865_v50 = vld [vmem:[%s4165_s19 + $0xa0] sm:$0xf] }
  0x8d   : > { %v1719_v63 = vshll.u32 %v3673_v41, 16  ;;  %v3546_v2 = vcombine.low %v480_v54, %v490_v60  ;;  %v1018_v3 = vsel %vm4167_vm2, %v1016_v57, %v1017_v45  ;;  %v1723_v4 = vshrl.u32 %v3673_v41, 16 }
  0x8e   : > { %v1729_v5 = vshll.u32 %v3674_v46, 16  ;;  %v3578_v8 = vcombine.low %v1015_v56, %v1018_v3  ;;  %v1715_v9 = vrot.slane %v1713_v62, 5  ;;  %v1518_v11 = vshrl.u32 %v3648_v52, 16  ;;  %v4533_v18 = vpop.permute.xlu1 %1151  ;;  %v4538_v29 = vpop.permute.xlu0 %2198  ;;  %v3866_v56 = vld [vmem:[%s4165_s19 + $0xa4] sm:$0x1] }
  0x8f   : > { %v1721_v10 = vrot.slane %v1719_v63, 5  ;;  %833 = vrot.lane.b32.xlu0 %v3546_v2, %s4115_s23  ;;  %v1725_v13 = vrot.slane %v1723_v4, 4  ;;  %v1521_v15 = vshll.u32 %v3648_v52, 16  ;;  %v1527_v16 = vshll.u32 %v3649_v58, 16  ;;  %v3840_v63 = vld [vmem:[%s4165_s19 + $0x3c] sm:$0xf] }
  0x90   : > { %v1731_v14 = vrot.slane %v1729_v5, 5  ;;  %1173 = vrot.lane.b32.xlu1 %v3586_v55, %s4114_s22  ;;  %v1716_v20 = vor.u32 %v1715_v9, %v1712_v61  ;;  %v1520_v21 = vrot.slane %v1518_v11, 4  ;;  %v1531_v22 = vshrl.u32 %v3649_v58, 16  ;;  %v4060_v9 = vld [vmem:[%s4165_s19 + $0x6c] sm:$0xff]   ;;  %v4066_v11 = vld [vmem:[%s4165_s19 + $0x78] sm:$0xff]  }
  0x91   : > { %v1537_v23 = vshll.u32 %v3650_v1, 16  ;;  %v1726_v25 = vor.u32 %v1725_v13, %v1721_v10  ;;  %v1523_v26 = vrot.slane %v1521_v15, 5  ;;  %v1529_v27 = vrot.slane %v1527_v16, 5  ;;  %v3842_v16 = vld [vmem:[%s4165_s19 + $0x44] sm:$0x1]  ;;  %337 = vst.msk [vmem:[#allocation2 + $0x48] sm:$0xff] %vm327_vm6, %v4060_v9 }
  0x92   : > { %v3762_v28 = vrot.slane %v3736_v6, 9  ;;  %v1717_v30 = vrot.slane %v1716_v20, 4  ;;  %v1533_v31 = vrot.slane %v1531_v22, 4  ;;  %v2117_v33 = vrot.slane %v3737_v7, 5  ;;  %v4552_v51 = vpop.permute.xlu1 %1167  ;;  %v3841_v6 = vld [vmem:[%s4165_s19 + $0x40] sm:$0xf] }
  0x93   : > { %v1539_v32 = vrot.slane %v1537_v23, 5  ;;  %1157 = vrot.lane.b32.xlu0 %v3578_v8, %s4114_s22  ;;  %v1727_v36 = vrot.slane %v1726_v25, 4  ;;  %v1524_v37 = vor.u32 %v1523_v26, %v1520_v21  ;;  %v2120_v38 = vrot.slane %v3738_v12, 5  ;;  %v4056_v7 = vld [vmem:[%s4165_s19] sm:$0xff]   ;;  %338 = vst.msk [vmem:[#allocation2 + $0x50] sm:$0xff] %vm327_vm6, %v4066_v11 }
  0x94   : > { %v3754_v39 = vrot.slane %v3712_v17, 9  ;;  %1354 = vrot.lane.b32.xlu1 %v4052_v19, %s4112_s20  ;;  %v1722_v41 = vsel %vm4208_vm5, %v1717_v30, %v1721_v10  ;;  %v1534_v42 = vor.u32 %v1533_v31, %v1529_v27  ;;  %v2118_v43 = vsel %vm4167_vm2, %v3762_v28, %v2117_v33  ;;  %v4057_v8 = vld [vmem:[%s4165_s19 + $0x60] sm:$0xff]   ;;  %v4061_v10 = vld [vmem:[%s4165_s19 + $0xc] sm:$0xff]   ;;  %v4067_v17 = vld [vmem:[%s4165_s19 + $0x18] sm:$0xff]   ;;  %328 = vst.msk [vmem:[#allocation2] sm:$0xff] %vm327_vm6, %v4056_v7 }
  0x95   : > { %v2119_v44 = vrot.slane %v2117_v33, 4  ;;  %v1732_v45 = vsel %vm4208_vm5, %v1727_v36, %v1731_v14  ;;  %v1525_v46 = vrot.slane %v1524_v37, 4  ;;  %v2061_v48 = vrot.slane %v3713_v24, 5  ;;  %v4072_v19 = vld [vmem:[%s4165_s19 + $0x84] sm:$0xff]   ;;  %v3928_v24 = vld [vmem:[%s4165_s19 + $0x9c] sm:$0xe] }
  0x96   : > { %v2064_v49 = vrot.slane %v3714_v34, 5  ;;  %v3698_v52 = vcombine.low %v1722_v41, %v1732_v45  ;;  %v1535_v54 = vrot.slane %v1534_v42, 4  ;;  %v2757_v57 = vshrl.u32 %v3864_v40, 16  ;;  %v4073_v25 = vld [vmem:[%s4165_s19 + $0x24] sm:$0xff]   ;;  %v3929_v31 = vld [vmem:[%s4165_s19 + $0xa0] sm:$0xf]  ;;  %v4586_v33 = vpop.permute.xlu1 %2214 }
  0x97   : > { %v2121_v55 = vsel %vm4167_vm2, %v2119_v44, %v2120_v38  ;;  %1338 = vrot.lane.b32.xlu0 %v4053_v35, %s4112_s20  ;;  %v1530_v58 = vsel %vm4208_vm5, %v1525_v46, %v1529_v27  ;;  %v2062_v61 = vsel %vm4167_vm2, %v3754_v39, %v2061_v48  ;;  %v2063_v62 = vrot.slane %v2061_v48, 4  ;;  %v4054_v34 = vld [vmem:[%s4165_s19 + $0x9c] sm:$0xff]   ;;  %336 = vst.msk [vmem:[#allocation2 + $0x40] sm:$0xff] %vm327_vm6, %v4057_v8  ;;  %v381_v7 = vld [vmem:[%s4165_s19 + $0x94] sm:$0xf] }
  0x98   : > { %v3778_v60 = vcombine.low %v2118_v43, %v2121_v55  ;;  %v4563_v1 = vpop.permute.xlu0 %827  ;;  %1899 = vrot.lane.b32.xlu1 %v3698_v52, %s4116_s24  ;;  %v1540_v2 = vsel %vm4208_vm5, %v1535_v54, %v1539_v32  ;;  %v2759_v3 = vrot.slane %v2757_v57, 4  ;;  %v2760_v4 = vshll.u32 %v3864_v40, 16  ;;  %v4584_v32 = vld [vmem:[%s4165_s19 + $0xa4] sm:$0x1]  ;;  %v3904_v39 = vld [vmem:[%s4165_s19 + $0x3c] sm:$0xe] }
  0x99   : > { %v2766_v5 = vshll.u32 %v3865_v50, 16  ;;  %v3690_v12 = vcombine.low %v1530_v58, %v1540_v2  ;;  %v2065_v13 = vsel %vm4167_vm2, %v2063_v62, %v2064_v49  ;;  %v2770_v14 = vshrl.u32 %v3865_v50, 16  ;;  %v3905_v48 = vld [vmem:[%s4165_s19 + $0x40] sm:$0xf]  ;;  %329 = vst.msk [vmem:[#allocation2 + $0x8] sm:$0xff] %vm327_vm6, %v4061_v10  ;;  %330 = vst.msk [vmem:[#allocation2 + $0x10] sm:$0xff] %vm327_vm6, %v4067_v17 }
  0x9a   : > { %v2776_v15 = vshll.u32 %v3866_v56, 16  ;;  %v3770_v20 = vcombine.low %v2062_v61, %v2065_v13  ;;  %v2762_v21 = vrot.slane %v2760_v4, 5  ;;  %v2565_v23 = vshrl.u32 %v3840_v63, 16  ;;  %339 = vst.msk [vmem:[#allocation2 + $0x58] sm:$0xff] %vm327_vm6, %v4072_v19  ;;  %331 = vst.msk [vmem:[#allocation2 + $0x18] sm:$0xff] %vm327_vm6, %v4073_v25  ;;  %v4055_v49 = vld [vmem:[%s4165_s19 + $0x3c] sm:$0xff]  }
  0x9b   : > { %v2768_v22 = vrot.slane %v2766_v5, 5  ;;  %1883 = vrot.lane.b32.xlu0 %v3690_v12, %s4116_s24  ;;  %v2772_v26 = vrot.slane %v2770_v14, 4  ;;  %v2568_v28 = vshll.u32 %v3840_v63, 16  ;;  %v2574_v30 = vshll.u32 %v3841_v6, 16  ;;  %876 = vst.msk [vmem:[#allocation2] sm:$0xff] %vm875_vm7, %v4563_v1 }
  0x9c   : > { %v2778_v27 = vrot.slane %v2776_v15, 5  ;;  %2220 = vrot.lane.b32.xlu1 %v3778_v60, %s4113_s21  ;;  %v2763_v35 = vor.u32 %v2762_v21, %v2759_v3  ;;  %v2567_v36 = vrot.slane %v2565_v23, 4  ;;  %v2578_v37 = vshrl.u32 %v3841_v6, 16  ;;  %v844_v40 = vpop.permute.xlu0 %843  ;;  %1200 = vst.msk [vmem:[#allocation2] sm:$0xff] %vm1199_vm8, %v4533_v18  ;;  %v3906_v60 = vld [vmem:[%s4165_s19 + $0x44] sm:$0x1] }
  0x9d   : > { %v2584_v38 = vshll.u32 %v3842_v16, 16  ;;  %v2773_v41 = vor.u32 %v2772_v26, %v2768_v22  ;;  %v2570_v42 = vrot.slane %v2568_v28, 5  ;;  %v2576_v43 = vrot.slane %v2574_v30, 5  ;;  %884 = vst.msk [vmem:[#allocation2 + $0x40] sm:$0xff] %vm875_vm7, %v844_v40  ;;  %v380_v2 = vld [vmem:[%s4165_s19 + $0x90] sm:$0xf] }
  0x9e   : > { %v2764_v44 = vrot.slane %v2763_v35, 4  ;;  %v2580_v45 = vrot.slane %v2578_v37, 4  ;;  %v3954_v54 = vrot.slane %v3928_v24, 9  ;;  %v3164_v57 = vrot.slane %v3929_v31, 5  ;;  %1208 = vst.msk [vmem:[#allocation2 + $0x40] sm:$0xff] %vm1199_vm8, %v4552_v51 }
  0x9f   : > { %v2586_v46 = vrot.slane %v2584_v38, 5  ;;  %2204 = vrot.lane.b32.xlu0 %v3770_v20, %s4113_s21  ;;  %v2774_v50 = vrot.slane %v2773_v41, 4  ;;  %v2571_v52 = vor.u32 %v2570_v42, %v2567_v36  ;;  %v3167_v58 = vrot.slane %v4584_v32, 5  ;;  %v382_v11 = vld [vmem:[%s4165_s19 + $0x98] sm:$0x1]  ;;  %1389 = vst.msk [vmem:[#allocation2 + $0x40] sm:$0xff] %vm1380_vm9, %v4510_v47 }
  0xa0   : > { %2401 = vrot.lane.b32.xlu1 %v4054_v34, %s4117_s25  ;;  %v2769_v55 = vsel %vm4208_vm5, %v2764_v44, %v2768_v22  ;;  %v2581_v56 = vor.u32 %v2580_v45, %v2576_v43  ;;  %v3946_v63 = vrot.slane %v3904_v39, 9  ;;  %v3108_v1 = vrot.slane %v3905_v48, 5  ;;  %v356_v16 = vld [vmem:[%s4165_s19 + $0x30] sm:$0xf]  ;;  %v357_v17 = vld [vmem:[%s4165_s19 + $0x34] sm:$0xf] }
  0xa1   : > { %v2779_v61 = vsel %vm4208_vm5, %v2774_v50, %v2778_v27  ;;  %v2572_v62 = vrot.slane %v2571_v52, 4  ;;  %v4617_v3 = vpop.permute.xlu1 %1893  ;;  %v3165_v5 = vsel %vm4167_vm2, %v3954_v54, %v3164_v57  ;;  %v3166_v6 = vrot.slane %v3164_v57, 4  ;;  %v358_v24 = vld [vmem:[%s4165_s19 + $0x38] sm:$0x1]  ;;  %v928_v36 = vld [vmem:[%s4165_s19 + $0x90] sm:$0xe] }
  0xa2   : > { %v3890_v4 = vcombine.low %v2769_v55, %v2779_v61  ;;  %v2582_v18 = vrot.slane %v2581_v56, 4  ;;  %v3109_v8 = vsel %vm4167_vm2, %v3946_v63, %v3108_v1  ;;  %v3110_v9 = vrot.slane %v3108_v1, 4  ;;  %v929_v41 = vld [vmem:[%s4165_s19 + $0x94] sm:$0xf]  ;;  %v930_v42 = vld [vmem:[%s4165_s19 + $0x98] sm:$0x1] }
  0xa3   : > { %2385 = vrot.lane.b32.xlu0 %v4055_v49, %s4117_s25  ;;  %v2577_v51 = vsel %vm4208_vm5, %v2572_v62, %v2576_v43  ;;  %v3111_v10 = vrot.slane %v3906_v60, 5  ;;  %v3168_v13 = vsel %vm4167_vm2, %v3166_v6, %v3167_v58  ;;  %v684_v14 = vshrl.u32 %v380_v2, 16  ;;  %v904_v43 = vld [vmem:[%s4165_s19 + $0x30] sm:$0xe]  ;;  %v905_v50 = vld [vmem:[%s4165_s19 + $0x34] sm:$0xf] }
  0xa4   : > { %2946 = vrot.lane.b32.xlu1 %v3890_v4, %s4118_s26  ;;  %v2587_v12 = vsel %vm4208_vm5, %v2582_v18, %v2586_v46  ;;  %v687_v15 = vshll.u32 %v380_v2, 16  ;;  %v3970_v21 = vcombine.low %v3165_v5, %v3168_v13  ;;  %v693_v23 = vshll.u32 %v381_v7, 16  ;;  %v906_v52 = vld [vmem:[%s4165_s19 + $0x38] sm:$0x1]  ;;  %1381 = vst.msk [vmem:[#allocation2] sm:$0xff] %vm1380_vm9, %v4520_v59 }
  0xa5   : > { %v1878_v19 = vpop.permute.xlu0 %1877  ;;  %v3882_v20 = vcombine.low %v2577_v51, %v2587_v12  ;;  %v3112_v22 = vsel %vm4167_vm2, %v3110_v9, %v3111_v10  ;;  %v4638_v25 = vpop.permute.xlu1 %2395  ;;  %v686_v27 = vrot.slane %v684_v14, 4  ;;  %v697_v30 = vshrl.u32 %v381_v7, 16  ;;  %1934 = vst.msk [vmem:[#allocation2 + $0x40] sm:$0xff] %vm1925_vm10, %v4617_v3  ;;  %v3675_v12 = vld [vmem:[%s4165_s19 + $0x9c] sm:$0xf] }
  0xa6   : > { %v3962_v26 = vcombine.low %v3109_v8, %v3112_v22  ;;  %v689_v28 = vrot.slane %v687_v15, 5  ;;  %v695_v31 = vrot.slane %v693_v23, 5  ;;  %v703_v32 = vshll.u32 %v382_v11, 16  ;;  %1926 = vst.msk [vmem:[#allocation2] sm:$0xff] %vm1925_vm10, %v1878_v19  ;;  %v3651_v22 = vld [vmem:[%s4165_s19 + $0x3c] sm:$0xf] }
  0xa7   : > { %2930 = vrot.lane.b32.xlu0 %v3882_v20, %s4118_s26  ;;  %v492_v34 = vshrl.u32 %v356_v16, 16  ;;  %v495_v35 = vshll.u32 %v356_v16, 16  ;;  %v699_v38 = vrot.slane %v697_v30, 4  ;;  %v501_v39 = vshll.u32 %v357_v17, 16  ;;  %v3676_v16 = vld [vmem:[%s4165_s19 + $0xa0] sm:$0xf] }
  0xa8   : > { %3267 = vrot.lane.b32.xlu1 %v3970_v21, %s4119_s27  ;;  %v690_v37 = vor.u32 %v689_v28, %v686_v27  ;;  %v505_v40 = vshrl.u32 %v357_v17, 16  ;;  %v705_v45 = vrot.slane %v703_v32, 5  ;;  %v511_v49 = vshll.u32 %v358_v24, 16  ;;  %v3677_v17 = vld [vmem:[%s4165_s19 + $0xa4] sm:$0x1]  ;;  %2255 = vst.msk [vmem:[#allocation2 + $0x40] sm:$0xff] %vm2246_vm11, %v4586_v33 }
  0xa9   : > { %v2380_v44 = vpop.permute.xlu0 %2379  ;;  %v494_v46 = vrot.slane %v492_v34, 4  ;;  %v497_v48 = vrot.slane %v495_v35, 5  ;;  %v700_v55 = vor.u32 %v699_v38, %v695_v31  ;;  %v503_v56 = vrot.slane %v501_v39, 5  ;;  %v2941_v58 = vpop.permute.xlu1 %2940  ;;  %2247 = vst.msk [vmem:[#allocation2] sm:$0xff] %vm2246_vm11, %v4538_v29  ;;  %v3652_v28 = vld [vmem:[%s4165_s19 + $0x40] sm:$0xf] }
  0xaa   : > { %v691_v54 = vrot.slane %v690_v37, 4  ;;  %v507_v57 = vrot.slane %v505_v40, 4  ;;  %v513_v61 = vrot.slane %v511_v49, 5  ;;  %v3571_v2 = vrot.slane %v928_v36, 9  ;;  %2436 = vst.msk [vmem:[#allocation2 + $0x40] sm:$0xff] %vm2427_vm12, %v4638_v25  ;;  %2428 = vst.msk [vmem:[#allocation2] sm:$0xff] %vm2427_vm12, %v2380_v44 }
  0xab   : > { %3251 = vrot.lane.b32.xlu0 %v3962_v26, %s4119_s27  ;;  %v498_v60 = vor.u32 %v497_v48, %v494_v46  ;;  %v701_v63 = vrot.slane %v700_v55, 4  ;;  %v1077_v18 = vrot.slane %v929_v41, 5  ;;  %v1080_v5 = vrot.slane %v930_v42, 5  ;;  %v4058_v33 = vld [vmem:[%s4165_s19 + $0x9c] sm:$0xff]   ;;  %2981 = vst.msk [vmem:[#allocation2 + $0x40] sm:$0xff] %vm2972_vm13, %v2941_v58  ;;  %v4078_v35 = vld [vmem:[%s4165_s19 + $0x90] sm:$0xff]  }
  0xac   : > { %v696_v62 = vsel %vm4208_vm5, %v691_v54, %v695_v31  ;;  %v508_v1 = vor.u32 %v507_v57, %v503_v56  ;;  %v3563_v6 = vrot.slane %v904_v43, 9  ;;  %v1021_v51 = vrot.slane %v905_v50, 5  ;;  %v3653_v34 = vld [vmem:[%s4165_s19 + $0x44] sm:$0x1]  ;;  %v3739_v40 = vld [vmem:[%s4165_s19 + $0x9c] sm:$0xe] }
  0xad   : > { %v499_v4 = vrot.slane %v498_v60, 4  ;;  %v706_v7 = vsel %vm4208_vm5, %v701_v63, %v705_v45  ;;  %v1024_v8 = vrot.slane %v906_v52, 5  ;;  %v1078_v3 = vsel %vm4167_vm2, %v3571_v2, %v1077_v18  ;;  %v3262_v19 = vpop.permute.xlu1 %3261  ;;  %v3740_v45 = vld [vmem:[%s4165_s19 + $0xa0] sm:$0xf]  ;;  %340 = vst.msk [vmem:[#allocation2 + $0x60] sm:$0xff] %vm327_vm6, %v4078_v35  ;;  %v4079_v55 = vld [vmem:[%s4165_s19 + $0x30] sm:$0xff]  }
  0xae   : > { %v509_v47 = vrot.slane %v508_v1, 4  ;;  %v3555_v9 = vcombine.low %v696_v62, %v706_v7  ;;  %v1079_v11 = vrot.slane %v1077_v18, 4  ;;  %v1022_v14 = vsel %vm4167_vm2, %v3563_v6, %v1021_v51  ;;  %v3741_v52 = vld [vmem:[%s4165_s19 + $0xa4] sm:$0x1]  ;;  %3302 = vst.msk [vmem:[#allocation2 + $0x40] sm:$0xff] %vm3293_vm14, %v3262_v19 }
  0xaf   : > { %v2925_v59 = vpop.permute.xlu0 %2924  ;;  %v504_v10 = vsel %vm4208_vm5, %v499_v4, %v503_v56  ;;  %v1023_v15 = vrot.slane %v1021_v51, 4  ;;  %v1734_v26 = vshrl.u32 %v3675_v12, 16  ;;  %v1737_v27 = vshll.u32 %v3675_v12, 16  ;;  %v4059_v56 = vld [vmem:[%s4165_s19 + $0x3c] sm:$0xff]   ;;  %332 = vst.msk [vmem:[#allocation2 + $0x20] sm:$0xff] %vm327_vm6, %v4079_v55  ;;  %v4062_v55 = vld [vmem:[%s4165_s19 + $0xa8] sm:$0xff]  }
  0xb0   : > { %v514_v13 = vsel %vm4208_vm5, %v509_v47, %v513_v61  ;;  %851 = vrot.lane.b32.xlu1 %v3555_v9, %s4115_s23  ;;  %v1081_v21 = vsel %vm4167_vm2, %v1079_v11, %v1080_v5  ;;  %2973 = vst.msk [vmem:[#allocation2] sm:$0xff] %vm2972_vm13, %v2925_v59  ;;  %v1743_v30 = vshll.u32 %v3676_v16, 16  ;;  %v1747_v31 = vshrl.u32 %v3676_v16, 16  ;;  %v3715_v61 = vld [vmem:[%s4165_s19 + $0x3c] sm:$0xe] }
  0xb1   : > { %v3547_v20 = vcombine.low %v504_v10, %v514_v13  ;;  %v3587_v23 = vcombine.low %v1078_v3, %v1081_v21  ;;  %v1025_v24 = vsel %vm4167_vm2, %v1023_v15, %v1024_v8  ;;  %v1753_v32 = vshll.u32 %v3677_v17, 16  ;;  %v3716_v4 = vld [vmem:[%s4165_s19 + $0x40] sm:$0xf]  ;;  %v3717_v47 = vld [vmem:[%s4165_s19 + $0x44] sm:$0x1] }
  0xb2   : > { %v3579_v29 = vcombine.low %v1022_v14, %v1025_v24  ;;  %v1736_v36 = vrot.slane %v1734_v26, 4  ;;  %v1739_v37 = vrot.slane %v1737_v27, 5  ;;  %v1542_v38 = vshrl.u32 %v3651_v22, 16  ;;  %v3867_v15 = vld [vmem:[%s4165_s19 + $0xa8] sm:$0xf] }
  0xb3   : > { %835 = vrot.lane.b32.xlu0 %v3547_v20, %s4115_s23  ;;  %v3246_v25 = vpop.permute.xlu0 %3245  ;;  %v1545_v39 = vshll.u32 %v3651_v22, 16  ;;  %v1745_v41 = vrot.slane %v1743_v30, 5  ;;  %v1749_v42 = vrot.slane %v1747_v31, 4  ;;  %v1755_v43 = vrot.slane %v1753_v32, 5  ;;  %v3868_v16 = vld [vmem:[%s4165_s19 + $0xac] sm:$0xf] }
  0xb4   : > { %1175 = vrot.lane.b32.xlu1 %v3587_v23, %s4114_s22  ;;  %v1551_v44 = vshll.u32 %v3652_v28, 16  ;;  %v1740_v46 = vor.u32 %v1739_v37, %v1736_v36  ;;  %v1544_v48 = vrot.slane %v1542_v38, 4  ;;  %v1555_v50 = vshrl.u32 %v3652_v28, 16  ;;  %3294 = vst.msk [vmem:[#allocation2] sm:$0xff] %vm3293_vm14, %v3246_v25  ;;  %v3869_v22 = vld [vmem:[%s4165_s19 + $0xb0] sm:$0x1] }
  0xb5   : > { %v1547_v49 = vrot.slane %v1545_v39, 5  ;;  %v1750_v57 = vor.u32 %v1749_v42, %v1745_v41  ;;  %v1561_v60 = vshll.u32 %v3653_v34, 16  ;;  %v3763_v2 = vrot.slane %v3739_v40, 9  ;;  %v3843_v23 = vld [vmem:[%s4165_s19 + $0x48] sm:$0xf]  ;;  %v3319_v36 = vld [vmem:[#allocation2 + $0x40] sm:$0xff] }
  0xb6   : > { %v846_v54 = vpop.permute.xlu1 %845  ;;  %v1553_v58 = vrot.slane %v1551_v44, 5  ;;  %v1741_v62 = vrot.slane %v1740_v46, 4  ;;  %v1557_v1 = vrot.slane %v1555_v50, 4  ;;  %v2124_v6 = vrot.slane %v3740_v45, 5  ;;  %v3845_v39 = vld [vmem:[%s4165_s19 + $0x50] sm:$0x1]  ;;  %3997 = vmatprep.subr.msk.bf16.mxu0 %vm3333_vm15, %v3319_v36 }
  0xb7   : > { %1159 = vrot.lane.b32.xlu0 %v3579_v29, %s4114_s22  ;;  %885 = vst.msk [vmem:[#allocation2 + $0x48] sm:$0xff] %vm875_vm7, %v846_v54  ;;  %v1548_v63 = vor.u32 %v1547_v49, %v1544_v48  ;;  %v1751_v18 = vrot.slane %v1750_v57, 4  ;;  %v1563_v5 = vrot.slane %v1561_v60, 5  ;;  %v2127_v7 = vrot.slane %v3741_v52, 5  ;;  %v3844_v29 = vld [vmem:[%s4165_s19 + $0x4c] sm:$0xf] }
  0xb8   : > { %1356 = vrot.lane.b32.xlu1 %v4058_v33, %s4112_s20  ;;  %v1746_v8 = vsel %vm4208_vm5, %v1741_v62, %v1745_v41  ;;  %v1558_v9 = vor.u32 %v1557_v1, %v1553_v58  ;;  %v3755_v10 = vrot.slane %v3715_v61, 9  ;;  %v2125_v12 = vsel %vm4167_vm2, %v3763_v2, %v2124_v6  ;;  %v3931_v44 = vld [vmem:[%s4165_s19 + $0xa8] sm:$0xe]  ;;  %v3932_v54 = vld [vmem:[%s4165_s19 + $0xac] sm:$0xf] }
  0xb9   : > { %v1549_v59 = vrot.slane %v1548_v63, 4  ;;  %v1756_v11 = vsel %vm4208_vm5, %v1751_v18, %v1755_v43  ;;  %v2126_v13 = vrot.slane %v2124_v6, 4  ;;  %v2068_v14 = vrot.slane %v3716_v4, 5  ;;  %v3933_v61 = vld [vmem:[%s4165_s19 + $0xb0] sm:$0x1] }
  0xba   : > { %v830_v51 = vpop.permute.xlu0 %829  ;;  %v1170_v3 = vpop.permute.xlu1 %1169  ;;  %v3699_v17 = vcombine.low %v1746_v8, %v1756_v11  ;;  %v1559_v20 = vrot.slane %v1558_v9, 4  ;;  %v2071_v21 = vrot.slane %v3717_v47, 5  ;;  %v2781_v31 = vshrl.u32 %v3867_v15, 16  ;;  %v3907_v18 = vld [vmem:[%s4165_s19 + $0x48] sm:$0xe] }
  0xbb   : > { %877 = vst.msk [vmem:[#allocation2 + $0x8] sm:$0xff] %vm875_vm7, %v830_v51  ;;  %1340 = vrot.lane.b32.xlu0 %v4059_v56, %s4112_s20  ;;  %v1554_v19 = vsel %vm4208_vm5, %v1549_v59, %v1553_v58  ;;  %v2128_v24 = vsel %vm4167_vm2, %v2126_v13, %v2127_v7  ;;  %v2069_v26 = vsel %vm4167_vm2, %v3755_v10, %v2068_v14  ;;  %v2070_v27 = vrot.slane %v2068_v14, 4  ;;  %v3311_v50 = vld [vmem:[#allocation2] sm:$0xff]  ;;  %v3908_v51 = vld [vmem:[%s4165_s19 + $0x4c] sm:$0xf] }
  0xbc   : > { %1209 = vst.msk [vmem:[#allocation2 + $0x48] sm:$0xff] %vm1199_vm8, %v1170_v3  ;;  %1901 = vrot.lane.b32.xlu1 %v3699_v17, %s4116_s24  ;;  %v1564_v33 = vsel %vm4208_vm5, %v1559_v20, %v1563_v5  ;;  %v3779_v30 = vcombine.low %v2125_v12, %v2128_v24  ;;  %v2784_v32 = vshll.u32 %v3867_v15, 16  ;;  %v2790_v37 = vshll.u32 %v3868_v16, 16  ;;  %v4063_v8 = vld [vmem:[%s4165_s19 + $0x48] sm:$0xff]   ;;  %v383_v17 = vld [vmem:[%s4165_s19 + $0x9c] sm:$0xf] }
  0xbd   : > { %v3691_v25 = vcombine.low %v1554_v19, %v1564_v33  ;;  %v2072_v35 = vsel %vm4167_vm2, %v2070_v27, %v2071_v21  ;;  %v2794_v38 = vshrl.u32 %v3868_v16, 16  ;;  %v2783_v41 = vrot.slane %v2781_v31, 4  ;;  %v3909_v16 = vld [vmem:[%s4165_s19 + $0x50] sm:$0x1]  ;;  %v384_v24 = vld [vmem:[%s4165_s19 + $0xa0] sm:$0xf] }
  0xbe   : > { %v1154_v28 = vpop.permute.xlu0 %1153  ;;  %v1351_v34 = vpop.permute.xlu1 %1350  ;;  %v3771_v40 = vcombine.low %v2069_v26, %v2072_v35  ;;  %v2786_v42 = vrot.slane %v2784_v32, 5  ;;  %v2800_v43 = vshll.u32 %v3869_v22, 16  ;;  %v2792_v45 = vrot.slane %v2790_v37, 5  ;;  %v385_v33 = vld [vmem:[%s4165_s19 + $0xa4] sm:$0x1] }
  0xbf   : > { %1201 = vst.msk [vmem:[#allocation2 + $0x8] sm:$0xff] %vm1199_vm8, %v1154_v28  ;;  %1885 = vrot.lane.b32.xlu0 %v3691_v25, %s4116_s24  ;;  %v2796_v46 = vrot.slane %v2794_v38, 4  ;;  %v2589_v48 = vshrl.u32 %v3843_v23, 16  ;;  %v2592_v49 = vshll.u32 %v3843_v23, 16  ;;  %v2598_v58 = vshll.u32 %v3844_v29, 16 }
  0xc0   : > { %1390 = vst.msk [vmem:[#allocation2 + $0x48] sm:$0xff] %vm1380_vm9, %v1351_v34  ;;  %2222 = vrot.lane.b32.xlu1 %v3779_v30, %s4113_s21  ;;  %v2787_v56 = vor.u32 %v2786_v42, %v2783_v41  ;;  %v2802_v57 = vrot.slane %v2800_v43, 5  ;;  %v2602_v60 = vshrl.u32 %v3844_v29, 16  ;;  %v2608_v4 = vshll.u32 %v3845_v39, 16  ;;  %v359_v30 = vld [vmem:[%s4165_s19 + $0x3c] sm:$0xf] }
  0xc1   : > { %v2797_v63 = vor.u32 %v2796_v46, %v2792_v45  ;;  %v2591_v1 = vrot.slane %v2589_v48, 4  ;;  %v2594_v2 = vrot.slane %v2592_v49, 5  ;;  %v2600_v6 = vrot.slane %v2598_v58, 5  ;;  %v360_v35 = vld [vmem:[%s4165_s19 + $0x40] sm:$0xf] }
  0xc2   : > { %v1335_v52 = vpop.permute.xlu0 %1334  ;;  %v1896_v62 = vpop.permute.xlu1 %1895  ;;  %v2788_v5 = vrot.slane %v2787_v56, 4  ;;  %v2604_v7 = vrot.slane %v2602_v60, 4  ;;  %v3338_v47 = vsel %vm3333_vm15, %v3311_v50, 0  ;;  %v2610_v10 = vrot.slane %v2608_v4, 5  ;;  %v361_v41 = vld [vmem:[%s4165_s19 + $0x44] sm:$0x1] }
  0xc3   : > { %1382 = vst.msk [vmem:[#allocation2 + $0x8] sm:$0xff] %vm1380_vm9, %v1335_v52  ;;  %2206 = vrot.lane.b32.xlu0 %v3771_v40, %s4113_s21  ;;  %v2798_v59 = vrot.slane %v2797_v63, 4  ;;  %v2595_v9 = vor.u32 %v2594_v2, %v2591_v1  ;;  %3980 = vmatpush3.bf16.xpose.msra.mxu0 %v3338_v47  ;;  %v3955_v3 = vrot.slane %v3931_v44, 9  ;;  %v3171_v14 = vrot.slane %v3932_v54, 5  ;;  %v4082_v48 = vld [vmem:[%s4165_s19 + $0x9c] sm:$0xff]  }
  0xc4   : > { %1935 = vst.msk [vmem:[#allocation2 + $0x48] sm:$0xff] %vm1925_vm10, %v1896_v62  ;;  %2403 = vrot.lane.b32.xlu1 %v4062_v55, %s4117_s25  ;;  %v2793_v12 = vsel %vm4208_vm5, %v2788_v5, %v2792_v45  ;;  %v2605_v13 = vor.u32 %v2604_v7, %v2600_v6  ;;  %v3174_v15 = vrot.slane %v3933_v61, 5  ;;  %v3947_v22 = vrot.slane %v3907_v18, 9  ;;  %v931_v55 = vld [vmem:[%s4165_s19 + $0x9c] sm:$0xe] }
  0xc5   : > { %v2803_v20 = vsel %vm4208_vm5, %v2798_v59, %v2802_v57  ;;  %v2596_v21 = vrot.slane %v2595_v9, 4  ;;  %v3115_v23 = vrot.slane %v3908_v51, 5  ;;  %v3172_v28 = vsel %vm4167_vm2, %v3955_v3, %v3171_v14  ;;  %v932_v56 = vld [vmem:[%s4165_s19 + $0xa0] sm:$0xf]  ;;  %341 = vst.msk [vmem:[#allocation2 + $0x68] sm:$0xff] %vm327_vm6, %v4082_v48 }
  0xc6   : > { %v1880_v11 = vpop.permute.xlu0 %1879  ;;  %v2217_v19 = vpop.permute.xlu1 %2216  ;;  %v3891_v26 = vcombine.low %v2793_v12, %v2803_v20  ;;  %v2606_v27 = vrot.slane %v2605_v13, 4  ;;  %v3173_v29 = vrot.slane %v3171_v14, 4  ;;  %v3118_v25 = vrot.slane %v3909_v16, 5  ;;  %v4083_v57 = vld [vmem:[%s4165_s19 + $0x3c] sm:$0xff]   ;;  %v933_v5 = vld [vmem:[%s4165_s19 + $0xa4] sm:$0x1] }
  0xc7   : > { %1927 = vst.msk [vmem:[#allocation2 + $0x8] sm:$0xff] %vm1925_vm10, %v1880_v11  ;;  %2387 = vrot.lane.b32.xlu0 %v4063_v8, %s4117_s25  ;;  %v2601_v31 = vsel %vm4208_vm5, %v2596_v21, %v2600_v6  ;;  %v3116_v32 = vsel %vm4167_vm2, %v3947_v22, %v3115_v23  ;;  %v3117_v34 = vrot.slane %v3115_v23, 4  ;;  %v708_v39 = vshrl.u32 %v383_v17, 16  ;;  %v907_v59 = vld [vmem:[%s4165_s19 + $0x3c] sm:$0xe] }
  0xc8   : > { %2256 = vst.msk [vmem:[#allocation2 + $0x48] sm:$0xff] %vm2246_vm11, %v2217_v19  ;;  %2948 = vrot.lane.b32.xlu1 %v3891_v26, %s4118_s26  ;;  %v2611_v37 = vsel %vm4208_vm5, %v2606_v27, %v2610_v10  ;;  %v3175_v38 = vsel %vm4167_vm2, %v3173_v29, %v3174_v15  ;;  %v711_v40 = vshll.u32 %v383_v17, 16  ;;  %v717_v46 = vshll.u32 %v384_v24, 16  ;;  %v908_v12 = vld [vmem:[%s4165_s19 + $0x40] sm:$0xf] }
  0xc9   : > { %v3883_v43 = vcombine.low %v2601_v31, %v2611_v37  ;;  %v3971_v44 = vcombine.low %v3172_v28, %v3175_v38  ;;  %v3119_v45 = vsel %vm4167_vm2, %v3117_v34, %v3118_v25  ;;  %v710_v50 = vrot.slane %v708_v39, 4  ;;  %333 = vst.msk [vmem:[#allocation2 + $0x28] sm:$0xff] %vm327_vm6, %v4083_v57  ;;  %v909_v17 = vld [vmem:[%s4165_s19 + $0x44] sm:$0x1]  ;;  %v3679_v25 = vld [vmem:[%s4165_s19 + $0xac] sm:$0xf] }
  0xca   : > { %v2201_v36 = vpop.permute.xlu0 %2200  ;;  %v2398_v42 = vpop.permute.xlu1 %2397  ;;  %v3963_v49 = vcombine.low %v3116_v32, %v3119_v45  ;;  %v713_v52 = vrot.slane %v711_v40, 5  ;;  %v721_v54 = vshrl.u32 %v384_v24, 16  ;;  %v719_v58 = vrot.slane %v717_v46, 5  ;;  %v3678_v24 = vld [vmem:[%s4165_s19 + $0xa8] sm:$0xf] }
  0xcb   : > { %2248 = vst.msk [vmem:[#allocation2 + $0x8] sm:$0xff] %vm2246_vm11, %v2201_v36  ;;  %2932 = vrot.lane.b32.xlu0 %v3883_v43, %s4118_s26  ;;  %v727_v60 = vshll.u32 %v385_v33, 16  ;;  %v516_v61 = vshrl.u32 %v359_v30, 16  ;;  %v519_v62 = vshll.u32 %v359_v30, 16  ;;  %v525_v4 = vshll.u32 %v360_v35, 16 }
  0xcc   : > { %2437 = vst.msk [vmem:[#allocation2 + $0x48] sm:$0xff] %vm2427_vm12, %v2398_v42  ;;  %3269 = vrot.lane.b32.xlu1 %v3971_v44, %s4119_s27  ;;  %v714_v1 = vor.u32 %v713_v52, %v710_v50  ;;  %v723_v2 = vrot.slane %v721_v54, 4  ;;  %v529_v18 = vshrl.u32 %v360_v35, 16  ;;  %v535_v8 = vshll.u32 %v361_v41, 16  ;;  %v3680_v38 = vld [vmem:[%s4165_s19 + $0xb0] sm:$0x1] }
  0xcd   : > { %v729_v7 = vrot.slane %v727_v60, 5  ;;  %v518_v47 = vrot.slane %v516_v61, 4  ;;  %v521_v51 = vrot.slane %v519_v62, 5  ;;  %v527_v3 = vrot.slane %v525_v4, 5  ;;  %v3654_v40 = vld [vmem:[%s4165_s19 + $0x48] sm:$0xf] }
  0xce   : > { %v2382_v63 = vpop.permute.xlu0 %2381  ;;  %v2943_v6 = vpop.permute.xlu1 %2942  ;;  %v715_v9 = vrot.slane %v714_v1, 4  ;;  %v724_v10 = vor.u32 %v723_v2, %v719_v58  ;;  %v531_v11 = vrot.slane %v529_v18, 4  ;;  %v537_v14 = vrot.slane %v535_v8, 5  ;;  %v3655_v46 = vld [vmem:[%s4165_s19 + $0x4c] sm:$0xf] }
  0xcf   : > { %2429 = vst.msk [vmem:[#allocation2 + $0x8] sm:$0xff] %vm2427_vm12, %v2382_v63  ;;  %3253 = vrot.lane.b32.xlu0 %v3963_v49, %s4119_s27  ;;  %v522_v13 = vor.u32 %v521_v51, %v518_v47  ;;  %v3572_v15 = vrot.slane %v931_v55, 9  ;;  %v1084_v16 = vrot.slane %v932_v56, 5  ;;  %v1087_v23 = vrot.slane %v933_v5, 5  ;;  %v3656_v48 = vld [vmem:[%s4165_s19 + $0x50] sm:$0x1] }
  0xd0   : > { %2982 = vst.msk [vmem:[#allocation2 + $0x48] sm:$0xff] %vm2972_vm13, %v2943_v6  ;;  %v720_v20 = vsel %vm4208_vm5, %v715_v9, %v719_v58  ;;  %v725_v21 = vrot.slane %v724_v10, 4  ;;  %v532_v22 = vor.u32 %v531_v11, %v527_v3  ;;  %v3564_v33 = vrot.slane %v907_v59, 9  ;;  %v3742_v55 = vld [vmem:[%s4165_s19 + $0xa8] sm:$0xe] }
  0xd1   : > { %v523_v27 = vrot.slane %v522_v13, 4  ;;  %v1085_v28 = vsel %vm4167_vm2, %v3572_v15, %v1084_v16  ;;  %v1086_v29 = vrot.slane %v1084_v16, 4  ;;  %v1028_v32 = vrot.slane %v908_v12, 5  ;;  %v3743_v61 = vld [vmem:[%s4165_s19 + $0xac] sm:$0xf] }
  0xd2   : > { %v2927_v19 = vpop.permute.xlu0 %2926  ;;  %v3264_v26 = vpop.permute.xlu1 %3263  ;;  %v730_v30 = vsel %vm4208_vm5, %v725_v21, %v729_v7  ;;  %v533_v31 = vrot.slane %v532_v22, 4  ;;  %v1031_v34 = vrot.slane %v909_v17, 5  ;;  %v1758_v39 = vshrl.u32 %v3678_v24, 16  ;;  %v3744_v4 = vld [vmem:[%s4165_s19 + $0xb0] sm:$0x1]  ;;  %v4064_v8 = vld [vmem:[%s4165_s19 + $0xa8] sm:$0xff]  }
  0xd3   : > { %2974 = vst.msk [vmem:[#allocation2 + $0x8] sm:$0xff] %vm2972_vm13, %v2927_v19  ;;  %v3556_v35 = vcombine.low %v720_v20, %v730_v30  ;;  %v528_v36 = vsel %vm4208_vm5, %v523_v27, %v527_v3  ;;  %v1088_v37 = vsel %vm4167_vm2, %v1086_v29, %v1087_v23  ;;  %v1029_v44 = vsel %vm4167_vm2, %v3564_v33, %v1028_v32  ;;  %v3718_v11 = vld [vmem:[%s4165_s19 + $0x48] sm:$0xe]  ;;  %v3719_v16 = vld [vmem:[%s4165_s19 + $0x4c] sm:$0xf] }
  0xd4   : > { %3303 = vst.msk [vmem:[#allocation2 + $0x48] sm:$0xff] %vm3293_vm14, %v3264_v26  ;;  %v538_v42 = vsel %vm4208_vm5, %v533_v31, %v537_v14  ;;  %v3588_v43 = vcombine.low %v1085_v28, %v1088_v37  ;;  %v1030_v45 = vrot.slane %v1028_v32, 4  ;;  %v1760_v50 = vrot.slane %v1758_v39, 4  ;;  %v4065_v17 = vld [vmem:[%s4165_s19 + $0x48] sm:$0xff]   ;;  %v3720_v23 = vld [vmem:[%s4165_s19 + $0x50] sm:$0x1] }
  0xd5   : > { %853 = vrot.lane.b32.xlu1 %v3556_v35, %s4115_s23  ;;  %v3548_v49 = vcombine.low %v528_v36, %v538_v42  ;;  %v1761_v52 = vshll.u32 %v3678_v24, 16  ;;  %v1767_v54 = vshll.u32 %v3679_v25, 16  ;;  %v1771_v57 = vshrl.u32 %v3679_v25, 16  ;;  %v3870_v25 = vld [vmem:[%s4165_s19 + $0xb4] sm:$0xf] }
  0xd6   : > { %v3248_v41 = vpop.permute.xlu0 %3247  ;;  %v1032_v56 = vsel %vm4167_vm2, %v1030_v45, %v1031_v34  ;;  %v1777_v58 = vshll.u32 %v3680_v38, 16  ;;  %v1566_v60 = vshrl.u32 %v3654_v40, 16  ;;  %v1569_v2 = vshll.u32 %v3654_v40, 16  ;;  %v3871_v39 = vld [vmem:[%s4165_s19 + $0xb8] sm:$0xf] }
  0xd7   : > { %3295 = vst.msk [vmem:[#allocation2 + $0x8] sm:$0xff] %vm3293_vm14, %v3248_v41  ;;  %837 = vrot.lane.b32.xlu0 %v3548_v49, %s4115_s23  ;;  %v3580_v62 = vcombine.low %v1029_v44, %v1032_v56  ;;  %v1763_v63 = vrot.slane %v1761_v52, 5  ;;  %v1769_v1 = vrot.slane %v1767_v54, 5  ;;  %v1773_v18 = vrot.slane %v1771_v57, 4  ;;  %v3872_v40 = vld [vmem:[%s4165_s19 + $0xbc] sm:$0x1] }
  0xd8   : > { %v1779_v5 = vrot.slane %v1777_v58, 5  ;;  %v1568_v6 = vrot.slane %v1566_v60, 4  ;;  %v1575_v7 = vshll.u32 %v3655_v46, 16  ;;  %v1571_v9 = vrot.slane %v1569_v2, 5 }
  0xd9   : > { %1177 = vrot.lane.b32.xlu1 %v3588_v43, %s4114_s22  ;;  %v1764_v59 = vor.u32 %v1763_v63, %v1760_v50  ;;  %v1579_v10 = vshrl.u32 %v3655_v46, 16  ;;  %v1585_v3 = vshll.u32 %v3656_v48, 16  ;;  %v1774_v12 = vor.u32 %v1773_v18, %v1769_v1  ;;  %v3846_v46 = vld [vmem:[%s4165_s19 + $0x54] sm:$0xf]  ;;  %v3847_v48 = vld [vmem:[%s4165_s19 + $0x58] sm:$0xf] }
  0xda   : > { %v848_v47 = vpop.permute.xlu1 %847  ;;  %v1577_v13 = vrot.slane %v1575_v7, 5  ;;  %v3764_v14 = vrot.slane %v3742_v55, 9  ;;  %v2131_v15 = vrot.slane %v3743_v61, 5  ;;  %v1572_v20 = vor.u32 %v1571_v9, %v1568_v6  ;;  %v3848_v55 = vld [vmem:[%s4165_s19 + $0x5c] sm:$0x1] }
  0xdb   : > { %v3320_v51 = vld [vmem:[#allocation2 + $0x48] sm:$0xff]  ;;  %886 = vst.msk [vmem:[#allocation2 + $0x50] sm:$0xff] %vm875_vm7, %v848_v47  ;;  %1161 = vrot.lane.b32.xlu0 %v3580_v62, %s4114_s22  ;;  %v1765_v19 = vrot.slane %v1764_v59, 4  ;;  %v1581_v21 = vrot.slane %v1579_v10, 4  ;;  %v1587_v22 = vrot.slane %v1585_v3, 5  ;;  %v1775_v26 = vrot.slane %v1774_v12, 4 }
  0xdc   : > { %3998 = vmatprep.subr.msk.bf16.mxu0 %vm3333_vm15, %v3320_v51  ;;  %v2132_v27 = vsel %vm4167_vm2, %v3764_v14, %v2131_v15  ;;  %v2133_v28 = vrot.slane %v2131_v15, 4  ;;  %v2134_v29 = vrot.slane %v3744_v4, 5  ;;  %v1573_v31 = vrot.slane %v1572_v20, 4  ;;  %v3934_v18 = vld [vmem:[%s4165_s19 + $0xb4] sm:$0xe] }
  0xdd   : > { %v832_v24 = vpop.permute.xlu0 %831  ;;  %1358 = vrot.lane.b32.xlu1 %v4064_v8, %s4112_s20  ;;  %v1770_v30 = vsel %vm4208_vm5, %v1765_v19, %v1769_v1  ;;  %v1582_v32 = vor.u32 %v1581_v21, %v1577_v13  ;;  %v3756_v34 = vrot.slane %v3718_v11, 9  ;;  %v1780_v35 = vsel %vm4208_vm5, %v1775_v26, %v1779_v5  ;;  %v3935_v8 = vld [vmem:[%s4165_s19 + $0xb8] sm:$0xf]  ;;  %v3936_v11 = vld [vmem:[%s4165_s19 + $0xbc] sm:$0x1] }
  0xde   : > { %878 = vst.msk [vmem:[#allocation2 + $0x10] sm:$0xff] %vm875_vm7, %v832_v24  ;;  %v1172_v33 = vpop.permute.xlu1 %1171  ;;  %v2135_v36 = vsel %vm4167_vm2, %v2133_v28, %v2134_v29  ;;  %v2075_v37 = vrot.slane %v3719_v16, 5  ;;  %v2078_v38 = vrot.slane %v3720_v23, 5  ;;  %v3700_v41 = vcombine.low %v1770_v30, %v1780_v35  ;;  %v3312_v4 = vld [vmem:[#allocation2 + $0x8] sm:$0xff]  ;;  %v3910_v19 = vld [vmem:[%s4165_s19 + $0x54] sm:$0xe] }
  0xdf   : > { %1210 = vst.msk [vmem:[#allocation2 + $0x50] sm:$0xff] %vm1199_vm8, %v1172_v33  ;;  %1342 = vrot.lane.b32.xlu0 %v4065_v17, %s4112_s20  ;;  %v1578_v42 = vsel %vm4208_vm5, %v1573_v31, %v1577_v13  ;;  %v1583_v43 = vrot.slane %v1582_v32, 4  ;;  %v3780_v44 = vcombine.low %v2132_v27, %v2135_v36  ;;  %v2805_v52 = vshrl.u32 %v3870_v25, 16  ;;  %v4068_v13 = vld [vmem:[%s4165_s19 + $0xb4] sm:$0xff]   ;;  %v3912_v35 = vld [vmem:[%s4165_s19 + $0x5c] sm:$0x1] }
  0xe0   : > { %v2076_v49 = vsel %vm4167_vm2, %v3756_v34, %v2075_v37  ;;  %v2077_v50 = vrot.slane %v2075_v37, 4  ;;  %v2808_v54 = vshll.u32 %v3870_v25, 16  ;;  %v2814_v58 = vshll.u32 %v3871_v39, 16  ;;  %v3911_v24 = vld [vmem:[%s4165_s19 + $0x58] sm:$0xf] }
  0xe1   : > { %v1156_v45 = vpop.permute.xlu0 %1155  ;;  %1903 = vrot.lane.b32.xlu1 %v3700_v41, %s4116_s24  ;;  %v1588_v57 = vsel %vm4208_vm5, %v1583_v43, %v1587_v22  ;;  %v2818_v60 = vshrl.u32 %v3871_v39, 16  ;;  %v2824_v61 = vshll.u32 %v3872_v40, 16  ;;  %v2807_v1 = vrot.slane %v2805_v52, 4  ;;  %v4069_v30 = vld [vmem:[%s4165_s19 + $0x54] sm:$0xff]   ;;  %v386_v41 = vld [vmem:[%s4165_s19 + $0xa8] sm:$0xf] }
  0xe2   : > { %1202 = vst.msk [vmem:[#allocation2 + $0x10] sm:$0xff] %vm1199_vm8, %v1156_v45  ;;  %v1353_v56 = vpop.permute.xlu1 %1352  ;;  %v3692_v62 = vcombine.low %v1578_v42, %v1588_v57  ;;  %v2079_v63 = vsel %vm4167_vm2, %v2077_v50, %v2078_v38  ;;  %v2810_v2 = vrot.slane %v2808_v54, 5  ;;  %v2816_v6 = vrot.slane %v2814_v58, 5  ;;  %v387_v42 = vld [vmem:[%s4165_s19 + $0xac] sm:$0xf] }
  0xe3   : > { %1391 = vst.msk [vmem:[#allocation2 + $0x50] sm:$0xff] %vm1380_vm9, %v1353_v56  ;;  %v3772_v5 = vcombine.low %v2076_v49, %v2079_v63  ;;  %v2820_v7 = vrot.slane %v2818_v60, 4  ;;  %v2826_v47 = vrot.slane %v2824_v61, 5  ;;  %v2613_v9 = vshrl.u32 %v3846_v46, 16  ;;  %v362_v49 = vld [vmem:[%s4165_s19 + $0x48] sm:$0xf] }
  0xe4   : > { %1887 = vrot.lane.b32.xlu0 %v3692_v62, %s4116_s24  ;;  %v2811_v59 = vor.u32 %v2810_v2, %v2807_v1  ;;  %v2616_v10 = vshll.u32 %v3846_v46, 16  ;;  %v2622_v3 = vshll.u32 %v3847_v48, 16  ;;  %v2626_v15 = vshrl.u32 %v3847_v48, 16  ;;  %v388_v48 = vld [vmem:[%s4165_s19 + $0xb0] sm:$0x1] }
  0xe5   : > { %v1337_v51 = vpop.permute.xlu0 %1336  ;;  %2224 = vrot.lane.b32.xlu1 %v3780_v44, %s4113_s21  ;;  %v2821_v14 = vor.u32 %v2820_v7, %v2816_v6  ;;  %v2632_v16 = vshll.u32 %v3848_v55, 16  ;;  %v3341_v17 = vsel %vm3333_vm15, %v3312_v4, 0  ;;  %v2615_v21 = vrot.slane %v2613_v9, 4  ;;  %v363_v56 = vld [vmem:[%s4165_s19 + $0x4c] sm:$0xf] }
  0xe6   : > { %1383 = vst.msk [vmem:[#allocation2 + $0x10] sm:$0xff] %vm1380_vm9, %v1337_v51  ;;  %v1898_v12 = vpop.permute.xlu1 %1897  ;;  %v2812_v20 = vrot.slane %v2811_v59, 4  ;;  %v2618_v22 = vrot.slane %v2616_v10, 5  ;;  %v2624_v23 = vrot.slane %v2622_v3, 5  ;;  %3982 = vmatpush3.bf16.xpose.msra.mxu0 %v3341_v17  ;;  %v2628_v27 = vrot.slane %v2626_v15, 4 }
  0xe7   : > { %1936 = vst.msk [vmem:[#allocation2 + $0x50] sm:$0xff] %vm1925_vm10, %v1898_v12  ;;  %v2822_v26 = vrot.slane %v2821_v14, 4  ;;  %v2634_v28 = vrot.slane %v2632_v16, 5  ;;  %v3956_v29 = vrot.slane %v3934_v18, 9  ;;  %v3178_v34 = vrot.slane %v3935_v8, 5 }
  0xe8   : > { %2208 = vrot.lane.b32.xlu0 %v3772_v5, %s4113_s21  ;;  %v2817_v31 = vsel %vm4208_vm5, %v2812_v20, %v2816_v6  ;;  %v2619_v32 = vor.u32 %v2618_v22, %v2615_v21  ;;  %v3181_v25 = vrot.slane %v3936_v11, 5  ;;  %v2629_v38 = vor.u32 %v2628_v27, %v2624_v23  ;;  %v364_v63 = vld [vmem:[%s4165_s19 + $0x50] sm:$0x1]  ;;  %v4084_v6 = vld [vmem:[%s4165_s19 + $0xa8] sm:$0xff]  }
  0xe9   : > { %v1882_v33 = vpop.permute.xlu0 %1881  ;;  %2405 = vrot.lane.b32.xlu1 %v4068_v13, %s4117_s25  ;;  %v2827_v37 = vsel %vm4208_vm5, %v2822_v26, %v2826_v47  ;;  %v3948_v39 = vrot.slane %v3910_v19, 9  ;;  %v3122_v40 = vrot.slane %v3911_v24, 5  ;;  %v3179_v45 = vsel %vm4167_vm2, %v3956_v29, %v3178_v34  ;;  %v934_v59 = vld [vmem:[%s4165_s19 + $0xa8] sm:$0xe]  ;;  %v935_v9 = vld [vmem:[%s4165_s19 + $0xac] sm:$0xf] }
  0xea   : > { %1928 = vst.msk [vmem:[#allocation2 + $0x10] sm:$0xff] %vm1925_vm10, %v1882_v33  ;;  %v2219_v36 = vpop.permute.xlu1 %2218  ;;  %v3892_v43 = vcombine.low %v2817_v31, %v2827_v37  ;;  %v2620_v44 = vrot.slane %v2619_v32, 4  ;;  %v3180_v46 = vrot.slane %v3178_v34, 4  ;;  %v2630_v50 = vrot.slane %v2629_v38, 4  ;;  %v936_v19 = vld [vmem:[%s4165_s19 + $0xb0] sm:$0x1] }
  0xeb   : > { %2257 = vst.msk [vmem:[#allocation2 + $0x50] sm:$0xff] %vm2246_vm11, %v2219_v36  ;;  %v3123_v52 = vsel %vm4167_vm2, %v3948_v39, %v3122_v40  ;;  %v3124_v54 = vrot.slane %v3122_v40, 4  ;;  %v3125_v55 = vrot.slane %v3912_v35, 5  ;;  %v732_v61 = vshrl.u32 %v386_v41, 16  ;;  %v4085_v21 = vld [vmem:[%s4165_s19 + $0x48] sm:$0xff]  }
  0xec   : > { %2389 = vrot.lane.b32.xlu0 %v4069_v30, %s4117_s25  ;;  %v2625_v58 = vsel %vm4208_vm5, %v2620_v44, %v2624_v23  ;;  %v3182_v60 = vsel %vm4167_vm2, %v3180_v46, %v3181_v25  ;;  %v735_v62 = vshll.u32 %v386_v41, 16  ;;  %v2635_v2 = vsel %vm4208_vm5, %v2630_v50, %v2634_v28  ;;  %342 = vst.msk [vmem:[#allocation2 + $0x70] sm:$0xff] %vm327_vm6, %v4084_v6  ;;  %v910_v27 = vld [vmem:[%s4165_s19 + $0x48] sm:$0xe]  ;;  %v911_v31 = vld [vmem:[%s4165_s19 + $0x4c] sm:$0xf] }
  0xed   : > { %v2203_v57 = vpop.permute.xlu0 %2202  ;;  %2950 = vrot.lane.b32.xlu1 %v3892_v43, %s4118_s26  ;;  %v3972_v4 = vcombine.low %v3179_v45, %v3182_v60  ;;  %v3126_v18 = vsel %vm4167_vm2, %v3124_v54, %v3125_v55  ;;  %v741_v5 = vshll.u32 %v387_v42, 16  ;;  %v3884_v7 = vcombine.low %v2625_v58, %v2635_v2  ;;  %334 = vst.msk [vmem:[#allocation2 + $0x30] sm:$0xff] %vm327_vm6, %v4085_v21  ;;  %v912_v36 = vld [vmem:[%s4165_s19 + $0x50] sm:$0x1]  ;;  %v3683_v58 = vld [vmem:[%s4165_s19 + $0xbc] sm:$0x1] }
  0xee   : > { %2249 = vst.msk [vmem:[#allocation2 + $0x10] sm:$0xff] %vm2246_vm11, %v2203_v57  ;;  %v2400_v1 = vpop.permute.xlu1 %2399  ;;  %v3964_v47 = vcombine.low %v3123_v52, %v3126_v18  ;;  %v734_v51 = vrot.slane %v732_v61, 4  ;;  %v737_v8 = vrot.slane %v735_v62, 5  ;;  %v745_v3 = vshrl.u32 %v387_v42, 16  ;;  %v3681_v42 = vld [vmem:[%s4165_s19 + $0xb4] sm:$0xf] }
  0xef   : > { %2438 = vst.msk [vmem:[#allocation2 + $0x50] sm:$0xff] %vm2427_vm12, %v2400_v1  ;;  %v743_v10 = vrot.slane %v741_v5, 5  ;;  %v751_v11 = vshll.u32 %v388_v48, 16  ;;  %v540_v12 = vshrl.u32 %v362_v49, 16  ;;  %v543_v15 = vshll.u32 %v362_v49, 16 }
  0xf0   : > { %2934 = vrot.lane.b32.xlu0 %v3884_v7, %s4118_s26  ;;  %v738_v14 = vor.u32 %v737_v8, %v734_v51  ;;  %v549_v16 = vshll.u32 %v363_v56, 16  ;;  %v553_v17 = vshrl.u32 %v363_v56, 16  ;;  %v747_v22 = vrot.slane %v745_v3, 4  ;;  %v3682_v57 = vld [vmem:[%s4165_s19 + $0xb8] sm:$0xf] }
  0xf1   : > { %v2384_v13 = vpop.permute.xlu0 %2383  ;;  %3271 = vrot.lane.b32.xlu1 %v3972_v4, %s4119_s27  ;;  %v753_v23 = vrot.slane %v751_v11, 5  ;;  %v542_v24 = vrot.slane %v540_v12, 4  ;;  %v559_v26 = vshll.u32 %v364_v63, 16  ;;  %v545_v29 = vrot.slane %v543_v15, 5  ;;  %v3657_v18 = vld [vmem:[%s4165_s19 + $0x54] sm:$0xf] }
  0xf2   : > { %2430 = vst.msk [vmem:[#allocation2 + $0x10] sm:$0xff] %vm2427_vm12, %v2384_v13  ;;  %v2945_v20 = vpop.permute.xlu1 %2944  ;;  %v739_v28 = vrot.slane %v738_v14, 4  ;;  %v551_v33 = vrot.slane %v549_v16, 5  ;;  %v555_v30 = vrot.slane %v553_v17, 4  ;;  %v748_v32 = vor.u32 %v747_v22, %v743_v10  ;;  %v3658_v5 = vld [vmem:[%s4165_s19 + $0x58] sm:$0xf] }
  0xf3   : > { %2983 = vst.msk [vmem:[#allocation2 + $0x50] sm:$0xff] %vm2972_vm13, %v2945_v20  ;;  %v561_v34 = vrot.slane %v559_v26, 5  ;;  %v3573_v25 = vrot.slane %v934_v59, 9  ;;  %v1091_v35 = vrot.slane %v935_v9, 5  ;;  %v546_v39 = vor.u32 %v545_v29, %v542_v24  ;;  %v3659_v8 = vld [vmem:[%s4165_s19 + $0x5c] sm:$0x1] }
  0xf4   : > { %3255 = vrot.lane.b32.xlu0 %v3964_v47, %s4119_s27  ;;  %v744_v38 = vsel %vm4208_vm5, %v739_v28, %v743_v10  ;;  %v556_v40 = vor.u32 %v555_v30, %v551_v33  ;;  %v1094_v41 = vrot.slane %v936_v19, 5  ;;  %v749_v44 = vrot.slane %v748_v32, 4  ;;  %v3745_v11 = vld [vmem:[%s4165_s19 + $0xb4] sm:$0xe]  ;;  %v3746_v12 = vld [vmem:[%s4165_s19 + $0xb8] sm:$0xf] }
  0xf5   : > { %v2929_v37 = vpop.permute.xlu0 %2928  ;;  %v1092_v45 = vsel %vm4167_vm2, %v3573_v25, %v1091_v35  ;;  %v1093_v46 = vrot.slane %v1091_v35, 4  ;;  %v3565_v48 = vrot.slane %v910_v27, 9  ;;  %v547_v49 = vrot.slane %v546_v39, 4  ;;  %v3747_v17 = vld [vmem:[%s4165_s19 + $0xbc] sm:$0x1] }
  0xf6   : > { %2975 = vst.msk [vmem:[#allocation2 + $0x10] sm:$0xff] %vm2972_vm13, %v2929_v37  ;;  %v3266_v43 = vpop.permute.xlu1 %3265  ;;  %v557_v50 = vrot.slane %v556_v40, 4  ;;  %v1035_v52 = vrot.slane %v911_v31, 5  ;;  %v1038_v54 = vrot.slane %v912_v36, 5  ;;  %v754_v55 = vsel %vm4208_vm5, %v749_v44, %v753_v23  ;;  %v3721_v23 = vld [vmem:[%s4165_s19 + $0x54] sm:$0xe] }
  0xf7   : > { %3304 = vst.msk [vmem:[#allocation2 + $0x50] sm:$0xff] %vm3293_vm14, %v3266_v43  ;;  %v1095_v56 = vsel %vm4167_vm2, %v1093_v46, %v1094_v41  ;;  %v1782_v60 = vshrl.u32 %v3681_v42, 16  ;;  %v1785_v61 = vshll.u32 %v3681_v42, 16  ;;  %v3557_v63 = vcombine.low %v744_v38, %v754_v55  ;;  %v3722_v30 = vld [vmem:[%s4165_s19 + $0x58] sm:$0xf] }
  0xf8   : > { %v552_v1 = vsel %vm4208_vm5, %v547_v49, %v551_v33  ;;  %v562_v2 = vsel %vm4208_vm5, %v557_v50, %v561_v34  ;;  %v3589_v4 = vcombine.low %v1092_v45, %v1095_v56  ;;  %v1036_v7 = vsel %vm4167_vm2, %v3565_v48, %v1035_v52  ;;  %v4070_v31 = vld [vmem:[%s4165_s19 + $0xb4] sm:$0xff]   ;;  %v3723_v36 = vld [vmem:[%s4165_s19 + $0x5c] sm:$0x1]  ;;  %v3873_v43 = vld [vmem:[%s4165_s19 + $0xc0] sm:$0xf] }
  0xf9   : > { %v3250_v62 = vpop.permute.xlu0 %3249  ;;  %v3549_v6 = vcombine.low %v552_v1, %v562_v2  ;;  %v1037_v47 = vrot.slane %v1035_v52, 4  ;;  %v1784_v51 = vrot.slane %v1782_v60, 4  ;;  %855 = vrot.lane.b32.xlu1 %v3557_v63, %s4115_s23  ;;  %v1787_v59 = vrot.slane %v1785_v61, 5  ;;  %v4071_v37 = vld [vmem:[%s4165_s19 + $0x54] sm:$0xff]   ;;  %v3874_v50 = vld [vmem:[%s4165_s19 + $0xc4] sm:$0xf] }
  0xfa   : > { %3296 = vst.msk [vmem:[#allocation2 + $0x10] sm:$0xff] %vm3293_vm14, %v3250_v62  ;;  %v1791_v9 = vshll.u32 %v3682_v57, 16  ;;  %v1795_v10 = vshrl.u32 %v3682_v57, 16  ;;  %v1801_v3 = vshll.u32 %v3683_v58, 16  ;;  %v1590_v14 = vshrl.u32 %v3657_v18, 16 }
  0xfb   : > { %839 = vrot.lane.b32.xlu0 %v3549_v6, %s4115_s23  ;;  %v1039_v13 = vsel %vm4167_vm2, %v1037_v47, %v1038_v54  ;;  %v1593_v15 = vshll.u32 %v3657_v18, 16  ;;  %v1599_v16 = vshll.u32 %v3658_v5, 16  ;;  %v1788_v20 = vor.u32 %v1787_v59, %v1784_v51  ;;  %v3875_v57 = vld [vmem:[%s4165_s19 + $0xc8] sm:$0x1]  ;;  %v3849_v63 = vld [vmem:[%s4165_s19 + $0x60] sm:$0xf] }
  0xfc   : > { %v3581_v19 = vcombine.low %v1036_v7, %v1039_v13  ;;  %v1793_v21 = vrot.slane %v1791_v9, 5  ;;  %v1797_v22 = vrot.slane %v1795_v10, 4  ;;  %v1803_v27 = vrot.slane %v1801_v3, 5 }
  0xfd   : > { %v1592_v28 = vrot.slane %v1590_v14, 4  ;;  %v1595_v29 = vrot.slane %v1593_v15, 5  ;;  %v4951_v33 = vrot.slane %v1599_v16, 5  ;;  %1179 = vrot.lane.b32.xlu1 %v3589_v4, %s4114_s22  ;;  %v1789_v32 = vrot.slane %v1788_v20, 4  ;;  %v3851_v15 = vld [vmem:[%s4165_s19 + $0x68] sm:$0x1] }
  0xfe   : > { %v850_v24 = vpop.permute.xlu1 %849  ;;  %v3321_v26 = vld [vmem:[#allocation2 + $0x50] sm:$0xff]  ;;  %v1798_v34 = vor.u32 %v1797_v22, %v1793_v21  ;;  %v1603_v25 = vshrl.u32 %v3658_v5, 16  ;;  %v1609_v35 = vshll.u32 %v3659_v8, 16  ;;  %v3765_v39 = vrot.slane %v3745_v11, 9  ;;  %v3850_v11 = vld [vmem:[%s4165_s19 + $0x64] sm:$0xf] }
  0xff   : > { %887 = vst.msk [vmem:[#allocation2 + $0x58] sm:$0xff] %vm875_vm7, %v850_v24  ;;  %3999 = vmatprep.subr.msk.bf16.mxu0 %vm3333_vm15, %v3321_v26  ;;  %1163 = vrot.lane.b32.xlu0 %v3581_v19, %s4114_s22  ;;  %v1596_v38 = vor.u32 %v1595_v29, %v1592_v28  ;;  %v2138_v40 = vrot.slane %v3746_v12, 5  ;;  %v2141_v41 = vrot.slane %v3747_v17, 5  ;;  %v1794_v44 = vsel %vm4208_vm5, %v1789_v32, %v1793_v21  ;;  %v3937_v17 = vld [vmem:[%s4165_s19 + $0xc0] sm:$0xe] }
 0x100   : > { %v1799_v45 = vrot.slane %v1798_v34, 4  ;;  %v1605_v46 = vrot.slane %v1603_v25, 4  ;;  %v1611_v48 = vrot.slane %v1609_v35, 5  ;;  %v3757_v56 = vrot.slane %v3721_v23, 9  ;;  %v3938_v26 = vld [vmem:[%s4165_s19 + $0xc4] sm:$0xf] }
 0x101   : > { %v834_v42 = vpop.permute.xlu0 %833  ;;  %v1597_v52 = vrot.slane %v1596_v38, 4  ;;  %v2139_v54 = vsel %vm4167_vm2, %v3765_v39, %v2138_v40  ;;  %v2140_v55 = vrot.slane %v2138_v40, 4  ;;  %1360 = vrot.lane.b32.xlu1 %v4070_v31, %s4112_s20  ;;  %v2082_v61 = vrot.slane %v3722_v30, 5  ;;  %v3313_v23 = vld [vmem:[#allocation2 + $0x10] sm:$0xff]  ;;  %v3939_v30 = vld [vmem:[%s4165_s19 + $0xc8] sm:$0x1] }
 0x102   : > { %879 = vst.msk [vmem:[#allocation2 + $0x18] sm:$0xff] %vm875_vm7, %v834_v42  ;;  %v1174_v49 = vpop.permute.xlu1 %1173  ;;  %v1804_v58 = vsel %vm4208_vm5, %v1799_v45, %v1803_v27  ;;  %v1606_v60 = vor.u32 %v1605_v46, %v4951_v33  ;;  %v2085_v62 = vrot.slane %v3723_v36, 5  ;;  %v2829_v5 = vshrl.u32 %v3873_v43, 16  ;;  %v3913_v36 = vld [vmem:[%s4165_s19 + $0x60] sm:$0xe] }
 0x103   : > { %1211 = vst.msk [vmem:[#allocation2 + $0x58] sm:$0xff] %vm1199_vm8, %v1174_v49  ;;  %1344 = vrot.lane.b32.xlu0 %v4071_v37, %s4112_s20  ;;  %v3701_v1 = vcombine.low %v1794_v44, %v1804_v58  ;;  %v1602_v2 = vsel %vm4208_vm5, %v1597_v52, %v4951_v33  ;;  %v2142_v4 = vsel %vm4167_vm2, %v2140_v55, %v2141_v41  ;;  %v2084_v51 = vrot.slane %v2082_v61, 4  ;;  %v4074_v37 = vld [vmem:[%s4165_s19 + $0xc0] sm:$0xff]  }
 0x104   : > { %v1607_v6 = vrot.slane %v1606_v60, 4  ;;  %v3781_v7 = vcombine.low %v2139_v54, %v2142_v4  ;;  %v2083_v47 = vsel %vm4167_vm2, %v3757_v56, %v2082_v61  ;;  %v2831_v59 = vrot.slane %v2829_v5, 4  ;;  %v3914_v42 = vld [vmem:[%s4165_s19 + $0x64] sm:$0xf] }
 0x105   : > { %v1158_v18 = vpop.permute.xlu0 %1157  ;;  %v2832_v9 = vshll.u32 %v3873_v43, 16  ;;  %v2838_v10 = vshll.u32 %v3874_v50, 16  ;;  %v2842_v3 = vshrl.u32 %v3874_v50, 16  ;;  %1905 = vrot.lane.b32.xlu1 %v3701_v1, %s4116_s24  ;;  %v2086_v13 = vsel %vm4167_vm2, %v2084_v51, %v2085_v62  ;;  %v4075_v50 = vld [vmem:[%s4165_s19 + $0x60] sm:$0xff]   ;;  %v390_v1 = vld [vmem:[%s4165_s19 + $0xb8] sm:$0xf] }
 0x106   : > { %1203 = vst.msk [vmem:[#allocation2 + $0x18] sm:$0xff] %vm1199_vm8, %v1158_v18  ;;  %v1355_v8 = vpop.permute.xlu1 %1354  ;;  %v1612_v12 = vsel %vm4208_vm5, %v1607_v6, %v1611_v48  ;;  %v2848_v14 = vshll.u32 %v3875_v57, 16  ;;  %v2637_v16 = vshrl.u32 %v3849_v63, 16  ;;  %v3773_v20 = vcombine.low %v2083_v47, %v2086_v13  ;;  %v3915_v48 = vld [vmem:[%s4165_s19 + $0x68] sm:$0x1] }
 0x107   : > { %1392 = vst.msk [vmem:[#allocation2 + $0x58] sm:$0xff] %vm1380_vm9, %v1355_v8  ;;  %v3693_v19 = vcombine.low %v1602_v2, %v1612_v12  ;;  %v2834_v21 = vrot.slane %v2832_v9, 5  ;;  %v2840_v22 = vrot.slane %v2838_v10, 5  ;;  %v2844_v27 = vrot.slane %v2842_v3, 4  ;;  %v389_v57 = vld [vmem:[%s4165_s19 + $0xb4] sm:$0xf] }
 0x108   : > { %v2850_v28 = vrot.slane %v2848_v14, 5  ;;  %v2639_v29 = vrot.slane %v2637_v16, 4  ;;  %v2640_v33 = vshll.u32 %v3849_v63, 16  ;;  %v2646_v34 = vshll.u32 %v3850_v11, 16  ;;  %v391_v6 = vld [vmem:[%s4165_s19 + $0xbc] sm:$0x1] }
 0x109   : > { %v1339_v24 = vpop.permute.xlu0 %1338  ;;  %1889 = vrot.lane.b32.xlu0 %v3693_v19, %s4116_s24  ;;  %v2835_v32 = vor.u32 %v2834_v21, %v2831_v59  ;;  %v2650_v25 = vshrl.u32 %v3850_v11, 16  ;;  %v2656_v35 = vshll.u32 %v3851_v15, 16  ;;  %2226 = vrot.lane.b32.xlu1 %v3781_v7, %s4113_s21  ;;  %v2845_v38 = vor.u32 %v2844_v27, %v2840_v22  ;;  %v365_v59 = vld [vmem:[%s4165_s19 + $0x54] sm:$0xf]  ;;  %v366_v19 = vld [vmem:[%s4165_s19 + $0x58] sm:$0xf] }
 0x10a   : > { %1384 = vst.msk [vmem:[#allocation2 + $0x18] sm:$0xff] %vm1380_vm9, %v1339_v24  ;;  %v1900_v31 = vpop.permute.xlu1 %1899  ;;  %v2642_v39 = vrot.slane %v2640_v33, 5  ;;  %v3344_v40 = vsel %vm3333_vm15, %v3313_v23, 0  ;;  %v3957_v41 = vrot.slane %v3937_v17, 9  ;;  %v2648_v44 = vrot.slane %v2646_v34, 5 }
 0x10b   : > { %1937 = vst.msk [vmem:[#allocation2 + $0x58] sm:$0xff] %vm1925_vm10, %v1900_v31  ;;  %v2836_v43 = vrot.slane %v2835_v32, 4  ;;  %v2652_v45 = vrot.slane %v2650_v25, 4  ;;  %v2658_v46 = vrot.slane %v2656_v35, 5  ;;  %3984 = vmatpush3.bf16.xpose.msra.mxu0 %v3344_v40  ;;  %v2846_v52 = vrot.slane %v2845_v38, 4  ;;  %v4086_v32 = vld [vmem:[%s4165_s19 + $0xb4] sm:$0xff]  }
 0x10c   : > { %v2643_v54 = vor.u32 %v2642_v39, %v2639_v29  ;;  %v3185_v55 = vrot.slane %v3938_v26, 5  ;;  %v3188_v56 = vrot.slane %v3939_v30, 5  ;;  %v3949_v62 = vrot.slane %v3913_v36, 9  ;;  %v367_v24 = vld [vmem:[%s4165_s19 + $0x5c] sm:$0x1]  ;;  %343 = vst.msk [vmem:[#allocation2 + $0x78] sm:$0xff] %vm327_vm6, %v4086_v32 }
 0x10d   : > { %v1884_v49 = vpop.permute.xlu0 %1883  ;;  %2210 = vrot.lane.b32.xlu0 %v3773_v20, %s4113_s21  ;;  %v2841_v60 = vsel %vm4208_vm5, %v2836_v43, %v2840_v22  ;;  %v2653_v61 = vor.u32 %v2652_v45, %v2648_v44  ;;  %v3129_v63 = vrot.slane %v3914_v42, 5  ;;  %2407 = vrot.lane.b32.xlu1 %v4074_v37, %s4117_s25  ;;  %v2851_v2 = vsel %vm4208_vm5, %v2846_v52, %v2850_v28  ;;  %v937_v26 = vld [vmem:[%s4165_s19 + $0xb4] sm:$0xe]  ;;  %v938_v30 = vld [vmem:[%s4165_s19 + $0xb8] sm:$0xf] }
 0x10e   : > { %1929 = vst.msk [vmem:[#allocation2 + $0x18] sm:$0xff] %vm1925_vm10, %v1884_v49  ;;  %v2221_v58 = vpop.permute.xlu1 %2220  ;;  %v2644_v4 = vrot.slane %v2643_v54, 4  ;;  %v3186_v18 = vsel %vm4167_vm2, %v3957_v41, %v3185_v55  ;;  %v3187_v5 = vrot.slane %v3185_v55, 4  ;;  %v3893_v7 = vcombine.low %v2841_v60, %v2851_v2  ;;  %v939_v37 = vld [vmem:[%s4165_s19 + $0xbc] sm:$0x1] }
 0x10f   : > { %2258 = vst.msk [vmem:[#allocation2 + $0x58] sm:$0xff] %vm2246_vm11, %v2221_v58  ;;  %v2654_v47 = vrot.slane %v2653_v61, 4  ;;  %v5020_v51 = vsel %vm4167_vm2, %v3949_v62, %v3129_v63  ;;  %v3131_v8 = vrot.slane %v3129_v63, 4  ;;  %v3132_v11 = vrot.slane %v3915_v48, 5  ;;  %v913_v43 = vld [vmem:[%s4165_s19 + $0x54] sm:$0xe] }
 0x110   : > { %v2649_v10 = vsel %vm4208_vm5, %v2644_v4, %v2648_v44  ;;  %v3189_v3 = vsel %vm4167_vm2, %v3187_v5, %v3188_v56  ;;  %v756_v12 = vshrl.u32 %v389_v57, 16  ;;  %v759_v16 = vshll.u32 %v389_v57, 16  ;;  %v4087_v44 = vld [vmem:[%s4165_s19 + $0x54] sm:$0xff]   ;;  %v915_v63 = vld [vmem:[%s4165_s19 + $0x5c] sm:$0x1] }
 0x111   : > { %v2205_v9 = vpop.permute.xlu0 %2204  ;;  %2391 = vrot.lane.b32.xlu0 %v4075_v50, %s4117_s25  ;;  %v2659_v14 = vsel %vm4208_vm5, %v2654_v47, %v2658_v46  ;;  %v3973_v15 = vcombine.low %v3186_v18, %v3189_v3  ;;  %v765_v17 = vshll.u32 %v390_v1, 16  ;;  %2952 = vrot.lane.b32.xlu1 %v3893_v7, %s4118_s26  ;;  %v3133_v21 = vsel %vm4167_vm2, %v3131_v8, %v3132_v11  ;;  %v914_v50 = vld [vmem:[%s4165_s19 + $0x58] sm:$0xf]  ;;  %v3685_v7 = vld [vmem:[%s4165_s19 + $0xc4] sm:$0xf] }
 0x112   : > { %2250 = vst.msk [vmem:[#allocation2 + $0x18] sm:$0xff] %vm2246_vm11, %v2205_v9  ;;  %v2402_v13 = vpop.permute.xlu1 %2401  ;;  %v3885_v20 = vcombine.low %v2649_v10, %v2659_v14  ;;  %v758_v22 = vrot.slane %v756_v12, 4  ;;  %v769_v23 = vshrl.u32 %v390_v1, 16  ;;  %v3965_v27 = vcombine.low %v5020_v51, %v3133_v21  ;;  %v3686_v9 = vld [vmem:[%s4165_s19 + $0xc8] sm:$0x1] }
 0x113   : > { %2439 = vst.msk [vmem:[#allocation2 + $0x58] sm:$0xff] %vm2427_vm12, %v2402_v13  ;;  %v761_v28 = vrot.slane %v759_v16, 5  ;;  %v767_v29 = vrot.slane %v765_v17, 5  ;;  %v775_v33 = vshll.u32 %v391_v6, 16  ;;  %v564_v25 = vshrl.u32 %v365_v59, 16 }
 0x114   : > { %v771_v34 = vrot.slane %v769_v23, 4  ;;  %v567_v35 = vshll.u32 %v365_v59, 16  ;;  %v573_v36 = vshll.u32 %v366_v19, 16  ;;  %v577_v41 = vshrl.u32 %v366_v19, 16  ;;  %335 = vst.msk [vmem:[#allocation2 + $0x38] sm:$0xff] %vm327_vm6, %v4087_v44  ;;  %v4076_v44 = vld [vmem:[%s4165_s19 + $0xc0] sm:$0xff]  }
 0x115   : > { %v2386_v31 = vpop.permute.xlu0 %2385  ;;  %2936 = vrot.lane.b32.xlu0 %v3885_v20, %s4118_s26  ;;  %v762_v39 = vor.u32 %v761_v28, %v758_v22  ;;  %v777_v40 = vrot.slane %v775_v33, 5  ;;  %v583_v42 = vshll.u32 %v367_v24, 16  ;;  %3273 = vrot.lane.b32.xlu1 %v3973_v15, %s4119_s27  ;;  %v566_v46 = vrot.slane %v564_v25, 4  ;;  %v3684_v6 = vld [vmem:[%s4165_s19 + $0xc0] sm:$0xf] }
 0x116   : > { %2431 = vst.msk [vmem:[#allocation2 + $0x18] sm:$0xff] %vm2427_vm12, %v2386_v31  ;;  %v2947_v38 = vpop.permute.xlu1 %2946  ;;  %v772_v45 = vor.u32 %v771_v34, %v767_v29  ;;  %v569_v48 = vrot.slane %v567_v35, 5  ;;  %v575_v49 = vrot.slane %v573_v36, 5  ;;  %v579_v54 = vrot.slane %v577_v41, 4  ;;  %v3660_v13 = vld [vmem:[%s4165_s19 + $0x60] sm:$0xf] }
 0x117   : > { %2984 = vst.msk [vmem:[#allocation2 + $0x58] sm:$0xff] %vm2972_vm13, %v2947_v38  ;;  %v763_v52 = vrot.slane %v762_v39, 4  ;;  %v585_v55 = vrot.slane %v583_v42, 5  ;;  %v3574_v56 = vrot.slane %v937_v26, 9  ;;  %v1098_v61 = vrot.slane %v938_v30, 5 }
 0x118   : > { %v773_v58 = vrot.slane %v772_v45, 4  ;;  %v570_v60 = vor.u32 %v569_v48, %v566_v46  ;;  %v1101_v62 = vrot.slane %v939_v37, 5  ;;  %v580_v4 = vor.u32 %v579_v54, %v575_v49  ;;  %v3661_v14 = vld [vmem:[%s4165_s19 + $0x64] sm:$0xf]  ;;  %v3662_v21 = vld [vmem:[%s4165_s19 + $0x68] sm:$0x1] }
 0x119   : > { %v2931_v57 = vpop.permute.xlu0 %2930  ;;  %3257 = vrot.lane.b32.xlu0 %v3965_v27, %s4119_s27  ;;  %v768_v2 = vsel %vm4208_vm5, %v763_v52, %v767_v29  ;;  %v3566_v18 = vrot.slane %v913_v43, 9  ;;  %v1042_v5 = vrot.slane %v914_v50, 5  ;;  %v1099_v8 = vsel %vm4167_vm2, %v3574_v56, %v1098_v61  ;;  %v3748_v30 = vld [vmem:[%s4165_s19 + $0xc0] sm:$0xe]  ;;  %v3749_v35 = vld [vmem:[%s4165_s19 + $0xc4] sm:$0xf] }
 0x11a   : > { %2976 = vst.msk [vmem:[#allocation2 + $0x18] sm:$0xff] %vm2972_vm13, %v2931_v57  ;;  %v3268_v1 = vpop.permute.xlu1 %3267  ;;  %v778_v47 = vsel %vm4208_vm5, %v773_v58, %v777_v40  ;;  %v571_v51 = vrot.slane %v570_v60, 4  ;;  %v1100_v59 = vrot.slane %v1098_v61, 4  ;;  %v581_v3 = vrot.slane %v580_v4, 4  ;;  %v3750_v36 = vld [vmem:[%s4165_s19 + $0xc8] sm:$0x1] }
 0x11b   : > { %3305 = vst.msk [vmem:[#allocation2 + $0x58] sm:$0xff] %vm3293_vm14, %v3268_v1  ;;  %v3558_v10 = vcombine.low %v768_v2, %v778_v47  ;;  %v1043_v11 = vsel %vm4167_vm2, %v3566_v18, %v1042_v5  ;;  %v1044_v12 = vrot.slane %v1042_v5, 4  ;;  %v1045_v19 = vrot.slane %v915_v63, 5  ;;  %v3724_v41 = vld [vmem:[%s4165_s19 + $0x60] sm:$0xe] }
 0x11c   : > { %v576_v16 = vsel %vm4208_vm5, %v571_v51, %v575_v49  ;;  %v1102_v17 = vsel %vm4167_vm2, %v1100_v59, %v1101_v62  ;;  %v1806_v20 = vshrl.u32 %v3684_v6, 16  ;;  %v586_v22 = vsel %vm4208_vm5, %v581_v3, %v585_v55  ;;  %v3725_v42 = vld [vmem:[%s4165_s19 + $0x64] sm:$0xf]  ;;  %v3876_v59 = vld [vmem:[%s4165_s19 + $0xcc] sm:$0xf] }
 0x11d   : > { %v3252_v15 = vpop.permute.xlu0 %3251  ;;  %857 = vrot.lane.b32.xlu1 %v3558_v10, %s4115_s23  ;;  %v3590_v23 = vcombine.low %v1099_v8, %v1102_v17  ;;  %v1809_v24 = vshll.u32 %v3684_v6, 16  ;;  %v1815_v26 = vshll.u32 %v3685_v7, 16  ;;  %v3550_v27 = vcombine.low %v576_v16, %v586_v22  ;;  %v4077_v63 = vld [vmem:[%s4165_s19 + $0x60] sm:$0xff]   ;;  %v3878_v22 = vld [vmem:[%s4165_s19 + $0xd4] sm:$0x1] }
 0x11e   : > { %3297 = vst.msk [vmem:[#allocation2 + $0x18] sm:$0xff] %vm3293_vm14, %v3252_v15  ;;  %v1046_v28 = vsel %vm4167_vm2, %v1044_v12, %v1045_v19  ;;  %v1808_v29 = vrot.slane %v1806_v20, 4  ;;  %v1819_v33 = vshrl.u32 %v3685_v7, 16  ;;  %v1825_v25 = vshll.u32 %v3686_v9, 16  ;;  %v3726_v7 = vld [vmem:[%s4165_s19 + $0x68] sm:$0x1] }
 0x11f   : > { %v3582_v31 = vcombine.low %v1043_v11, %v1046_v28  ;;  %v1811_v32 = vrot.slane %v1809_v24, 5  ;;  %v1817_v34 = vrot.slane %v1815_v26, 5  ;;  %841 = vrot.lane.b32.xlu0 %v3550_v27, %s4115_s23  ;;  %v1614_v38 = vshrl.u32 %v3660_v13, 16  ;;  %v3877_v12 = vld [vmem:[%s4165_s19 + $0xd0] sm:$0xf] }
 0x120   : > { %v1821_v37 = vrot.slane %v1819_v33, 4  ;;  %v1617_v39 = vshll.u32 %v3660_v13, 16  ;;  %v1623_v40 = vshll.u32 %v3661_v14, 16  ;;  %v1827_v46 = vrot.slane %v1825_v25, 5  ;;  %v3853_v33 = vld [vmem:[%s4165_s19 + $0x70] sm:$0xf] }
 0x121   : > { %1181 = vrot.lane.b32.xlu1 %v3590_v23, %s4114_s22  ;;  %v1812_v45 = vor.u32 %v1811_v32, %v1808_v29  ;;  %v1627_v48 = vshrl.u32 %v3661_v14, 16  ;;  %v1633_v49 = vshll.u32 %v3662_v21, 16  ;;  %v1616_v54 = vrot.slane %v1614_v38, 4  ;;  %v3852_v29 = vld [vmem:[%s4165_s19 + $0x6c] sm:$0xf] }
 0x122   : > { %v3322_v43 = vld [vmem:[#allocation2 + $0x58] sm:$0xff]  ;;  %v852_v50 = vpop.permute.xlu1 %851  ;;  %v1822_v52 = vor.u32 %v1821_v37, %v1817_v34  ;;  %v1619_v55 = vrot.slane %v1617_v39, 5  ;;  %v1625_v56 = vrot.slane %v1623_v40, 5  ;;  %v3766_v61 = vrot.slane %v3748_v30, 9 }
 0x123   : > { %4000 = vmatprep.subr.msk.bf16.mxu0 %vm3333_vm15, %v3322_v43  ;;  %888 = vst.msk [vmem:[#allocation2 + $0x60] sm:$0xff] %vm875_vm7, %v852_v50  ;;  %v1813_v57 = vrot.slane %v1812_v45, 4  ;;  %v1629_v58 = vrot.slane %v1627_v48, 4  ;;  %v1635_v60 = vrot.slane %v1633_v49, 5  ;;  %1165 = vrot.lane.b32.xlu0 %v3582_v31, %s4114_s22  ;;  %v2145_v4 = vrot.slane %v3749_v35, 5  ;;  %v4080_v49 = vld [vmem:[%s4165_s19 + $0xcc] sm:$0xff]  }
 0x124   : > { %v1823_v1 = vrot.slane %v1822_v52, 4  ;;  %v1620_v2 = vor.u32 %v1619_v55, %v1616_v54  ;;  %v2148_v18 = vrot.slane %v3750_v36, 5  ;;  %v3758_v47 = vrot.slane %v3724_v41, 9  ;;  %v3854_v35 = vld [vmem:[%s4165_s19 + $0x74] sm:$0x1] }
 0x125   : > { %v836_v62 = vpop.permute.xlu0 %835  ;;  %1362 = vrot.lane.b32.xlu1 %v4076_v44, %s4112_s20  ;;  %v1818_v5 = vsel %vm4208_vm5, %v1813_v57, %v1817_v34  ;;  %v1630_v6 = vor.u32 %v1629_v58, %v1625_v56  ;;  %v2089_v51 = vrot.slane %v3725_v42, 5  ;;  %v2146_v3 = vsel %vm4167_vm2, %v3766_v61, %v2145_v4  ;;  %v3940_v41 = vld [vmem:[%s4165_s19 + $0xcc] sm:$0xe]  ;;  %v3941_v42 = vld [vmem:[%s4165_s19 + $0xd0] sm:$0xf]  ;;  %v3314_v48 = vld [vmem:[#allocation2 + $0x18] sm:$0xff] }
 0x126   : > { %880 = vst.msk [vmem:[#allocation2 + $0x20] sm:$0xff] %vm875_vm7, %v836_v62  ;;  %v1176_v8 = vpop.permute.xlu1 %1175  ;;  %v1828_v9 = vsel %vm4208_vm5, %v1823_v1, %v1827_v46  ;;  %v1621_v10 = vrot.slane %v1620_v2, 4  ;;  %v2147_v11 = vrot.slane %v2145_v4, 4  ;;  %v2092_v21 = vrot.slane %v3726_v7, 5  ;;  %v3916_v62 = vld [vmem:[%s4165_s19 + $0x6c] sm:$0xe] }
 0x127   : > { %1212 = vst.msk [vmem:[#allocation2 + $0x60] sm:$0xff] %vm1199_vm8, %v1176_v8  ;;  %v3702_v13 = vcombine.low %v1818_v5, %v1828_v9  ;;  %v1631_v14 = vrot.slane %v1630_v6, 4  ;;  %v2090_v15 = vsel %vm4167_vm2, %v3758_v47, %v2089_v51  ;;  %v2091_v16 = vrot.slane %v2089_v51, 4  ;;  %1346 = vrot.lane.b32.xlu0 %v4077_v63, %s4112_s20  ;;  %v3917_v5 = vld [vmem:[%s4165_s19 + $0x70] sm:$0xf] }
 0x128   : > { %v1626_v19 = vsel %vm4208_vm5, %v1621_v10, %v1625_v56  ;;  %v2149_v20 = vsel %vm4167_vm2, %v2147_v11, %v2148_v18  ;;  %v2853_v23 = vshrl.u32 %v3876_v59, 16  ;;  %v2856_v27 = vshll.u32 %v3876_v59, 16  ;;  %v3942_v56 = vld [vmem:[%s4165_s19 + $0xd4] sm:$0x1]  ;;  %v4081_v6 = vld [vmem:[%s4165_s19 + $0x6c] sm:$0xff]  }
 0x129   : > { %v1160_v17 = vpop.permute.xlu0 %1159  ;;  %1907 = vrot.lane.b32.xlu1 %v3702_v13, %s4116_s24  ;;  %v1636_v24 = vsel %vm4208_vm5, %v1631_v14, %v1635_v60  ;;  %v3782_v26 = vcombine.low %v2146_v3, %v2149_v20  ;;  %v2862_v28 = vshll.u32 %v3877_v12, 16  ;;  %v2093_v32 = vsel %vm4167_vm2, %v2091_v16, %v2092_v21  ;;  %v3918_v59 = vld [vmem:[%s4165_s19 + $0x74] sm:$0x1] }
 0x12a   : > { %1204 = vst.msk [vmem:[#allocation2 + $0x20] sm:$0xff] %vm1199_vm8, %v1160_v17  ;;  %v1357_v30 = vpop.permute.xlu1 %1356  ;;  %v3694_v31 = vcombine.low %v1626_v19, %v1636_v24  ;;  %v2855_v34 = vrot.slane %v2853_v23, 4  ;;  %v2866_v25 = vshrl.u32 %v3877_v12, 16  ;;  %v3774_v36 = vcombine.low %v2090_v15, %v2093_v32 }
 0x12b   : > { %1393 = vst.msk [vmem:[#allocation2 + $0x60] sm:$0xff] %vm1380_vm9, %v1357_v30  ;;  %v2858_v37 = vrot.slane %v2856_v27, 5  ;;  %v2864_v38 = vrot.slane %v2862_v28, 5  ;;  %v2872_v39 = vshll.u32 %v3878_v22, 16  ;;  %v2661_v44 = vshrl.u32 %v3852_v29, 16 }
 0x12c   : > { %1891 = vrot.lane.b32.xlu0 %v3694_v31, %s4116_s24  ;;  %v2868_v43 = vrot.slane %v2866_v25, 4  ;;  %v2664_v45 = vshll.u32 %v3852_v29, 16  ;;  %v2670_v46 = vshll.u32 %v3853_v33, 16  ;;  %v2674_v54 = vshrl.u32 %v3853_v33, 16 }
 0x12d   : > { %v1341_v40 = vpop.permute.xlu0 %1340  ;;  %2228 = vrot.lane.b32.xlu1 %v3782_v26, %s4113_s21  ;;  %v2859_v50 = vor.u32 %v2858_v37, %v2855_v34  ;;  %v2874_v52 = vrot.slane %v2872_v39, 5  ;;  %v2680_v55 = vshll.u32 %v3854_v35, 16  ;;  %v2663_v58 = vrot.slane %v2661_v44, 4  ;;  %v3327_v37 = vld [vmem:[%s5249_s2] sm:$0xff] }
 0x12e   : > { %1385 = vst.msk [vmem:[#allocation2 + $0x20] sm:$0xff] %vm1380_vm9, %v1341_v40  ;;  %v2869_v57 = vor.u32 %v2868_v43, %v2864_v38  ;;  %v2666_v60 = vrot.slane %v2664_v45, 5  ;;  %v2672_v61 = vrot.slane %v2670_v46, 5  ;;  %v1902_v63 = vpop.permute.xlu1 %1901  ;;  %v2676_v2 = vrot.slane %v2674_v54, 4 }
 0x12f   : > { %v2860_v1 = vrot.slane %v2859_v50, 4  ;;  %v2682_v4 = vrot.slane %v2680_v55, 5  ;;  %v3347_v18 = vsel %vm3333_vm15, %v3314_v48, 0  ;;  %1938 = vst.msk [vmem:[#allocation2 + $0x60] sm:$0xff] %vm1925_vm10, %v1902_v63  ;;  %v3958_v51 = vrot.slane %v3940_v41, 9 }
 0x130   : > { %2212 = vrot.lane.b32.xlu0 %v3774_v36, %s4113_s21  ;;  %v2870_v7 = vrot.slane %v2869_v57, 4  ;;  %v2667_v47 = vor.u32 %v2666_v60, %v2663_v58  ;;  %3986 = vmatpush3.bf16.xpose.msra.mxu0 %v3347_v18  ;;  %v3192_v8 = vrot.slane %v3941_v42, 5  ;;  %v2677_v10 = vor.u32 %v2676_v2, %v2672_v61 }
 0x131   : > { %2409 = vrot.lane.b32.xlu1 %v4080_v49, %s4117_s25  ;;  %v2865_v9 = vsel %vm4208_vm5, %v2860_v1, %v2864_v38  ;;  %v3195_v3 = vrot.slane %v3942_v56, 5  ;;  %v3950_v11 = vrot.slane %v3916_v62, 9  ;;  %v1886_v12 = vpop.permute.xlu0 %1885  ;;  %v3136_v21 = vrot.slane %v3917_v5, 5 }
 0x132   : > { %v2875_v13 = vsel %vm4208_vm5, %v2870_v7, %v2874_v52  ;;  %v2668_v14 = vrot.slane %v2667_v47, 4  ;;  %v3193_v15 = vsel %vm4167_vm2, %v3958_v51, %v3192_v8  ;;  %v3194_v16 = vrot.slane %v3192_v8, 4  ;;  %1930 = vst.msk [vmem:[#allocation2 + $0x20] sm:$0xff] %vm1925_vm10, %v1886_v12  ;;  %v2223_v17 = vpop.permute.xlu1 %2222 }
 0x133   : > { %v3894_v19 = vcombine.low %v2865_v9, %v2875_v13  ;;  %v2678_v20 = vrot.slane %v2677_v10, 4  ;;  %v3139_v22 = vrot.slane %v3918_v59, 5  ;;  %2259 = vst.msk [vmem:[#allocation2 + $0x60] sm:$0xff] %vm2246_vm11, %v2223_v17  ;;  %v3137_v28 = vsel %vm4167_vm2, %v3950_v11, %v3136_v21 }
 0x134   : > { %2393 = vrot.lane.b32.xlu0 %v4081_v6, %s4117_s25  ;;  %v2673_v23 = vsel %vm4208_vm5, %v2668_v14, %v2672_v61  ;;  %v3196_v24 = vsel %vm4167_vm2, %v3194_v16, %v3195_v3  ;;  %v3138_v29 = vrot.slane %v3136_v21, 4  ;;  %v4120_v38 = vmov 0  }
 0x135   : > { %2954 = vrot.lane.b32.xlu1 %v3894_v19, %s4118_s26  ;;  %v2683_v26 = vsel %vm4208_vm5, %v2678_v20, %v2682_v4  ;;  %v3974_v27 = vcombine.low %v3193_v15, %v3196_v24  ;;  %v2207_v33 = vpop.permute.xlu0 %2206  ;;  %4039 = vset.pattern.permute.xlu0 %v4120_v38 }
 0x136   : > { %v3886_v30 = vcombine.low %v2673_v23, %v2683_v26  ;;  %2251 = vst.msk [vmem:[#allocation2 + $0x20] sm:$0xff] %vm2246_vm11, %v2207_v33  ;;  %v2404_v31 = vpop.permute.xlu1 %2403  ;;  %v3140_v32 = vsel %vm4167_vm2, %v3138_v29, %v3139_v22 }
 0x137   : > { %2440 = vst.msk [vmem:[#allocation2 + $0x60] sm:$0xff] %vm2427_vm12, %v2404_v31  ;;  %v3966_v34 = vcombine.low %v3137_v28, %v3140_v32 }
 0x138   : > { %2938 = vrot.lane.b32.xlu0 %v3886_v30, %s4118_s26 }
 0x139   : > { %3275 = vrot.lane.b32.xlu1 %v3974_v27, %s4119_s27  ;;  %v2388_v25 = vpop.permute.xlu0 %2387 }
 0x13a   : > { %2432 = vst.msk [vmem:[#allocation2 + $0x20] sm:$0xff] %vm2427_vm12, %v2388_v25  ;;  %v2949_v0 = vpop.permute.xlu1 %2948 }
 0x13b   : > { %2985 = vst.msk [vmem:[#allocation2 + $0x60] sm:$0xff] %vm2972_vm13, %v2949_v0 }
 0x13c   : > { %3259 = vrot.lane.b32.xlu0 %v3966_v34, %s4119_s27 }
 0x13d   : > { %v2933_v35 = vpop.permute.xlu0 %2932 }
 0x13e   : > { %2977 = vst.msk [vmem:[#allocation2 + $0x20] sm:$0xff] %vm2972_vm13, %v2933_v35  ;;  %v3270_v36 = vpop.permute.xlu1 %3269 }
 0x13f   : > { %3306 = vst.msk [vmem:[#allocation2 + $0x60] sm:$0xff] %vm3293_vm14, %v3270_v36 }
 0x140   : > { %3330 = vperm.xlu0 %4039, %v3327_v37  }
 0x141   : > { %v3254_v39 = vpop.permute.xlu0 %3253 }
 0x142   : > { %3298 = vst.msk [vmem:[#allocation2 + $0x20] sm:$0xff] %vm3293_vm14, %v3254_v39 }
 0x146   : > { %v3323_v40 = vld [vmem:[#allocation2 + $0x60] sm:$0xff] }
 0x147   : > { %v854_v41 = vpop.permute.xlu1 %853  ;;  %4001 = vmatprep.subr.msk.bf16.mxu0 %vm3333_vm15, %v3323_v40 }
 0x148   : > { %889 = vst.msk [vmem:[#allocation2 + $0x68] sm:$0xff] %vm875_vm7, %v854_v41 }
 0x149   : > { %v838_v42 = vpop.permute.xlu0 %837  ;;  %v3315_v43 = vld [vmem:[#allocation2 + $0x20] sm:$0xff] }
 0x14a   : > { %881 = vst.msk [vmem:[#allocation2 + $0x28] sm:$0xff] %vm875_vm7, %v838_v42  ;;  %v3350_v44 = vsel %vm3333_vm15, %v3315_v43, 0 }
 0x14b   : > { %v1178_v45 = vpop.permute.xlu1 %1177  ;;  %3988 = vmatpush3.bf16.xpose.msra.mxu0 %v3350_v44 }
 0x14c   : > { %1213 = vst.msk [vmem:[#allocation2 + $0x68] sm:$0xff] %vm1199_vm8, %v1178_v45 }
 0x14d   : > { %v1162_v46 = vpop.permute.xlu0 %1161 }
 0x14e   : > { %1205 = vst.msk [vmem:[#allocation2 + $0x28] sm:$0xff] %vm1199_vm8, %v1162_v46 }
 0x14f   : > { %v1359_v48 = vpop.permute.xlu1 %1358 }
 0x150   : > { %1394 = vst.msk [vmem:[#allocation2 + $0x68] sm:$0xff] %vm1380_vm9, %v1359_v48 }
 0x151   : > { %v1343_v49 = vpop.permute.xlu0 %1342 }
 0x152   : > { %1386 = vst.msk [vmem:[#allocation2 + $0x28] sm:$0xff] %vm1380_vm9, %v1343_v49 }
 0x153   : > { %v1904_v50 = vpop.permute.xlu1 %1903 }
 0x154   : > { %1939 = vst.msk [vmem:[#allocation2 + $0x68] sm:$0xff] %vm1925_vm10, %v1904_v50 }
 0x156   : > { %v1888_v52 = vpop.permute.xlu0 %1887 }
 0x157   : > { %1931 = vst.msk [vmem:[#allocation2 + $0x28] sm:$0xff] %vm1925_vm10, %v1888_v52  ;;  %v2225_v54 = vpop.permute.xlu1 %2224 }
 0x158   : > { %2260 = vst.msk [vmem:[#allocation2 + $0x68] sm:$0xff] %vm2246_vm11, %v2225_v54 }
 0x15a   : > { %v2209_v55 = vpop.permute.xlu0 %2208 }
 0x15b   : > { %2252 = vst.msk [vmem:[#allocation2 + $0x28] sm:$0xff] %vm2246_vm11, %v2209_v55  ;;  %v2406_v56 = vpop.permute.xlu1 %2405 }
 0x15c   : > { %2441 = vst.msk [vmem:[#allocation2 + $0x68] sm:$0xff] %vm2427_vm12, %v2406_v56 }
 0x15e   : > { %v2390_v57 = vpop.permute.xlu0 %2389 }
 0x15f   : > { %2433 = vst.msk [vmem:[#allocation2 + $0x28] sm:$0xff] %vm2427_vm12, %v2390_v57  ;;  %v2951_v58 = vpop.permute.xlu1 %2950 }
 0x160   : > { %2986 = vst.msk [vmem:[#allocation2 + $0x68] sm:$0xff] %vm2972_vm13, %v2951_v58 }
 0x162   : > { %v2935_v60 = vpop.permute.xlu0 %2934 }
 0x163   : > { %2978 = vst.msk [vmem:[#allocation2 + $0x28] sm:$0xff] %vm2972_vm13, %v2935_v60  ;;  %v3272_v61 = vpop.permute.xlu1 %3271 }
 0x164   : > { %3307 = vst.msk [vmem:[#allocation2 + $0x68] sm:$0xff] %vm3293_vm14, %v3272_v61 }
 0x166   : > { %v3256_v62 = vpop.permute.xlu0 %3255 }
 0x167   : > { %3299 = vst.msk [vmem:[#allocation2 + $0x28] sm:$0xff] %vm3293_vm14, %v3256_v62 }
 0x16b   : > { %v3324_v63 = vld [vmem:[#allocation2 + $0x68] sm:$0xff]  ;;  %v856_v1 = vpop.permute.xlu1 %855 }
 0x16c   : > { %4002 = vmatprep.subr.msk.bf16.mxu0 %vm3333_vm15, %v3324_v63  ;;  %890 = vst.msk [vmem:[#allocation2 + $0x70] sm:$0xff] %vm875_vm7, %v856_v1 }
 0x16d   : > { %v840_v2 = vpop.permute.xlu0 %839 }
 0x16e   : > { %882 = vst.msk [vmem:[#allocation2 + $0x30] sm:$0xff] %vm875_vm7, %v840_v2  ;;  %v3316_v4 = vld [vmem:[#allocation2 + $0x28] sm:$0xff] }
 0x16f   : > { %v3353_v18 = vsel %vm3333_vm15, %v3316_v4, 0  ;;  %v1180_v5 = vpop.permute.xlu1 %1179 }
 0x170   : > { %3990 = vmatpush3.bf16.xpose.msra.mxu0 %v3353_v18  ;;  %1214 = vst.msk [vmem:[#allocation2 + $0x70] sm:$0xff] %vm1199_vm8, %v1180_v5 }
 0x171   : > { %v1164_v6 = vpop.permute.xlu0 %1163 }
 0x172   : > { %1206 = vst.msk [vmem:[#allocation2 + $0x30] sm:$0xff] %vm1199_vm8, %v1164_v6 }
 0x173   : > { %v1361_v7 = vpop.permute.xlu1 %1360 }
 0x174   : > { %1395 = vst.msk [vmem:[#allocation2 + $0x70] sm:$0xff] %vm1380_vm9, %v1361_v7 }
 0x175   : > { %v1345_v47 = vpop.permute.xlu0 %1344 }
 0x176   : > { %1387 = vst.msk [vmem:[#allocation2 + $0x30] sm:$0xff] %vm1380_vm9, %v1345_v47 }
 0x177   : > { %v1906_v51 = vpop.permute.xlu1 %1905 }
 0x178   : > { %1940 = vst.msk [vmem:[#allocation2 + $0x70] sm:$0xff] %vm1925_vm10, %v1906_v51 }
 0x17b   : > { %v1890_v8 = vpop.permute.xlu0 %1889  ;;  %v2227_v59 = vpop.permute.xlu1 %2226 }
 0x17c   : > { %1932 = vst.msk [vmem:[#allocation2 + $0x30] sm:$0xff] %vm1925_vm10, %v1890_v8 }
 0x17d   : > { %2261 = vst.msk [vmem:[#allocation2 + $0x70] sm:$0xff] %vm2246_vm11, %v2227_v59 }
 0x17f   : > { %v2211_v9 = vpop.permute.xlu0 %2210  ;;  %v2408_v10 = vpop.permute.xlu1 %2407 }
 0x180   : > { %2253 = vst.msk [vmem:[#allocation2 + $0x30] sm:$0xff] %vm2246_vm11, %v2211_v9 }
 0x181   : > { %2442 = vst.msk [vmem:[#allocation2 + $0x70] sm:$0xff] %vm2427_vm12, %v2408_v10 }
 0x183   : > { %v2392_v3 = vpop.permute.xlu0 %2391  ;;  %v2953_v11 = vpop.permute.xlu1 %2952 }
 0x184   : > { %2434 = vst.msk [vmem:[#allocation2 + $0x30] sm:$0xff] %vm2427_vm12, %v2392_v3 }
 0x185   : > { %2987 = vst.msk [vmem:[#allocation2 + $0x70] sm:$0xff] %vm2972_vm13, %v2953_v11 }
 0x187   : > { %v2937_v12 = vpop.permute.xlu0 %2936  ;;  %v3274_v13 = vpop.permute.xlu1 %3273 }
 0x188   : > { %2979 = vst.msk [vmem:[#allocation2 + $0x30] sm:$0xff] %vm2972_vm13, %v2937_v12 }
 0x189   : > { %3308 = vst.msk [vmem:[#allocation2 + $0x70] sm:$0xff] %vm3293_vm14, %v3274_v13 }
 0x18b   : > { %v3258_v14 = vpop.permute.xlu0 %3257 }
 0x18c   : > { %3300 = vst.msk [vmem:[#allocation2 + $0x30] sm:$0xff] %vm3293_vm14, %v3258_v14 }
 0x18f   : > { %v858_v15 = vpop.permute.xlu1 %857 }
 0x190   : > { %891 = vst.msk [vmem:[#allocation2 + $0x78] sm:$0xff] %vm875_vm7, %v858_v15  ;;  %v3325_v16 = vld [vmem:[#allocation2 + $0x70] sm:$0xff] }
 0x191   : > { %4003 = vmatprep.subr.msk.bf16.mxu0 %vm3333_vm15, %v3325_v16  ;;  %v842_v17 = vpop.permute.xlu0 %841 }
 0x192   : > { %883 = vst.msk [vmem:[#allocation2 + $0x38] sm:$0xff] %vm875_vm7, %v842_v17 }
 0x193   : > { %v1182_v19 = vpop.permute.xlu1 %1181  ;;  %v3317_v20 = vld [vmem:[#allocation2 + $0x30] sm:$0xff] }
 0x194   : > { %1215 = vst.msk [vmem:[#allocation2 + $0x78] sm:$0xff] %vm1199_vm8, %v1182_v19  ;;  %v3356_v21 = vsel %vm3333_vm15, %v3317_v20, 0 }
 0x195   : > { %3992 = vmatpush3.bf16.xpose.msra.mxu0 %v3356_v21  ;;  %v1166_v22 = vpop.permute.xlu0 %1165 }
 0x196   : > { %1207 = vst.msk [vmem:[#allocation2 + $0x38] sm:$0xff] %vm1199_vm8, %v1166_v22 }
 0x197   : > { %v1363_v23 = vpop.permute.xlu1 %1362 }
 0x198   : > { %1396 = vst.msk [vmem:[#allocation2 + $0x78] sm:$0xff] %vm1380_vm9, %v1363_v23 }
 0x199   : > { %v1347_v24 = vpop.permute.xlu0 %1346 }
 0x19a   : > { %1388 = vst.msk [vmem:[#allocation2 + $0x38] sm:$0xff] %vm1380_vm9, %v1347_v24 }
 0x19b   : > { %v1908_v26 = vpop.permute.xlu1 %1907 }
 0x19c   : > { %1941 = vst.msk [vmem:[#allocation2 + $0x78] sm:$0xff] %vm1925_vm10, %v1908_v26 }
 0x19e   : > { %v1892_v27 = vpop.permute.xlu0 %1891 }
 0x19f   : > { %1933 = vst.msk [vmem:[#allocation2 + $0x38] sm:$0xff] %vm1925_vm10, %v1892_v27  ;;  %v2229_v28 = vpop.permute.xlu1 %2228 }
 0x1a0   : > { %2262 = vst.msk [vmem:[#allocation2 + $0x78] sm:$0xff] %vm2246_vm11, %v2229_v28 }
 0x1a2   : > { %v2213_v29 = vpop.permute.xlu0 %2212 }
 0x1a3   : > { %2254 = vst.msk [vmem:[#allocation2 + $0x38] sm:$0xff] %vm2246_vm11, %v2213_v29  ;;  %v2410_v33 = vpop.permute.xlu1 %2409 }
 0x1a4   : > { %2443 = vst.msk [vmem:[#allocation2 + $0x78] sm:$0xff] %vm2427_vm12, %v2410_v33 }
 0x1a6   : > { %v2394_v30 = vpop.permute.xlu0 %2393 }
 0x1a7   : > { %2435 = vst.msk [vmem:[#allocation2 + $0x38] sm:$0xff] %vm2427_vm12, %v2394_v30  ;;  %v2955_v31 = vpop.permute.xlu1 %2954 }
 0x1a8   : > { %2988 = vst.msk [vmem:[#allocation2 + $0x78] sm:$0xff] %vm2972_vm13, %v2955_v31 }
 0x1aa   : > { %v2939_v32 = vpop.permute.xlu0 %2938 }
 0x1ab   : > { %2980 = vst.msk [vmem:[#allocation2 + $0x38] sm:$0xff] %vm2972_vm13, %v2939_v32  ;;  %v3276_v34 = vpop.permute.xlu1 %3275 }
 0x1ac   : > { %3309 = vst.msk [vmem:[#allocation2 + $0x78] sm:$0xff] %vm3293_vm14, %v3276_v34 }
 0x1ae   : > { %v3260_v25 = vpop.permute.xlu0 %3259 }
 0x1af   : > { %3301 = vst.msk [vmem:[#allocation2 + $0x38] sm:$0xff] %vm3293_vm14, %v3260_v25 }
 0x1b3   : > { %v3326_v0 = vld [vmem:[#allocation2 + $0x78] sm:$0xff] }
 0x1b4   : > { %4004 = vmatprep.subr.msk.bf16.mxu0 %vm3333_vm15, %v3326_v0 }
 0x1b6   : > { %v3318_v35 = vld [vmem:[#allocation2 + $0x38] sm:$0xff] }
 0x1b7   : > { %v3359_v36 = vsel %vm3333_vm15, %v3318_v35, 0 }
 0x1b8   : > { %3994 = vmatpush3.bf16.xpose.msra.mxu0 %v3359_v36 }
 0x1bf   : > { %3996 = vmatmul.mubr.msk.bf16.vlgmr.msra.gmra.mrb[0].mxu0 %vm3333_vm15, %v5162_v53  ;;  %v3331_v37 = vpop.permute.xlu0 %3330 }
 0x292   : > { %v3419_v38 = vpop.f32.mrb[0].mxu0 }
 0x293   : > { %v3420_v39 = vadd.f32 %v3419_v38, %v3331_v37  ;;  %v3421_v40 = vpop.f32.mrb[1].mxu0 }
 0x294   : > { %v3422_v41 = vadd.f32 %v3421_v40, %v3331_v37  ;;  %v3423_v42 = vpop.f32.mrb[2].mxu0 }
 0x295   : > { %3426 = vst [vmem:[%s192_s8] sm:$0xff] %v3420_v39  ;;  %v3424_v43 = vpop.f32.mrb[3].mxu0 }
 0x296   : > { %3427 = vst [vmem:[%s192_s8 + $0x8] sm:$0xff] %v3422_v41 }
 0x297 PF: > { %s13_s14 = sadd.s32 1, %s4110_s14   ;;  %s5255_s12 = smov %s4106_s13 }
 0x298   : > { %p10_p5 = scmp.ge.s32.totalorder %s13_s14, 4   ;;  %s5256_s13 = smov %s5258_s15 }
 0x29a   :  { %12 = sbr.rel (!%p10_p5) target bundleno = 2 (0x2), region = 65 }

</bundles_post_ra>
